<compile_context>
chip_gen: v7x
topology: tpu7x:2x2x1
jax: 0.10.0
libtpu: 0.0.40
codegen_flags: <defaults>
</compile_context>

<pallas_src>
import functools

import jax
import jax.numpy as jnp
from jax import lax
from jax.experimental import pallas as pl
from jax.experimental.pallas import tpu as pltpu

NEG_SLOPE = 0.01  # F.leaky_relu default


def _leaky_relu(x):
    return jnp.maximum(x, NEG_SLOPE * x)


def _round_up(x, m):
    return (x + m - 1) // m * m


def indexes_embed_kernel(idx_ref, table_ref, wp_ref, bp_ref, wm_ref, bm_ref,
                         wo_ref, bo_ref, o_ref, emb_ref):
    block_b, P = idx_ref.shape
    C_pad, E = table_ref.shape
    D_pad = wp_ref.shape[1]
    D = P * E

    idx = idx_ref[...]                                            # [block_b, P] i32
    table = table_ref[...]                                        # [C_pad, E]  bf16
    lane = lax.broadcasted_iota(jnp.int32, (block_b, C_pad), 1)   # column ids (hoisted)

    # Padded tail lanes of the gather scratch are never written below; zero
    # them every step (scratch is uninitialized, and grid steps may run on
    # different cores, so don't gate this on program_id == 0).
    emb_ref[:, D:] = jnp.zeros((block_b, D_pad - D), jnp.bfloat16)

    # MXU "gather": onehot(idx[:, p]) @ table -> emb_p, stored at lane offset
    # p*E.  One-hot built directly in bf16 (exact); emb_p's live range ends at
    # its store, so no large f32 accumulator survives across positions.
    for p in range(P):                                            # static unroll (P=15)
        oh = (idx[:, p:p + 1] == lane).astype(jnp.bfloat16)       # [block_b, C_pad]
        emb_p = jnp.dot(oh, table, preferred_element_type=jnp.float32)
        emb_ref[:, p * E:(p + 1) * E] = emb_p.astype(jnp.bfloat16)

    # Single full-depth (K = D_pad) project matmul, then the small MLP.
    # bf16 operands, f32 accumulate, f32 bias add.
    h = _leaky_relu(jnp.dot(emb_ref[...], wp_ref[...],
                            preferred_element_type=jnp.float32) + bp_ref[...])
    m = _leaky_relu(jnp.dot(h.astype(jnp.bfloat16), wm_ref[...],
                            preferred_element_type=jnp.float32) + bm_ref[...])
    out = _leaky_relu(jnp.dot(m.astype(jnp.bfloat16), wo_ref[...],
                              preferred_element_type=jnp.float32) + bo_ref[...])
    o_ref[...] = out


@functools.partial(jax.jit, static_argnames=("block_b",))
def indexes_embed_forward(indices, kparams, *, block_b=None):
    """indices: [B, P] int; kparams: padded bf16/f32 weights (see pack_params)."""
    B, P = indices.shape
    E = kparams["wo"].shape[1]
    D_pad = kparams["wp"].shape[1]

    if block_b is None:
        # <=128 rows per step: matches the 128-row MXU / single-vst path on
        # v5e and guarantees >=2 "parallel" grid steps for v7x megacore when
        # B > 128.  (On v6e, 256 is also fine; sweep if it matters.)
        block_b = min(_round_up(B, 8), 128)
    nb = pl.cdiv(B, block_b)
    B_pad = nb * block_b

    idx = indices.astype(jnp.int32)
    if B_pad != B:
        idx = jnp.pad(idx, ((0, B_pad - B), (0, 0)))   # pad rows use padding_idx=0

    def full(arr):  # whole-array block, constant index_map -> stays VMEM-resident
        return pl.BlockSpec(arr.shape, lambda i: (0,) * arr.ndim)

    out = pl.pallas_call(
        indexes_embed_kernel,
        out_shape=jax.ShapeDtypeStruct((B_pad, E), jnp.float32),
        grid_spec=pltpu.PrefetchScalarGridSpec(
            num_scalar_prefetch=0,
            grid=(nb,),
            in_specs=[
                pl.BlockSpec((block_b, P), lambda i: (i, 0)),   # index tile
                full(kparams["table"]),                         # [C_pad, E]   bf16
                full(kparams["wp"]),                            # [D_pad, D_pad] bf16
                full(kparams["bp"]),                            # [1, D_pad]   f32
                full(kparams["wm"]),                            # [D_pad, H]   bf16
                full(kparams["bm"]),                            # [1, H]       f32
                full(kparams["wo"]),                            # [H, E]       bf16
                full(kparams["bo"]),                            # [1, E]       f32
            ],
            out_specs=pl.BlockSpec((block_b, E), lambda i: (i, 0)),
            scratch_shapes=[pltpu.VMEM((block_b, D_pad), jnp.bfloat16)],
        ),
        compiler_params=pltpu.CompilerParams(
            dimension_semantics=("parallel",)),
    )(idx, kparams["table"], kparams["wp"], kparams["bp"],
      kparams["wm"], kparams["bm"], kparams["wo"], kparams["bo"])
    return out[:B]


def init_params(key, *, embed_size=32, columns=600, position_num=15, hid_dim=256):
    """Raw (unpadded, f32) params mimicking PyTorch defaults.

    Embedding: N(0,1) with row 0 zeroed (padding_idx=0).
    Linear: U[-1/sqrt(fan_in), 1/sqrt(fan_in)]; weights stored [in, out]."""
    D = embed_size * position_num
    ks = jax.random.split(key, 7)

    table = jax.random.normal(ks[0], (columns, embed_size), jnp.float32)
    table = table.at[0].set(0.0)

    def linear(kw, kb, fan_in, fan_out):
        bound = 1.0 / jnp.sqrt(jnp.float32(fan_in))
        w = jax.random.uniform(kw, (fan_in, fan_out), jnp.float32, -bound, bound)
        b = jax.random.uniform(kb, (1, fan_out), jnp.float32, -bound, bound)
        return w, b

    wp, bp = linear(ks[1], ks[2], D, D)
    wm, bm = linear(ks[3], ks[4], D, hid_dim)
    wo, bo = linear(ks[5], ks[6], hid_dim, embed_size)
    return {"table": table, "wp": wp, "bp": bp, "wm": wm, "bm": bm,
            "wo": wo, "bo": bo}


def pack_params(raw):
    """Pad to lane-aligned sizes and cast matmul operands to bf16."""
    table = raw["table"]
    wp = raw["wp"]
    wm = raw["wm"]
    C, E = table.shape
    D = wp.shape[0]
    H = wm.shape[1]
    C_pad = _round_up(C, 128)          # 600 -> 640
    D_pad = _round_up(D, 128)          # 480 -> 512

    table_p = jnp.zeros((C_pad, E), jnp.float32).at[:C].set(table)
    # project: zero-pad both dims (padded h columns come out exactly zero)
    wp_p = jnp.zeros((D_pad, D_pad), jnp.float32).at[:D, :D].set(wp)
    bp_p = jnp.zeros((1, D_pad), jnp.float32).at[:, :D].set(raw["bp"])
    # mid1: zero-pad in-dim so padded h columns contribute nothing
    wm_p = jnp.zeros((D_pad, H), jnp.float32).at[:D].set(wm)

    return {
        "table": table_p.astype(jnp.bfloat16),
        "wp": wp_p.astype(jnp.bfloat16),
        "bp": bp_p,                                  # f32 bias
        "wm": wm_p.astype(jnp.bfloat16),
        "bm": raw["bm"],                             # f32 bias
        "wo": raw["wo"].astype(jnp.bfloat16),
        "bo": raw["bo"],                             # f32 bias
    }


def indexes_embed_reference(indices, raw):
    emb = raw["table"][indices]                      # [B, P, E]
    x = emb.reshape(indices.shape[0], -1)            # [B, P*E]
    h = jax.nn.leaky_relu(x @ raw["wp"] + raw["bp"], NEG_SLOPE)
    m = jax.nn.leaky_relu(h @ raw["wm"] + raw["bm"], NEG_SLOPE)
    return jax.nn.leaky_relu(m @ raw["wo"] + raw["bo"], NEG_SLOPE)


if __name__ == "__main__":
    key = jax.random.PRNGKey(0)
    k_idx, k_p = jax.random.split(key)

    B, E, C, P, H = 16, 32, 600, 15, 256   # module defaults, small batch
    indices = jax.random.randint(k_idx, (B, P), 0, C, dtype=jnp.int32)

    raw = init_params(k_p, embed_size=E, columns=C, position_num=P, hid_dim=H)
    kparams = pack_params(raw)

    out = jax.block_until_ready(indexes_embed_forward(indices, kparams))
    ref = indexes_embed_reference(indices, raw)

    assert out.shape == (B, E)
    # bf16 MXU operands -> looser tolerance vs the f32 reference.
    assert jnp.allclose(out, ref, atol=2e-2, rtol=2e-2), (
        "mismatch vs reference, max abs diff = "
        f"{float(jnp.max(jnp.abs(out - ref)))}")

    print("KERNEL_OK")
</pallas_src>

<mosaic_0001>
module attributes {stable_mosaic.version = 11 : i64} {
  func.func @indexes_embed_kernel(%arg0: i32, %arg1: memref<16x15xi32, #tpu.memory_space<vmem>>, %arg2: memref<640x32xbf16, #tpu.memory_space<vmem>>, %arg3: memref<512x512xbf16, #tpu.memory_space<vmem>>, %arg4: memref<1x512xf32, #tpu.memory_space<vmem>>, %arg5: memref<512x256xbf16, #tpu.memory_space<vmem>>, %arg6: memref<1x256xf32, #tpu.memory_space<vmem>>, %arg7: memref<256x32xbf16, #tpu.memory_space<vmem>>, %arg8: memref<1x32xf32, #tpu.memory_space<vmem>>, %arg9: memref<16x32xf32, #tpu.memory_space<vmem>>, %arg10: memref<16x512xbf16, #tpu.memory_space<vmem>>) attributes {dimension_semantics = [#tpu.dimension_semantics<parallel>], iteration_bounds = array<i64: 1>, scalar_prefetch = 0 : i64, scratch_operands = 1 : i64, tpu.core_type = #tpu.core_type<tc>, window_params = [{transform_indices = @transform_0, window_bounds = array<i64: 16, 15>}, {pipeline_mode = #tpu.pipeline_mode<synchronous>, transform_indices = @transform_1, window_bounds = array<i64: 640, 32>}, {pipeline_mode = #tpu.pipeline_mode<synchronous>, transform_indices = @transform_2, window_bounds = array<i64: 512, 512>}, {pipeline_mode = #tpu.pipeline_mode<synchronous>, transform_indices = @transform_3, window_bounds = array<i64: 1, 512>}, {pipeline_mode = #tpu.pipeline_mode<synchronous>, transform_indices = @transform_4, window_bounds = array<i64: 512, 256>}, {pipeline_mode = #tpu.pipeline_mode<synchronous>, transform_indices = @transform_5, window_bounds = array<i64: 1, 256>}, {pipeline_mode = #tpu.pipeline_mode<synchronous>, transform_indices = @transform_6, window_bounds = array<i64: 256, 32>}, {pipeline_mode = #tpu.pipeline_mode<synchronous>, transform_indices = @transform_7, window_bounds = array<i64: 1, 32>}, {transform_indices = @transform_8, window_bounds = array<i64: 16, 32>}]} {
    %c0 = arith.constant 0 : index
    %c0_0 = arith.constant 0 : index
    %0 = vector.load %arg1[%c0, %c0_0] : memref<16x15xi32, #tpu.memory_space<vmem>>, vector<16x15xi32>
    %c0_1 = arith.constant 0 : index
    %c0_2 = arith.constant 0 : index
    %1 = vector.load %arg2[%c0_1, %c0_2] : memref<640x32xbf16, #tpu.memory_space<vmem>>, vector<640x32xbf16>
    %2 = tpu.iota {dimensions = array<i32: 1>} : vector<16x640xi32>
    %cst = arith.constant 0.000000e+00 : bf16
    %3 = vector.broadcast %cst : bf16 to vector<16x32xbf16>
    %c0_3 = arith.constant 0 : index
    %c480 = arith.constant 480 : index
    %4 = vector.load %arg10[%c0_3, %c480] : memref<16x512xbf16, #tpu.memory_space<vmem>>, vector<16x32xbf16>
    tpu.vector_store %arg10[%c0_3, %c480], %3 {strides = array<i32>} : memref<16x512xbf16, #tpu.memory_space<vmem>>, vector<16x32xbf16>,
    %5 = vector.extract_strided_slice %0 {offsets = [0, 0], sizes = [16, 1], strides = [1, 1]} : vector<16x15xi32> to vector<16x1xi32>
    %6 = vector.broadcast %5 : vector<16x1xi32> to vector<16x640xi32>
    %7 = arith.cmpi eq, %6, %2 : vector<16x640xi32>
    %8 = arith.extui %7 : vector<16x640xi1> to vector<16x640xi32>
    %9 = arith.sitofp %8 : vector<16x640xi32> to vector<16x640xf32>
    %10 = arith.truncf %9 : vector<16x640xf32> to vector<16x640xbf16>
    %cst_4 = arith.constant dense<0.000000e+00> : vector<16x32xf32>
    %11 = tpu.matmul %10, %1, %cst_4 {dimension_numbers = #tpu.dot_dimension_numbers<[1], [0], [0], [1], [0, 0, 1, 1], [], []>} : vector<16x640xbf16>, vector<640x32xbf16>, vector<16x32xf32> -> vector<16x32xf32>
    %12 = arith.truncf %11 : vector<16x32xf32> to vector<16x32xbf16>
    %c0_5 = arith.constant 0 : index
    %c0_6 = arith.constant 0 : index
    %13 = vector.load %arg10[%c0_5, %c0_6] : memref<16x512xbf16, #tpu.memory_space<vmem>>, vector<16x32xbf16>
    tpu.vector_store %arg10[%c0_5, %c0_6], %12 {strides = array<i32>} : memref<16x512xbf16, #tpu.memory_space<vmem>>, vector<16x32xbf16>,
    %14 = vector.extract_strided_slice %0 {offsets = [0, 1], sizes = [16, 1], strides = [1, 1]} : vector<16x15xi32> to vector<16x1xi32>
    %15 = vector.broadcast %14 : vector<16x1xi32> to vector<16x640xi32>
    %16 = arith.cmpi eq, %15, %2 : vector<16x640xi32>
    %17 = arith.extui %16 : vector<16x640xi1> to vector<16x640xi32>
    %18 = arith.sitofp %17 : vector<16x640xi32> to vector<16x640xf32>
    %19 = arith.truncf %18 : vector<16x640xf32> to vector<16x640xbf16>
    %cst_7 = arith.constant dense<0.000000e+00> : vector<16x32xf32>
    %20 = tpu.matmul %19, %1, %cst_7 {dimension_numbers = #tpu.dot_dimension_numbers<[1], [0], [0], [1], [0, 0, 1, 1], [], []>} : vector<16x640xbf16>, vector<640x32xbf16>, vector<16x32xf32> -> vector<16x32xf32>
    %21 = arith.truncf %20 : vector<16x32xf32> to vector<16x32xbf16>
    %c0_8 = arith.constant 0 : index
    %c32 = arith.constant 32 : index
    %22 = vector.load %arg10[%c0_8, %c32] : memref<16x512xbf16, #tpu.memory_space<vmem>>, vector<16x32xbf16>
    tpu.vector_store %arg10[%c0_8, %c32], %21 {strides = array<i32>} : memref<16x512xbf16, #tpu.memory_space<vmem>>, vector<16x32xbf16>,
    %23 = vector.extract_strided_slice %0 {offsets = [0, 2], sizes = [16, 1], strides = [1, 1]} : vector<16x15xi32> to vector<16x1xi32>
    %24 = vector.broadcast %23 : vector<16x1xi32> to vector<16x640xi32>
    %25 = arith.cmpi eq, %24, %2 : vector<16x640xi32>
    %26 = arith.extui %25 : vector<16x640xi1> to vector<16x640xi32>
    %27 = arith.sitofp %26 : vector<16x640xi32> to vector<16x640xf32>
    %28 = arith.truncf %27 : vector<16x640xf32> to vector<16x640xbf16>
    %cst_9 = arith.constant dense<0.000000e+00> : vector<16x32xf32>
    %29 = tpu.matmul %28, %1, %cst_9 {dimension_numbers = #tpu.dot_dimension_numbers<[1], [0], [0], [1], [0, 0, 1, 1], [], []>} : vector<16x640xbf16>, vector<640x32xbf16>, vector<16x32xf32> -> vector<16x32xf32>
    %30 = arith.truncf %29 : vector<16x32xf32> to vector<16x32xbf16>
    %c0_10 = arith.constant 0 : index
    %c64 = arith.constant 64 : index
    %31 = vector.load %arg10[%c0_10, %c64] : memref<16x512xbf16, #tpu.memory_space<vmem>>, vector<16x32xbf16>
    tpu.vector_store %arg10[%c0_10, %c64], %30 {strides = array<i32>} : memref<16x512xbf16, #tpu.memory_space<vmem>>, vector<16x32xbf16>,
    %32 = vector.extract_strided_slice %0 {offsets = [0, 3], sizes = [16, 1], strides = [1, 1]} : vector<16x15xi32> to vector<16x1xi32>
    %33 = vector.broadcast %32 : vector<16x1xi32> to vector<16x640xi32>
    %34 = arith.cmpi eq, %33, %2 : vector<16x640xi32>
    %35 = arith.extui %34 : vector<16x640xi1> to vector<16x640xi32>
    %36 = arith.sitofp %35 : vector<16x640xi32> to vector<16x640xf32>
    %37 = arith.truncf %36 : vector<16x640xf32> to vector<16x640xbf16>
    %cst_11 = arith.constant dense<0.000000e+00> : vector<16x32xf32>
    %38 = tpu.matmul %37, %1, %cst_11 {dimension_numbers = #tpu.dot_dimension_numbers<[1], [0], [0], [1], [0, 0, 1, 1], [], []>} : vector<16x640xbf16>, vector<640x32xbf16>, vector<16x32xf32> -> vector<16x32xf32>
    %39 = arith.truncf %38 : vector<16x32xf32> to vector<16x32xbf16>
    %c0_12 = arith.constant 0 : index
    %c96 = arith.constant 96 : index
    %40 = vector.load %arg10[%c0_12, %c96] : memref<16x512xbf16, #tpu.memory_space<vmem>>, vector<16x32xbf16>
    tpu.vector_store %arg10[%c0_12, %c96], %39 {strides = array<i32>} : memref<16x512xbf16, #tpu.memory_space<vmem>>, vector<16x32xbf16>,
    %41 = vector.extract_strided_slice %0 {offsets = [0, 4], sizes = [16, 1], strides = [1, 1]} : vector<16x15xi32> to vector<16x1xi32>
    %42 = vector.broadcast %41 : vector<16x1xi32> to vector<16x640xi32>
    %43 = arith.cmpi eq, %42, %2 : vector<16x640xi32>
    %44 = arith.extui %43 : vector<16x640xi1> to vector<16x640xi32>
    %45 = arith.sitofp %44 : vector<16x640xi32> to vector<16x640xf32>
    %46 = arith.truncf %45 : vector<16x640xf32> to vector<16x640xbf16>
    %cst_13 = arith.constant dense<0.000000e+00> : vector<16x32xf32>
    %47 = tpu.matmul %46, %1, %cst_13 {dimension_numbers = #tpu.dot_dimension_numbers<[1], [0], [0], [1], [0, 0, 1, 1], [], []>} : vector<16x640xbf16>, vector<640x32xbf16>, vector<16x32xf32> -> vector<16x32xf32>
    %48 = arith.truncf %47 : vector<16x32xf32> to vector<16x32xbf16>
    %c0_14 = arith.constant 0 : index
    %c128 = arith.constant 128 : index
    %49 = vector.load %arg10[%c0_14, %c128] : memref<16x512xbf16, #tpu.memory_space<vmem>>, vector<16x32xbf16>
    tpu.vector_store %arg10[%c0_14, %c128], %48 {strides = array<i32>} : memref<16x512xbf16, #tpu.memory_space<vmem>>, vector<16x32xbf16>,
    %50 = vector.extract_strided_slice %0 {offsets = [0, 5], sizes = [16, 1], strides = [1, 1]} : vector<16x15xi32> to vector<16x1xi32>
    %51 = vector.broadcast %50 : vector<16x1xi32> to vector<16x640xi32>
    %52 = arith.cmpi eq, %51, %2 : vector<16x640xi32>
    %53 = arith.extui %52 : vector<16x640xi1> to vector<16x640xi32>
    %54 = arith.sitofp %53 : vector<16x640xi32> to vector<16x640xf32>
    %55 = arith.truncf %54 : vector<16x640xf32> to vector<16x640xbf16>
    %cst_15 = arith.constant dense<0.000000e+00> : vector<16x32xf32>
    %56 = tpu.matmul %55, %1, %cst_15 {dimension_numbers = #tpu.dot_dimension_numbers<[1], [0], [0], [1], [0, 0, 1, 1], [], []>} : vector<16x640xbf16>, vector<640x32xbf16>, vector<16x32xf32> -> vector<16x32xf32>
    %57 = arith.truncf %56 : vector<16x32xf32> to vector<16x32xbf16>
    %c0_16 = arith.constant 0 : index
    %c160 = arith.constant 160 : index
    %58 = vector.load %arg10[%c0_16, %c160] : memref<16x512xbf16, #tpu.memory_space<vmem>>, vector<16x32xbf16>
    tpu.vector_store %arg10[%c0_16, %c160], %57 {strides = array<i32>} : memref<16x512xbf16, #tpu.memory_space<vmem>>, vector<16x32xbf16>,
    %59 = vector.extract_strided_slice %0 {offsets = [0, 6], sizes = [16, 1], strides = [1, 1]} : vector<16x15xi32> to vector<16x1xi32>
    %60 = vector.broadcast %59 : vector<16x1xi32> to vector<16x640xi32>
    %61 = arith.cmpi eq, %60, %2 : vector<16x640xi32>
    %62 = arith.extui %61 : vector<16x640xi1> to vector<16x640xi32>
    %63 = arith.sitofp %62 : vector<16x640xi32> to vector<16x640xf32>
    %64 = arith.truncf %63 : vector<16x640xf32> to vector<16x640xbf16>
    %cst_17 = arith.constant dense<0.000000e+00> : vector<16x32xf32>
    %65 = tpu.matmul %64, %1, %cst_17 {dimension_numbers = #tpu.dot_dimension_numbers<[1], [0], [0], [1], [0, 0, 1, 1], [], []>} : vector<16x640xbf16>, vector<640x32xbf16>, vector<16x32xf32> -> vector<16x32xf32>
    %66 = arith.truncf %65 : vector<16x32xf32> to vector<16x32xbf16>
    %c0_18 = arith.constant 0 : index
    %c192 = arith.constant 192 : index
    %67 = vector.load %arg10[%c0_18, %c192] : memref<16x512xbf16, #tpu.memory_space<vmem>>, vector<16x32xbf16>
    tpu.vector_store %arg10[%c0_18, %c192], %66 {strides = array<i32>} : memref<16x512xbf16, #tpu.memory_space<vmem>>, vector<16x32xbf16>,
    %68 = vector.extract_strided_slice %0 {offsets = [0, 7], sizes = [16, 1], strides = [1, 1]} : vector<16x15xi32> to vector<16x1xi32>
    %69 = vector.broadcast %68 : vector<16x1xi32> to vector<16x640xi32>
    %70 = arith.cmpi eq, %69, %2 : vector<16x640xi32>
    %71 = arith.extui %70 : vector<16x640xi1> to vector<16x640xi32>
    %72 = arith.sitofp %71 : vector<16x640xi32> to vector<16x640xf32>
    %73 = arith.truncf %72 : vector<16x640xf32> to vector<16x640xbf16>
    %cst_19 = arith.constant dense<0.000000e+00> : vector<16x32xf32>
    %74 = tpu.matmul %73, %1, %cst_19 {dimension_numbers = #tpu.dot_dimension_numbers<[1], [0], [0], [1], [0, 0, 1, 1], [], []>} : vector<16x640xbf16>, vector<640x32xbf16>, vector<16x32xf32> -> vector<16x32xf32>
    %75 = arith.truncf %74 : vector<16x32xf32> to vector<16x32xbf16>
    %c0_20 = arith.constant 0 : index
    %c224 = arith.constant 224 : index
    %76 = vector.load %arg10[%c0_20, %c224] : memref<16x512xbf16, #tpu.memory_space<vmem>>, vector<16x32xbf16>
    tpu.vector_store %arg10[%c0_20, %c224], %75 {strides = array<i32>} : memref<16x512xbf16, #tpu.memory_space<vmem>>, vector<16x32xbf16>,
    %77 = vector.extract_strided_slice %0 {offsets = [0, 8], sizes = [16, 1], strides = [1, 1]} : vector<16x15xi32> to vector<16x1xi32>
    %78 = vector.broadcast %77 : vector<16x1xi32> to vector<16x640xi32>
    %79 = arith.cmpi eq, %78, %2 : vector<16x640xi32>
    %80 = arith.extui %79 : vector<16x640xi1> to vector<16x640xi32>
    %81 = arith.sitofp %80 : vector<16x640xi32> to vector<16x640xf32>
    %82 = arith.truncf %81 : vector<16x640xf32> to vector<16x640xbf16>
    %cst_21 = arith.constant dense<0.000000e+00> : vector<16x32xf32>
    %83 = tpu.matmul %82, %1, %cst_21 {dimension_numbers = #tpu.dot_dimension_numbers<[1], [0], [0], [1], [0, 0, 1, 1], [], []>} : vector<16x640xbf16>, vector<640x32xbf16>, vector<16x32xf32> -> vector<16x32xf32>
    %84 = arith.truncf %83 : vector<16x32xf32> to vector<16x32xbf16>
    %c0_22 = arith.constant 0 : index
    %c256 = arith.constant 256 : index
    %85 = vector.load %arg10[%c0_22, %c256] : memref<16x512xbf16, #tpu.memory_space<vmem>>, vector<16x32xbf16>
    tpu.vector_store %arg10[%c0_22, %c256], %84 {strides = array<i32>} : memref<16x512xbf16, #tpu.memory_space<vmem>>, vector<16x32xbf16>,
    %86 = vector.extract_strided_slice %0 {offsets = [0, 9], sizes = [16, 1], strides = [1, 1]} : vector<16x15xi32> to vector<16x1xi32>
    %87 = vector.broadcast %86 : vector<16x1xi32> to vector<16x640xi32>
    %88 = arith.cmpi eq, %87, %2 : vector<16x640xi32>
    %89 = arith.extui %88 : vector<16x640xi1> to vector<16x640xi32>
    %90 = arith.sitofp %89 : vector<16x640xi32> to vector<16x640xf32>
    %91 = arith.truncf %90 : vector<16x640xf32> to vector<16x640xbf16>
    %cst_23 = arith.constant dense<0.000000e+00> : vector<16x32xf32>
    %92 = tpu.matmul %91, %1, %cst_23 {dimension_numbers = #tpu.dot_dimension_numbers<[1], [0], [0], [1], [0, 0, 1, 1], [], []>} : vector<16x640xbf16>, vector<640x32xbf16>, vector<16x32xf32> -> vector<16x32xf32>
    %93 = arith.truncf %92 : vector<16x32xf32> to vector<16x32xbf16>
    %c0_24 = arith.constant 0 : index
    %c288 = arith.constant 288 : index
    %94 = vector.load %arg10[%c0_24, %c288] : memref<16x512xbf16, #tpu.memory_space<vmem>>, vector<16x32xbf16>
    tpu.vector_store %arg10[%c0_24, %c288], %93 {strides = array<i32>} : memref<16x512xbf16, #tpu.memory_space<vmem>>, vector<16x32xbf16>,
    %95 = vector.extract_strided_slice %0 {offsets = [0, 10], sizes = [16, 1], strides = [1, 1]} : vector<16x15xi32> to vector<16x1xi32>
    %96 = vector.broadcast %95 : vector<16x1xi32> to vector<16x640xi32>
    %97 = arith.cmpi eq, %96, %2 : vector<16x640xi32>
    %98 = arith.extui %97 : vector<16x640xi1> to vector<16x640xi32>
    %99 = arith.sitofp %98 : vector<16x640xi32> to vector<16x640xf32>
    %100 = arith.truncf %99 : vector<16x640xf32> to vector<16x640xbf16>
    %cst_25 = arith.constant dense<0.000000e+00> : vector<16x32xf32>
    %101 = tpu.matmul %100, %1, %cst_25 {dimension_numbers = #tpu.dot_dimension_numbers<[1], [0], [0], [1], [0, 0, 1, 1], [], []>} : vector<16x640xbf16>, vector<640x32xbf16>, vector<16x32xf32> -> vector<16x32xf32>
    %102 = arith.truncf %101 : vector<16x32xf32> to vector<16x32xbf16>
    %c0_26 = arith.constant 0 : index
    %c320 = arith.constant 320 : index
    %103 = vector.load %arg10[%c0_26, %c320] : memref<16x512xbf16, #tpu.memory_space<vmem>>, vector<16x32xbf16>
    tpu.vector_store %arg10[%c0_26, %c320], %102 {strides = array<i32>} : memref<16x512xbf16, #tpu.memory_space<vmem>>, vector<16x32xbf16>,
    %104 = vector.extract_strided_slice %0 {offsets = [0, 11], sizes = [16, 1], strides = [1, 1]} : vector<16x15xi32> to vector<16x1xi32>
    %105 = vector.broadcast %104 : vector<16x1xi32> to vector<16x640xi32>
    %106 = arith.cmpi eq, %105, %2 : vector<16x640xi32>
    %107 = arith.extui %106 : vector<16x640xi1> to vector<16x640xi32>
    %108 = arith.sitofp %107 : vector<16x640xi32> to vector<16x640xf32>
    %109 = arith.truncf %108 : vector<16x640xf32> to vector<16x640xbf16>
    %cst_27 = arith.constant dense<0.000000e+00> : vector<16x32xf32>
    %110 = tpu.matmul %109, %1, %cst_27 {dimension_numbers = #tpu.dot_dimension_numbers<[1], [0], [0], [1], [0, 0, 1, 1], [], []>} : vector<16x640xbf16>, vector<640x32xbf16>, vector<16x32xf32> -> vector<16x32xf32>
    %111 = arith.truncf %110 : vector<16x32xf32> to vector<16x32xbf16>
    %c0_28 = arith.constant 0 : index
    %c352 = arith.constant 352 : index
    %112 = vector.load %arg10[%c0_28, %c352] : memref<16x512xbf16, #tpu.memory_space<vmem>>, vector<16x32xbf16>
    tpu.vector_store %arg10[%c0_28, %c352], %111 {strides = array<i32>} : memref<16x512xbf16, #tpu.memory_space<vmem>>, vector<16x32xbf16>,
    %113 = vector.extract_strided_slice %0 {offsets = [0, 12], sizes = [16, 1], strides = [1, 1]} : vector<16x15xi32> to vector<16x1xi32>
    %114 = vector.broadcast %113 : vector<16x1xi32> to vector<16x640xi32>
    %115 = arith.cmpi eq, %114, %2 : vector<16x640xi32>
    %116 = arith.extui %115 : vector<16x640xi1> to vector<16x640xi32>
    %117 = arith.sitofp %116 : vector<16x640xi32> to vector<16x640xf32>
    %118 = arith.truncf %117 : vector<16x640xf32> to vector<16x640xbf16>
    %cst_29 = arith.constant dense<0.000000e+00> : vector<16x32xf32>
    %119 = tpu.matmul %118, %1, %cst_29 {dimension_numbers = #tpu.dot_dimension_numbers<[1], [0], [0], [1], [0, 0, 1, 1], [], []>} : vector<16x640xbf16>, vector<640x32xbf16>, vector<16x32xf32> -> vector<16x32xf32>
    %120 = arith.truncf %119 : vector<16x32xf32> to vector<16x32xbf16>
    %c0_30 = arith.constant 0 : index
    %c384 = arith.constant 384 : index
    %121 = vector.load %arg10[%c0_30, %c384] : memref<16x512xbf16, #tpu.memory_space<vmem>>, vector<16x32xbf16>
    tpu.vector_store %arg10[%c0_30, %c384], %120 {strides = array<i32>} : memref<16x512xbf16, #tpu.memory_space<vmem>>, vector<16x32xbf16>,
    %122 = vector.extract_strided_slice %0 {offsets = [0, 13], sizes = [16, 1], strides = [1, 1]} : vector<16x15xi32> to vector<16x1xi32>
    %123 = vector.broadcast %122 : vector<16x1xi32> to vector<16x640xi32>
    %124 = arith.cmpi eq, %123, %2 : vector<16x640xi32>
    %125 = arith.extui %124 : vector<16x640xi1> to vector<16x640xi32>
    %126 = arith.sitofp %125 : vector<16x640xi32> to vector<16x640xf32>
    %127 = arith.truncf %126 : vector<16x640xf32> to vector<16x640xbf16>
    %cst_31 = arith.constant dense<0.000000e+00> : vector<16x32xf32>
    %128 = tpu.matmul %127, %1, %cst_31 {dimension_numbers = #tpu.dot_dimension_numbers<[1], [0], [0], [1], [0, 0, 1, 1], [], []>} : vector<16x640xbf16>, vector<640x32xbf16>, vector<16x32xf32> -> vector<16x32xf32>
    %129 = arith.truncf %128 : vector<16x32xf32> to vector<16x32xbf16>
    %c0_32 = arith.constant 0 : index
    %c416 = arith.constant 416 : index
    %130 = vector.load %arg10[%c0_32, %c416] : memref<16x512xbf16, #tpu.memory_space<vmem>>, vector<16x32xbf16>
    tpu.vector_store %arg10[%c0_32, %c416], %129 {strides = array<i32>} : memref<16x512xbf16, #tpu.memory_space<vmem>>, vector<16x32xbf16>,
    %131 = vector.extract_strided_slice %0 {offsets = [0, 14], sizes = [16, 1], strides = [1, 1]} : vector<16x15xi32> to vector<16x1xi32>
    %132 = vector.broadcast %131 : vector<16x1xi32> to vector<16x640xi32>
    %133 = arith.cmpi eq, %132, %2 : vector<16x640xi32>
    %134 = arith.extui %133 : vector<16x640xi1> to vector<16x640xi32>
    %135 = arith.sitofp %134 : vector<16x640xi32> to vector<16x640xf32>
    %136 = arith.truncf %135 : vector<16x640xf32> to vector<16x640xbf16>
    %cst_33 = arith.constant dense<0.000000e+00> : vector<16x32xf32>
    %137 = tpu.matmul %136, %1, %cst_33 {dimension_numbers = #tpu.dot_dimension_numbers<[1], [0], [0], [1], [0, 0, 1, 1], [], []>} : vector<16x640xbf16>, vector<640x32xbf16>, vector<16x32xf32> -> vector<16x32xf32>
    %138 = arith.truncf %137 : vector<16x32xf32> to vector<16x32xbf16>
    %c0_34 = arith.constant 0 : index
    %c448 = arith.constant 448 : index
    %139 = vector.load %arg10[%c0_34, %c448] : memref<16x512xbf16, #tpu.memory_space<vmem>>, vector<16x32xbf16>
    tpu.vector_store %arg10[%c0_34, %c448], %138 {strides = array<i32>} : memref<16x512xbf16, #tpu.memory_space<vmem>>, vector<16x32xbf16>,
    %c0_35 = arith.constant 0 : index
    %c0_36 = arith.constant 0 : index
    %140 = vector.load %arg10[%c0_35, %c0_36] : memref<16x512xbf16, #tpu.memory_space<vmem>>, vector<16x512xbf16>
    %c0_37 = arith.constant 0 : index
    %c0_38 = arith.constant 0 : index
    %141 = vector.load %arg3[%c0_37, %c0_38] : memref<512x512xbf16, #tpu.memory_space<vmem>>, vector<512x512xbf16>
    %cst_39 = arith.constant dense<0.000000e+00> : vector<16x512xf32>
    %142 = tpu.matmul %140, %141, %cst_39 {dimension_numbers = #tpu.dot_dimension_numbers<[1], [0], [0], [1], [0, 0, 1, 1], [], []>} : vector<16x512xbf16>, vector<512x512xbf16>, vector<16x512xf32> -> vector<16x512xf32>
    %c0_40 = arith.constant 0 : index
    %c0_41 = arith.constant 0 : index
    %143 = vector.load %arg4[%c0_40, %c0_41] : memref<1x512xf32, #tpu.memory_space<vmem>>, vector<1x512xf32>
    %144 = vector.broadcast %143 : vector<1x512xf32> to vector<16x512xf32>
    %145 = arith.addf %142, %144 : vector<16x512xf32>
    %cst_42 = arith.constant 0.00999999977 : f32
    %146 = vector.broadcast %cst_42 : f32 to vector<16x512xf32>
    %147 = arith.mulf %146, %145 : vector<16x512xf32>
    %148 = arith.maximumf %145, %147 : vector<16x512xf32>
    %149 = arith.truncf %148 : vector<16x512xf32> to vector<16x512xbf16>
    %c0_43 = arith.constant 0 : index
    %c0_44 = arith.constant 0 : index
    %150 = vector.load %arg5[%c0_43, %c0_44] : memref<512x256xbf16, #tpu.memory_space<vmem>>, vector<512x256xbf16>
    %cst_45 = arith.constant dense<0.000000e+00> : vector<16x256xf32>
    %151 = tpu.matmul %149, %150, %cst_45 {dimension_numbers = #tpu.dot_dimension_numbers<[1], [0], [0], [1], [0, 0, 1, 1], [], []>} : vector<16x512xbf16>, vector<512x256xbf16>, vector<16x256xf32> -> vector<16x256xf32>
    %c0_46 = arith.constant 0 : index
    %c0_47 = arith.constant 0 : index
    %152 = vector.load %arg6[%c0_46, %c0_47] : memref<1x256xf32, #tpu.memory_space<vmem>>, vector<1x256xf32>
    %153 = vector.broadcast %152 : vector<1x256xf32> to vector<16x256xf32>
    %154 = arith.addf %151, %153 : vector<16x256xf32>
    %cst_48 = arith.constant 0.00999999977 : f32
    %155 = vector.broadcast %cst_48 : f32 to vector<16x256xf32>
    %156 = arith.mulf %155, %154 : vector<16x256xf32>
    %157 = arith.maximumf %154, %156 : vector<16x256xf32>
    %158 = arith.truncf %157 : vector<16x256xf32> to vector<16x256xbf16>
    %c0_49 = arith.constant 0 : index
    %c0_50 = arith.constant 0 : index
    %159 = vector.load %arg7[%c0_49, %c0_50] : memref<256x32xbf16, #tpu.memory_space<vmem>>, vector<256x32xbf16>
    %cst_51 = arith.constant dense<0.000000e+00> : vector<16x32xf32>
    %160 = tpu.matmul %158, %159, %cst_51 {dimension_numbers = #tpu.dot_dimension_numbers<[1], [0], [0], [1], [0, 0, 1, 1], [], []>} : vector<16x256xbf16>, vector<256x32xbf16>, vector<16x32xf32> -> vector<16x32xf32>
    %c0_52 = arith.constant 0 : index
    %c0_53 = arith.constant 0 : index
    %161 = vector.load %arg8[%c0_52, %c0_53] : memref<1x32xf32, #tpu.memory_space<vmem>>, vector<1x32xf32>
    %162 = vector.broadcast %161 : vector<1x32xf32> to vector<16x32xf32>
    %163 = arith.addf %160, %162 : vector<16x32xf32>
    %cst_54 = arith.constant 0.00999999977 : f32
    %164 = vector.broadcast %cst_54 : f32 to vector<16x32xf32>
    %165 = arith.mulf %164, %163 : vector<16x32xf32>
    %166 = arith.maximumf %163, %165 : vector<16x32xf32>
    %c0_55 = arith.constant 0 : index
    %c0_56 = arith.constant 0 : index
    %167 = vector.load %arg9[%c0_55, %c0_56] : memref<16x32xf32, #tpu.memory_space<vmem>>, vector<16x32xf32>
    tpu.vector_store %arg9[%c0_55, %c0_56], %166 {strides = array<i32>} : memref<16x32xf32, #tpu.memory_space<vmem>>, vector<16x32xf32>,
    return
  }
  func.func @transform_0(%arg0: i32) -> (i32, i32) {
    %c0_i32 = arith.constant 0 : i32
    %c0_i32_0 = arith.constant 0 : i32
    return %arg0, %c0_i32 : i32, i32
  }
  func.func @transform_1(%arg0: i32) -> (i32, i32) {
    %c0_i32 = arith.constant 0 : i32
    %c0_i32_0 = arith.constant 0 : i32
    %c0_i32_1 = arith.constant 0 : i32
    return %c0_i32, %c0_i32_0 : i32, i32
  }
  func.func @transform_2(%arg0: i32) -> (i32, i32) {
    %c0_i32 = arith.constant 0 : i32
    %c0_i32_0 = arith.constant 0 : i32
    %c0_i32_1 = arith.constant 0 : i32
    return %c0_i32, %c0_i32_0 : i32, i32
  }
  func.func @transform_3(%arg0: i32) -> (i32, i32) {
    %c0_i32 = arith.constant 0 : i32
    %c0_i32_0 = arith.constant 0 : i32
    %c0_i32_1 = arith.constant 0 : i32
    return %c0_i32, %c0_i32_0 : i32, i32
  }
  func.func @transform_4(%arg0: i32) -> (i32, i32) {
    %c0_i32 = arith.constant 0 : i32
    %c0_i32_0 = arith.constant 0 : i32
    %c0_i32_1 = arith.constant 0 : i32
    return %c0_i32, %c0_i32_0 : i32, i32
  }
  func.func @transform_5(%arg0: i32) -> (i32, i32) {
    %c0_i32 = arith.constant 0 : i32
    %c0_i32_0 = arith.constant 0 : i32
    %c0_i32_1 = arith.constant 0 : i32
    return %c0_i32, %c0_i32_0 : i32, i32
  }
  func.func @transform_6(%arg0: i32) -> (i32, i32) {
    %c0_i32 = arith.constant 0 : i32
    %c0_i32_0 = arith.constant 0 : i32
    %c0_i32_1 = arith.constant 0 : i32
    return %c0_i32, %c0_i32_0 : i32, i32
  }
  func.func @transform_7(%arg0: i32) -> (i32, i32) {
    %c0_i32 = arith.constant 0 : i32
    %c0_i32_0 = arith.constant 0 : i32
    %c0_i32_1 = arith.constant 0 : i32
    return %c0_i32, %c0_i32_0 : i32, i32
  }
  func.func @transform_8(%arg0: i32) -> (i32, i32) {
    %c0_i32 = arith.constant 0 : i32
    %c0_i32_0 = arith.constant 0 : i32
    return %arg0, %c0_i32 : i32, i32
  }
}

</mosaic_0001>

<bundles_post_ra>
// kernel: indexes_embed_forward.1
= control target key start
LH: loop header
LB: loop body
LE: loop exit
PB: predicated region body
PF: predicated region fallthrough
CT: control target
= control target key end

     0   :  { %13 = vsyncpa [#allocation4], 0  ;;  %s9275_s0 = inlined_call_operand.vmem [shape: s32[16,15], index: 0, kind: input, shape index: {}]   ;;  %s9276_s1 = inlined_call_operand.vmem [shape: bf16[640,32], index: 1, kind: input, shape index: {}]   ;;  %s9277_s2 = inlined_call_operand.hbm [shape: bf16[512,512], index: 2, kind: input, shape index: {}]   ;;  %s9278_s3 = inlined_call_operand.vmem [shape: f32[1,512], index: 3, kind: input, shape index: {}]   ;;  %s9279_s4 = inlined_call_operand.vmem [shape: bf16[512,256], index: 4, kind: input, shape index: {}]   ;;  %s9280_s5 = inlined_call_operand.vmem [shape: f32[1,256], index: 5, kind: input, shape index: {}]   ;;  %s9281_s6 = inlined_call_operand.vmem [shape: bf16[256,32], index: 6, kind: input, shape index: {}]   ;;  %s9282_s7 = inlined_call_operand.vmem [shape: f32[1,32], index: 7, kind: input, shape index: {}]   ;;  %s9283_s8 = inlined_call_operand.hbm [shape: f32[16,32], index: 8, kind: output, shape index: {}]  }
   0x1   :  { %14 = vsyncpa [#allocation5], 0  ;;  %s6822_s27 = smov [#allocation3]   ;;  %s6774_s9 = scalar_lea.hbm %s9277_s2, 16384 }
   0x2   :  { %s24_s28 = sshll.u32 %s6822_s27, 4  ;;  %p6775_p0 = scmp.ne.s32.totalorder %s9277_s2, %s6774_s9  ;;  %s25_s28 = int_to_ptr.vmem [resolvable:$true] %s24_s28 }
   0x3   :  { %p6778_p1 = scmp.lt.u32.totalorder %s6774_s9, %s9277_s2 }
   0x5   :  { %p6780_p2 = pnand %p6778_p1, %p6775_p0 }
   0x7   :  { %6783 = shalt.err (!%p6780_p2)
}
   0x8   :  { %s6784_s14 = scalar_lea.vmem %s25_s28, 16384  ;;  %p6789_p4 = scmp.lt.s32.totalorder %s25_s28, %s25_s28 }
   0x9   :  { %p6785_p3 = scmp.ne.s32.totalorder %s25_s28, %s6784_s14  ;;  %p6790_p5 = scmp.lt.s32.totalorder %s6784_s14, %s6784_s14 }
   0xb   :  { %p6791_p6 = por %p6790_p5, %p6789_p4 }
   0xd   :  { %p6792_p7 = pnand %p6791_p6, %p6785_p3 }
   0xf   :  { %6795 = shalt.err (!%p6792_p7)
}
  0x10   :  { %s6823_s15 = smov 256   ;;  %s6824_s16 = smov 16  }
  0x11   :  { %30 = dma.hbm_to_vmem [thread:$0]  %s9277_s2, 16384, %s25_s28, [#allocation4], %s6823_s15, %s6823_s15, %s6824_s16  }
  0x12   :  { %6818 = dma.done.wait [#allocation4], 16384  }
  0x13   :  { %6819 = vsyncadd [#allocation4], 4294950912  ;;  %vm9298_vm0 = vcmask 1048320   ;;  %v6825_v0 = vmov 0   ;;  %v6826_v1 = vmov 1   ;;  %v6910_v2 = vld [vmem:[%s9275_s0] sm:$0xff]  ;;  %v9284_v26 = vlaneseq }
  0x14   :  { %6306 = vset.pattern.permute.xlu0 %v6825_v0  ;;  %134 = vst.msk [vmem:[#allocation2 + $0x18] sm:$0xff] %vm9298_vm0, %v6825_v0  ;;  %6307 = vset.pattern.permute.xlu1 %v6826_v1  ;;  %v6915_v3 = vld [vmem:[%s9275_s0 + $0x8] sm:$0xff]  ;;  %v6330_v4 = vld [vmem:[%s9276_s1 + $0x40] sm:$0xff]   ;;  %v6334_v8 = vld [vmem:[%s9276_s1 + $0x50] sm:$0xff]   ;;  %v6827_v10 = vmov 2   ;;  %v6828_v14 = vmov 3  }
  0x15   :  { %136 = vperm.xlu0 %6306, %v6910_v2   ;;  %543 = vperm.xlu1 %6307, %v6910_v2   ;;  %v6331_v5 = vld [vmem:[%s9276_s1] sm:$0xff]   ;;  %v6332_v6 = vld [vmem:[%s9276_s1 + $0x48] sm:$0xff]   ;;  %v6335_v9 = vld [vmem:[%s9276_s1 + $0x10] sm:$0xff]   ;;  %v9289_v23 = vmov 0.0   ;;  %v6830_v24 = vmov 4   ;;  %v6831_v25 = vmov 5  }
  0x16   :  { %5138 = vmatprep.subr.bf16.mxu0 %v6330_v4  ;;  %5191 = vmatprep.subr.bf16.mxu1 %v6330_v4  ;;  %v6333_v7 = vld [vmem:[%s9276_s1 + $0x8] sm:$0xff]   ;;  %v6336_v11 = vld [vmem:[%s9276_s1 + $0x58] sm:$0xff]   ;;  %v6950_v13 = vld [vmem:[%s9276_s1 + $0x60] sm:$0xff]   ;;  %v7017_v27 = vand.u32 127, %v9284_v26  ;;  %v9287_v36 = vmov 1.0|1.0  }
  0x17   :  { %5139 = vmatpush3.bf16.msra.mxu0 %v6331_v5  ;;  %5192 = vmatpush3.bf16.msra.mxu1 %v6331_v5  ;;  %v6337_v12 = vld [vmem:[%s9276_s1 + $0x18] sm:$0xff]   ;;  %v6957_v15 = vld [vmem:[%s9276_s1 + $0x20] sm:$0xff]   ;;  %v6962_v16 = vld [vmem:[%s9276_s1 + $0x68] sm:$0xff]   ;;  %v6834_v63 = vmov 6   ;;  %v6837_v50 = vmov 9   ;;  %v6838_v54 = vmov 11  }
  0x18   :  { %5140 = vmatprep.subr.bf16.mxu0 %v6332_v6  ;;  %5193 = vmatprep.subr.bf16.mxu1 %v6332_v6  ;;  %v6970_v17 = vld [vmem:[%s9276_s1 + $0x28] sm:$0xff]   ;;  %v6977_v18 = vld [vmem:[%s9276_s1 + $0x70] sm:$0xff]   ;;  %v6991_v20 = vld [vmem:[%s9276_s1 + $0x78] sm:$0xff]   ;;  %v7024_v30 = vadd.s32 128, %v7017_v27  ;;  %v7027_v31 = vadd.s32 384, %v7017_v27  ;;  %v7071_v38 = vadd.s32 512, %v7017_v27 }
  0x19   :  { %139 = vperm.xlu0 %6306, %v6915_v3   ;;  %546 = vperm.xlu1 %6307, %v6915_v3   ;;  %v6984_v19 = vld [vmem:[%s9276_s1 + $0x30] sm:$0xff]   ;;  %v6998_v21 = vld [vmem:[%s9276_s1 + $0x38] sm:$0xff]   ;;  %v7005_v22 = vld [vmem:[%s9276_s1 + $0xc0] sm:$0xff]   ;;  %v7095_v41 = vadd.s32 256, %v7017_v27  ;;  %v9286_v56 = vmov 12   ;;  %s6842_s15 = smov 32  }
  0x1a   :  { %v7042_v34 = vld [vmem:[%s9276_s1 + $0x80] sm:$0xff]   ;;  %v7051_v35 = vld [vmem:[%s9276_s1 + $0xc8] sm:$0xff]   ;;  %9308 = vst [vmem:[#allocation9_spill] sm:$0xff] %v7071_v38  ;;  %v7087_v40 = vld [vmem:[%s9276_s1 + $0xd0] sm:$0xff]   ;;  %s6844_s24 = smov 64   ;;  %s6845_s19 = smov 96  }
  0x1b   :  { %5141 = vmatpush3.bf16.msra.mxu0 %v6333_v7  ;;  %5194 = vmatpush3.bf16.msra.mxu1 %v6333_v7  ;;  %v7068_v37 = vld [vmem:[%s9276_s1 + $0x100] sm:$0xff]   ;;  %v7078_v39 = vld [vmem:[%s9276_s1 + $0x88] sm:$0xff]   ;;  %v7110_v43 = vld [vmem:[%s9276_s1 + $0x90] sm:$0xff]   ;;  %s6846_s22 = smov [#allocation6]  }
  0x1c   :  { %5142 = vmatprep.subr.bf16.mxu0 %v6334_v8  ;;  %5195 = vmatprep.subr.bf16.mxu1 %v6334_v8  ;;  %v7100_v42 = vld [vmem:[%s9276_s1 + $0x108] sm:$0xff]   ;;  %v7121_v45 = vld [vmem:[%s9276_s1 + $0xd8] sm:$0xff]   ;;  %v7131_v46 = vld [vmem:[%s9276_s1 + $0x110] sm:$0xff]   ;;  %s4577_s2 = sshll.u32 %s6846_s22, 4  ;;  %s4578_s2 = int_to_ptr.vmem [resolvable:$true] %s4577_s2 }
  0x1d   :  { %6309 = vset.pattern.permute.xlu1 %v6827_v10  ;;  %6308 = vset.pattern.permute.xlu0 %v6827_v10  ;;  %v7137_v47 = vld [vmem:[%s9276_s1 + $0x98] sm:$0xff]   ;;  %v7152_v51 = vld [vmem:[%s9276_s1 + $0xe0] sm:$0xff]   ;;  %v7183_v55 = vld [vmem:[%s9276_s1 + $0xe8] sm:$0xff]   ;;  %s6796_s23 = scalar_lea.vmem %s4578_s2, 256  ;;  %p6801_p9 = scmp.lt.s32.totalorder %s4578_s2, %s4578_s2 }
  0x1e   :  { %717 = vperm.xlu1 %6309, %v6915_v3   ;;  %714 = vperm.xlu0 %6308, %v6910_v2   ;;  %v7166_v52 = vld [vmem:[%s9276_s1 + $0x118] sm:$0xff]   ;;  %v7172_v53 = vld [vmem:[%s9276_s1 + $0xa0] sm:$0xff]   ;;  %v7199_v58 = vld [vmem:[%s9276_s1 + $0xa8] sm:$0xff]   ;;  %p6797_p8 = scmp.ne.s32.totalorder %s4578_s2, %s6796_s23  ;;  %p6802_p10 = scmp.lt.s32.totalorder %s6796_s23, %s6796_s23 }
  0x1f   :  { %5143 = vmatpush3.bf16.msra.mxu0 %v6335_v9  ;;  %5196 = vmatpush3.bf16.msra.mxu1 %v6335_v9  ;;  %v7193_v57 = vld [vmem:[%s9276_s1 + $0x120] sm:$0xff]   ;;  %v7206_v59 = vld [vmem:[%s9276_s1 + $0xf0] sm:$0xff]   ;;  %v7212_v60 = vld [vmem:[%s9276_s1 + $0x128] sm:$0xff]  }
  0x20   :  { %5144 = vmatprep.subr.bf16.mxu0 %v6336_v11  ;;  %5197 = vmatprep.subr.bf16.mxu1 %v6336_v11  ;;  %v7218_v61 = vld [vmem:[%s9276_s1 + $0xb0] sm:$0xff]   ;;  %v7225_v62 = vld [vmem:[%s9276_s1 + $0xf8] sm:$0xff]   ;;  %v7292_v4 = vld [vmem:[%s9275_s0] sm:$0xff]  ;;  %p6803_p11 = por %p6802_p10, %p6801_p9 }
  0x21   :  { %v7232_v0 = vld [vmem:[%s9276_s1 + $0x130] sm:$0xff]   ;;  %v7239_v1 = vld [vmem:[%s9276_s1 + $0xb8] sm:$0xff]   ;;  %v7302_v5 = vld [vmem:[%s9275_s0 + $0x8] sm:$0xff] }
  0x22   :  { %6310 = vset.pattern.permute.xlu1 %v6828_v14  ;;  %6311 = vset.pattern.permute.xlu0 %v6828_v14  ;;  %v7339_v8 = vld [vmem:[%s9276_s1 + $0x40] sm:$0xff]   ;;  %v7354_v10 = vld [vmem:[%s9276_s1 + $0x48] sm:$0xff]   ;;  %v7375_v14 = vld [vmem:[%s9276_s1 + $0x10] sm:$0xff]   ;;  %p6804_p12 = pnand %p6803_p11, %p6797_p8 }
  0x23   :  { %885 = vperm.xlu1 %6310, %v6910_v2   ;;  %888 = vperm.xlu0 %6311, %v6915_v3   ;;  %v7346_v9 = vld [vmem:[%s9276_s1] sm:$0xff]   ;;  %v7361_v11 = vld [vmem:[%s9276_s1 + $0x8] sm:$0xff]  }
  0x24   :  { %5145 = vmatpush3.bf16.msra.mxu0 %v6337_v12  ;;  %5198 = vmatpush3.bf16.msra.mxu1 %v6337_v12  ;;  %v7368_v12 = vld [vmem:[%s9276_s1 + $0x50] sm:$0xff]   ;;  %v7532_v44 = vld [vmem:[%s9276_s1 + $0xc0] sm:$0xff]  }
  0x25   :  { %5146 = vmatprep.subr.bf16.mxu0 %v6950_v13  ;;  %5199 = vmatprep.subr.bf16.mxu1 %v6950_v13 }
  0x27   :  { %6312 = vset.pattern.permute.xlu1 %v6830_v24  ;;  %6313 = vset.pattern.permute.xlu0 %v6831_v25  ;;  %v7389_v24 = vld [vmem:[%s9276_s1 + $0x18] sm:$0xff]  }
  0x28   :  { %5147 = vmatpush3.bf16.msra.mxu0 %v6957_v15  ;;  %5200 = vmatpush3.bf16.msra.mxu1 %v6957_v15 }
  0x29   :  { %5148 = vmatprep.subr.bf16.mxu0 %v6962_v16  ;;  %5201 = vmatprep.subr.bf16.mxu1 %v6962_v16 }
  0x2a   :  { %1055 = vperm.xlu1 %6312, %v6910_v2   ;;  %1221 = vperm.xlu0 %6313, %v6910_v2  }
  0x2c   :  { %5149 = vmatpush3.bf16.msra.mxu0 %v6970_v17  ;;  %5202 = vmatpush3.bf16.msra.mxu1 %v6970_v17 }
  0x2d   :  { %5150 = vmatprep.subr.bf16.mxu0 %v6977_v18  ;;  %5203 = vmatprep.subr.bf16.mxu1 %v6977_v18 }
  0x2e   :  { %1058 = vperm.xlu1 %6312, %v6915_v3   ;;  %6316 = vset.pattern.permute.xlu0 %v6834_v63 }
  0x2f   :  { %1394 = vperm.xlu0 %6316, %v6915_v3  }
  0x30   :  { %5151 = vmatpush3.bf16.msra.mxu0 %v6984_v19  ;;  %5204 = vmatpush3.bf16.msra.mxu1 %v6984_v19 }
  0x31   :  { %5152 = vmatprep.subr.bf16.mxu0 %v6991_v20  ;;  %5205 = vmatprep.subr.bf16.mxu1 %v6991_v20 }
  0x32   :  { %6314 = vset.pattern.permute.xlu1 %v6831_v25 }
  0x33   :  { %1224 = vperm.xlu1 %6314, %v6915_v3   ;;  %v6835_v3 = vmov 7  }
  0x34   :  { %5153 = vmatpush3.bf16.msra.mxu0 %v6998_v21  ;;  %5206 = vmatpush3.bf16.msra.mxu1 %v6998_v21 }
  0x35   :  { %5160 = vmatprep.subr.bf16.mxu0 %v7005_v22  ;;  %5975 = vmatprep.subr.bf16.mxu1 %v9289_v23 }
  0x37   :  { %6315 = vset.pattern.permute.xlu1 %v6834_v63  ;;  %v9285_v63 = vmov 14  }
  0x38   :  { %1391 = vperm.xlu1 %6315, %v6910_v2   ;;  %v7249_v2 = vld [vmem:[%s9276_s1 + $0x138] sm:$0xff]  }
  0x3c   :  { %6317 = vset.pattern.permute.xlu1 %v6835_v3 }
  0x3d   :  { %1561 = vperm.xlu1 %6317, %v7292_v4  }
  0x41   :  { %1564 = vperm.xlu1 %6317, %v7302_v5  }
  0x94   :  { %v7019_v28 = vpop.permute.xlu0 %136  ;;  %v7021_v29 = vpop.permute.xlu1 %543 }
  0x95   :  { %vm142_vm1 = vcmp.eq.s32.totalorder %v7019_v28, %v7024_v30  ;;  %vm141_vm6 = vcmp.eq.s32.totalorder %v7019_v28, %v7017_v27  ;;  %vm549_vm7 = vcmp.eq.s32.totalorder %v7021_v29, %v7024_v30  ;;  %vm144_vm10 = vcmp.eq.s32.totalorder %v7019_v28, %v7027_v31 }
  0x96   :  { %vm548_vm11 = vcmp.eq.s32.totalorder %v7021_v29, %v7017_v27 }
  0x98   :  { %v7029_v32 = vpop.permute.xlu0 %139  ;;  %v7031_v33 = vpop.permute.xlu1 %546 }
  0x99   :  { %vm147_vm2 = vcmp.eq.s32.totalorder %v7029_v32, %v7024_v30  ;;  %vm146_vm3 = vcmp.eq.s32.totalorder %v7029_v32, %v7017_v27  ;;  %vm149_vm4 = vcmp.eq.s32.totalorder %v7029_v32, %v7027_v31  ;;  %vm554_vm8 = vcmp.eq.s32.totalorder %v7031_v33, %v7024_v30 }
  0x9a   :  { %vm4639_vm5 = vmpackc.low %vm147_vm2, %vm142_vm1  ;;  %vm553_vm12 = vcmp.eq.s32.totalorder %v7031_v33, %v7017_v27  ;;  %vm150_vm1 = vcmp.eq.s32.totalorder %v7029_v32, %v7071_v38  ;;  %vm6833_vm2 = vmmov 0  }
  0x9b   :  { %4640 = vmatprep.mubr.msk.bf16.mxu0 %vm4639_vm5, %v9287_v36  ;;  %vm4641_vm9 = vmpackc.low %vm146_vm3, %vm141_vm6  ;;  %vm145_vm3 = vcmp.eq.s32.totalorder %v7019_v28, %v7071_v38  ;;  %vm550_vm5 = vcmp.eq.s32.totalorder %v7021_v29, %v7095_v41  ;;  %vm555_vm6 = vcmp.eq.s32.totalorder %v7031_v33, %v7095_v41 }
  0x9c   :  { %4642 = vmatmul.mubr.msk.bf16.vlgmr.msra.gmra.mrb[0].mxu0 %vm4641_vm9, %v9287_v36  ;;  %vm4643_vm13 = vmpackc.low %vm149_vm4, %vm144_vm10 }
  0x9d   :  { %5161 = vmatpush3.bf16.msra.mxu0 %v7042_v34  ;;  %4644 = vmatprep.mubr.msk.bf16.mxu0 %vm4643_vm13, %v9287_v36  ;;  %vm4659_vm14 = vmpackc.low %vm554_vm8, %vm549_vm7  ;;  %v7140_v48 = vpop.permute.xlu1 %717  ;;  %v7142_v49 = vpop.permute.xlu0 %714 }
  0x9e   :  { %5162 = vmatprep.subr.bf16.mxu0 %v7051_v35  ;;  %4660 = vmatprep.mubr.msk.bf16.mxu1 %vm4659_vm14, %v9287_v36  ;;  %vm4661_vm15 = vmpackc.low %vm553_vm12, %vm548_vm11  ;;  %vm719_vm8 = vcmp.eq.s32.totalorder %v7142_v49, %v7017_v27  ;;  %vm724_vm9 = vcmp.eq.s32.totalorder %v7140_v48, %v7017_v27  ;;  %vm723_vm10 = vcmp.eq.s32.totalorder %v7142_v49, %v7071_v38 }
  0x9f   :  { %4662 = vmatmul.mubr.msk.bf16.vlgmr.msra.gmra.mrb[0].mxu1 %vm4661_vm15, %v9287_v36  ;;  %vm7113_vm4 = vmpackc.low %vm150_vm1, %vm145_vm3  ;;  %vm728_vm11 = vcmp.eq.s32.totalorder %v7140_v48, %v7071_v38  ;;  %vm148_vm14 = vcmp.eq.s32.totalorder %v7029_v32, %v7095_v41  ;;  %vm552_vm15 = vcmp.eq.s32.totalorder %v7021_v29, %v7071_v38  ;;  %vm557_vm1 = vcmp.eq.s32.totalorder %v7031_v33, %v7071_v38  ;;  %v7502_v32 = vld [vmem:[%s9276_s1 + $0x78] sm:$0xff]  }
  0xa0   :  { %5976 = vmatpush3.bf16.msra.mxu1 %v7068_v37  ;;  %5991 = vmatprep.mubr.msk.bf16.mxu1 %vm6833_vm2, %v9289_v23  ;;  %vm7144_vm7 = vmpackc.low %vm555_vm6, %vm550_vm5  ;;  %vm143_vm3 = vcmp.eq.s32.totalorder %v7019_v28, %v7095_v41  ;;  %vm722_vm5 = vcmp.eq.s32.totalorder %v7142_v49, %v7027_v31  ;;  %vm727_vm6 = vcmp.eq.s32.totalorder %v7140_v48, %v7027_v31  ;;  %v6836_v28 = vmov 8  }
  0xa1   :  { %5163 = vmatpush3.bf16.msra.mxu0 %v7078_v39  ;;  %5977 = vmatprep.subr.bf16.mxu1 %v9289_v23  ;;  %vm7175_vm12 = vmpackc.low %vm724_vm9, %vm719_vm8 }
  0xa2   :  { %5164 = vmatprep.subr.bf16.mxu0 %v7087_v40  ;;  %vm7185_vm13 = vmpackc.low %vm728_vm11, %vm723_vm10  ;;  %vm551_vm11 = vcmp.eq.s32.totalorder %v7021_v29, %v7027_v31  ;;  %v7313_v6 = vpop.permute.xlu1 %885  ;;  %v7315_v7 = vpop.permute.xlu0 %888  ;;  %6319 = vset.pattern.permute.xlu1 %v6836_v28  ;;  %v7495_v29 = vld [vmem:[%s9276_s1 + $0x30] sm:$0xff]  }
  0xa3   :  { %vm4645_vm8 = vmpackc.low %vm148_vm14, %vm143_vm3  ;;  %vm556_vm14 = vcmp.eq.s32.totalorder %v7031_v33, %v7027_v31  ;;  %6318 = vset.pattern.permute.xlu0 %v6836_v28  ;;  %1734 = vperm.xlu1 %6319, %v7302_v5   ;;  %v7511_v33 = vld [vmem:[%s9276_s1 + $0x38] sm:$0xff]  }
  0xa4   :  { %5978 = vmatpush3.bf16.msra.mxu1 %v7100_v42  ;;  %vm4667_vm9 = vmpackc.low %vm557_vm1, %vm552_vm15  ;;  %vm721_vm15 = vcmp.eq.s32.totalorder %v7142_v49, %v7095_v41  ;;  %vm726_vm1 = vcmp.eq.s32.totalorder %v7140_v48, %v7095_v41  ;;  %1731 = vperm.xlu0 %6318, %v7292_v4  }
  0xa5   :  { %5165 = vmatpush3.bf16.msra.mxu0 %v7110_v43  ;;  %5979 = vmatprep.subr.bf16.mxu1 %v9289_v23  ;;  %vm4683_vm10 = vmpackc.low %vm727_vm6, %vm722_vm5  ;;  %vm891_vm5 = vcmp.eq.s32.totalorder %v7313_v6, %v7024_v30  ;;  %vm896_vm6 = vcmp.eq.s32.totalorder %v7315_v7, %v7024_v30 }
  0xa6   :  { %5166 = vmatprep.subr.bf16.mxu0 %v7121_v45  ;;  %vm4663_vm3 = vmpackc.low %vm556_vm14, %vm551_vm11  ;;  %vm725_vm11 = vcmp.eq.s32.totalorder %v7140_v48, %v7024_v30  ;;  %vm895_vm14 = vcmp.eq.s32.totalorder %v7315_v7, %v7017_v27 }
  0xa7   :  { %6320 = vset.pattern.permute.xlu1 %v6837_v50 }
  0xa8   :  { %5980 = vmatpush3.bf16.msra.mxu1 %v7131_v46  ;;  %6321 = vset.pattern.permute.xlu0 %v6837_v50 }
  0xa9   :  { %5167 = vmatpush3.bf16.msra.mxu0 %v7137_v47  ;;  %5981 = vmatprep.subr.bf16.mxu1 %v9289_v23  ;;  %v7399_v25 = vpop.permute.xlu1 %1055 }
  0xaa   :  { %5168 = vmatprep.subr.bf16.mxu0 %v7152_v51  ;;  %1897 = vperm.xlu1 %6320, %v7292_v4  }
  0xab   :  { %1900 = vperm.xlu0 %6321, %v7302_v5  }
  0xac   :  { %5982 = vmatpush3.bf16.msra.mxu1 %v7166_v52 }
  0xad   :  { %5169 = vmatpush3.bf16.msra.mxu0 %v7172_v53  ;;  %5983 = vmatprep.subr.bf16.mxu1 %v9289_v23 }
  0xae   :  { %5170 = vmatprep.subr.bf16.mxu0 %v7183_v55 }
  0xaf   :  { %6323 = vset.pattern.permute.xlu0 %v6838_v54 }
  0xb0   :  { %5984 = vmatpush3.bf16.msra.mxu1 %v7193_v57  ;;  %2237 = vperm.xlu0 %6323, %v7292_v4  }
  0xb1   :  { %5171 = vmatpush3.bf16.msra.mxu0 %v7199_v58  ;;  %5985 = vmatprep.subr.bf16.mxu1 %v9289_v23 }
  0xb2   :  { %5172 = vmatprep.subr.bf16.mxu0 %v7206_v59 }
  0xb4   :  { %5986 = vmatpush3.bf16.msra.mxu1 %v7212_v60  ;;  %6326 = vset.pattern.permute.xlu0 %v9286_v56 }
  0xb5   :  { %5173 = vmatpush3.bf16.msra.mxu0 %v7218_v61  ;;  %5987 = vmatprep.subr.bf16.mxu1 %v9289_v23 }
  0xb6   :  { %5174 = vmatprep.subr.bf16.mxu0 %v7225_v62  ;;  %2410 = vperm.xlu0 %6326, %v7302_v5  }
  0xb8   :  { %5988 = vmatpush3.bf16.msra.mxu1 %v7232_v0 }
  0xb9   :  { %5175 = vmatpush3.bf16.msra.mxu0 %v7239_v1  ;;  %5989 = vmatprep.subr.bf16.mxu1 %v9289_v23 }
  0xba   :  { %5955 = vmatprep.subr.bf16.mxu0 %v9289_v23  ;;  %6328 = vset.pattern.permute.xlu0 %v9285_v63 }
  0xbb   :  { %2743 = vperm.xlu0 %6328, %v7292_v4  }
  0xbc   :  { %4646 = vmatmul.mubr.msk.bf16.vlgmr.msra.gmra.mrb[4].mxu0 %vm4645_vm8, %v9287_v36  ;;  %5990 = vmatpush3.bf16.msra.mxu1 %v7249_v2  ;;  %vm4685_vm8 = vmpackc.low %vm726_vm1, %vm721_vm15  ;;  %vm1060_vm15 = vcmp.eq.s32.totalorder %v7399_v25, %v7017_v27 }
  0xbd   :  { %5956 = vmatpush3.bf16.msra.mxu0 %v7068_v37  ;;  %5266 = vmatprep.subr.bf16.mxu1 %v7005_v22 }
  0xbe   :  { %5957 = vmatprep.subr.bf16.mxu0 %v9289_v23  ;;  %5971 = vmatprep.mubr.msk.bf16.mxu0 %vm6833_vm2, %v9289_v23 }
  0xbf   :  { %5992 = vmatmul.mubr.msk.bf16.vlgmr.msra.gmra.mrb[4].mxu1 %vm4667_vm9, %v9287_v36  ;;  %vm4699_vm9 = vmpackc.low %vm896_vm6, %vm891_vm5 }
  0xc0   :  { %5267 = vmatpush3.bf16.msra.mxu1 %v7042_v34  ;;  %4684 = vmatprep.mubr.msk.bf16.mxu1 %vm4683_vm10, %v9287_v36  ;;  %vm720_vm10 = vcmp.eq.s32.totalorder %v7142_v49, %v7024_v30  ;;  %v7570_v49 = vpop.permute.xlu0 %1221 }
  0xc1   :  { %5958 = vmatpush3.bf16.msra.mxu0 %v7100_v42  ;;  %5268 = vmatprep.subr.bf16.mxu1 %v7051_v35  ;;  %vm4679_vm5 = vmpackc.low %vm725_vm11, %vm720_vm10  ;;  %vm1063_vm10 = vcmp.eq.s32.totalorder %v7399_v25, %v7027_v31 }
  0xc2   :  { %5959 = vmatprep.subr.bf16.mxu0 %v9289_v23 }
  0xc4   :  { %5269 = vmatpush3.bf16.msra.mxu1 %v7078_v39 }
  0xc5   :  { %5960 = vmatpush3.bf16.msra.mxu0 %v7131_v46  ;;  %5270 = vmatprep.subr.bf16.mxu1 %v7087_v40 }
  0xc6   :  { %5961 = vmatprep.subr.bf16.mxu0 %v9289_v23 }
  0xc8   :  { %5271 = vmatpush3.bf16.msra.mxu1 %v7110_v43 }
  0xc9   :  { %5962 = vmatpush3.bf16.msra.mxu0 %v7166_v52  ;;  %5272 = vmatprep.subr.bf16.mxu1 %v7121_v45 }
  0xca   :  { %5963 = vmatprep.subr.bf16.mxu0 %v9289_v23 }
  0xcc   :  { %5273 = vmatpush3.bf16.msra.mxu1 %v7137_v47 }
  0xcd   :  { %5964 = vmatpush3.bf16.msra.mxu0 %v7193_v57  ;;  %5274 = vmatprep.subr.bf16.mxu1 %v7152_v51 }
  0xce   :  { %5965 = vmatprep.subr.bf16.mxu0 %v9289_v23 }
  0xd0   :  { %5275 = vmatpush3.bf16.msra.mxu1 %v7172_v53 }
  0xd1   :  { %5966 = vmatpush3.bf16.msra.mxu0 %v7212_v60  ;;  %5276 = vmatprep.subr.bf16.mxu1 %v7183_v55 }
  0xd2   :  { %5967 = vmatprep.subr.bf16.mxu0 %v9289_v23 }
  0xd4   :  { %5277 = vmatpush3.bf16.msra.mxu1 %v7199_v58 }
  0xd5   :  { %5968 = vmatpush3.bf16.msra.mxu0 %v7232_v0  ;;  %5278 = vmatprep.subr.bf16.mxu1 %v7206_v59 }
  0xd6   :  { %5969 = vmatprep.subr.bf16.mxu0 %v9289_v23 }
  0xd8   :  { %5279 = vmatpush3.bf16.msra.mxu1 %v7218_v61 }
  0xd9   :  { %5970 = vmatpush3.bf16.msra.mxu0 %v7249_v2  ;;  %5280 = vmatprep.subr.bf16.mxu1 %v7225_v62 }
  0xda   :  { %5213 = vmatprep.subr.bf16.mxu0 %v7005_v22  ;;  %v7382_v22 = vld [vmem:[%s9276_s1 + $0x58] sm:$0xff]  }
  0xdc   :  { %5972 = vmatmul.mubr.msk.bf16.vlgmr.msra.gmra.mrb[8].mxu0 %vm7113_vm4, %v9287_v36  ;;  %5281 = vmatpush3.bf16.msra.mxu1 %v7239_v1  ;;  %vm890_vm4 = vcmp.eq.s32.totalorder %v7313_v6, %v7017_v27 }
  0xdd   :  { %5214 = vmatpush3.bf16.msra.mxu0 %v7042_v34  ;;  %4664 = vmatprep.mubr.msk.bf16.mxu0 %vm4663_vm3, %v9287_v36  ;;  %vm4701_vm6 = vmpackc.low %vm895_vm14, %vm890_vm4  ;;  %vm899_vm4 = vcmp.eq.s32.totalorder %v7315_v7, %v7071_v38 }
  0xde   :  { %5215 = vmatprep.subr.bf16.mxu0 %v7051_v35  ;;  %5297 = vmatprep.subr.bf16.mxu1 %v7339_v8 }
  0xdf   :  { %4686 = vmatmul.mubr.msk.bf16.vlgmr.msra.gmra.mrb[8].mxu1 %vm4685_vm8, %v9287_v36  ;;  %vm1064_vm8 = vcmp.eq.s32.totalorder %v7399_v25, %v7071_v38 }
  0xe0   :  { %5298 = vmatpush3.bf16.msra.mxu1 %v7346_v9  ;;  %4700 = vmatprep.mubr.msk.bf16.mxu1 %vm4699_vm9, %v9287_v36 }
  0xe1   :  { %5216 = vmatpush3.bf16.msra.mxu0 %v7078_v39  ;;  %5299 = vmatprep.subr.bf16.mxu1 %v7354_v10 }
  0xe2   :  { %5217 = vmatprep.subr.bf16.mxu0 %v7087_v40 }
  0xe4   :  { %5300 = vmatpush3.bf16.msra.mxu1 %v7361_v11 }
  0xe5   :  { %5218 = vmatpush3.bf16.msra.mxu0 %v7110_v43  ;;  %5301 = vmatprep.subr.bf16.mxu1 %v7368_v12 }
  0xe6   :  { %5219 = vmatprep.subr.bf16.mxu0 %v7121_v45 }
  0xe8   :  { %5302 = vmatpush3.bf16.msra.mxu1 %v7375_v14 }
  0xe9   :  { %5220 = vmatpush3.bf16.msra.mxu0 %v7137_v47  ;;  %5303 = vmatprep.subr.bf16.mxu1 %v7382_v22 }
  0xea   :  { %5221 = vmatprep.subr.bf16.mxu0 %v7152_v51 }
  0xec   :  { %5304 = vmatpush3.bf16.msra.mxu1 %v7389_v24 }
  0xed   :  { %5222 = vmatpush3.bf16.msra.mxu0 %v7172_v53  ;;  %5305 = vmatprep.subr.bf16.mxu1 %v6950_v13  ;;  %v7412_v13 = vpop.permute.xlu1 %1058 }
  0xee   :  { %5223 = vmatprep.subr.bf16.mxu0 %v7183_v55  ;;  %vm1065_vm1 = vcmp.eq.s32.totalorder %v7412_v13, %v7017_v27  ;;  %vm1069_vm9 = vcmp.eq.s32.totalorder %v7412_v13, %v7071_v38  ;;  %vm1068_vm11 = vcmp.eq.s32.totalorder %v7412_v13, %v7027_v31 }
  0xef   :  { %vm7423_vm3 = vmpackc.low %vm1065_vm1, %vm1060_vm15 }
  0xf0   :  { %5306 = vmatpush3.bf16.msra.mxu1 %v6957_v15  ;;  %vm7437_vm15 = vmpackc.low %vm1069_vm9, %vm1064_vm8  ;;  %vm1067_vm8 = vcmp.eq.s32.totalorder %v7412_v13, %v7095_v41 }
  0xf1   :  { %5224 = vmatpush3.bf16.msra.mxu0 %v7199_v58  ;;  %5307 = vmatprep.subr.bf16.mxu1 %v6962_v16  ;;  %vm4723_vm1 = vmpackc.low %vm1068_vm11, %vm1063_vm10  ;;  %v7568_v48 = vpop.permute.xlu1 %1224 }
  0xf2   :  { %5225 = vmatprep.subr.bf16.mxu0 %v7206_v59 }
  0xf4   :  { %5308 = vmatpush3.bf16.msra.mxu1 %v6970_v17  ;;  %v7460_v17 = vld [vmem:[%s9276_s1 + $0x60] sm:$0xff]  }
  0xf5   :  { %5226 = vmatpush3.bf16.msra.mxu0 %v7218_v61  ;;  %5309 = vmatprep.subr.bf16.mxu1 %v6977_v18  ;;  %v7467_v18 = vld [vmem:[%s9276_s1 + $0x20] sm:$0xff]  }
  0xf6   :  { %5227 = vmatprep.subr.bf16.mxu0 %v7225_v62 }
  0xf8   :  { %5310 = vmatpush3.bf16.msra.mxu1 %v6984_v19  ;;  %v7474_v19 = vld [vmem:[%s9276_s1 + $0x68] sm:$0xff]  }
  0xf9   :  { %5228 = vmatpush3.bf16.msra.mxu0 %v7239_v1  ;;  %5311 = vmatprep.subr.bf16.mxu1 %v6991_v20  ;;  %v7481_v20 = vld [vmem:[%s9276_s1 + $0x28] sm:$0xff]  }
  0xfa   :  { %5244 = vmatprep.subr.bf16.mxu0 %v7339_v8 }
  0xfc   :  { %4666 = vmatmul.mubr.msk.bf16.vlgmr.msra.gmra.mrb[12].mxu0 %vm7144_vm7, %v9287_v36  ;;  %5312 = vmatpush3.bf16.msra.mxu1 %v6998_v21  ;;  %v7488_v21 = vld [vmem:[%s9276_s1 + $0x70] sm:$0xff]   ;;  %vm894_vm7 = vcmp.eq.s32.totalorder %v7313_v6, %v7071_v38 }
  0xfd   :  { %5245 = vmatpush3.bf16.msra.mxu0 %v7346_v9  ;;  %6015 = vmatprep.subr.bf16.mxu1 %v9289_v23  ;;  %vm4707_vm14 = vmpackc.low %vm899_vm4, %vm894_vm7  ;;  %vm1227_vm7 = vcmp.eq.s32.totalorder %v7570_v49, %v7024_v30  ;;  %vm1232_vm4 = vcmp.eq.s32.totalorder %v7568_v48, %v7024_v30 }
  0xfe   :  { %5246 = vmatprep.subr.bf16.mxu0 %v7354_v10  ;;  %4680 = vmatprep.mubr.msk.bf16.mxu0 %vm4679_vm5, %v9287_v36  ;;  %vm898_vm5 = vcmp.eq.s32.totalorder %v7315_v7, %v7027_v31  ;;  %vm4739_vm11 = vmpackc.low %vm1232_vm4, %vm1227_vm7  ;;  %vm1230_vm4 = vcmp.eq.s32.totalorder %v7570_v49, %v7071_v38 }
  0xff   :  { %4702 = vmatmul.mubr.msk.bf16.vlgmr.msra.gmra.mrb[12].mxu1 %vm4701_vm6, %v9287_v36  ;;  %vm1062_vm6 = vcmp.eq.s32.totalorder %v7399_v25, %v7095_v41 }
 0x100   :  { %6016 = vmatpush3.bf16.msra.mxu1 %v7068_v37  ;;  %6031 = vmatprep.mubr.msk.bf16.mxu1 %vm6833_vm2, %v9289_v23  ;;  %vm4725_vm10 = vmpackc.low %vm1067_vm8, %vm1062_vm6  ;;  %vm1231_vm6 = vcmp.eq.s32.totalorder %v7568_v48, %v7017_v27 }
 0x101   :  { %5247 = vmatpush3.bf16.msra.mxu0 %v7361_v11  ;;  %6017 = vmatprep.subr.bf16.mxu1 %v9289_v23 }
 0x102   :  { %5248 = vmatprep.subr.bf16.mxu0 %v7368_v12 }
 0x104   :  { %6018 = vmatpush3.bf16.msra.mxu1 %v7100_v42 }
 0x105   :  { %5249 = vmatpush3.bf16.msra.mxu0 %v7375_v14  ;;  %6019 = vmatprep.subr.bf16.mxu1 %v9289_v23 }
 0x106   :  { %5250 = vmatprep.subr.bf16.mxu0 %v7382_v22 }
 0x108   :  { %6020 = vmatpush3.bf16.msra.mxu1 %v7131_v46 }
 0x109   :  { %5251 = vmatpush3.bf16.msra.mxu0 %v7389_v24  ;;  %6021 = vmatprep.subr.bf16.mxu1 %v9289_v23 }
 0x10a   :  { %5252 = vmatprep.subr.bf16.mxu0 %v7460_v17 }
 0x10c   :  { %6022 = vmatpush3.bf16.msra.mxu1 %v7166_v52 }
 0x10d   :  { %5253 = vmatpush3.bf16.msra.mxu0 %v7467_v18  ;;  %6023 = vmatprep.subr.bf16.mxu1 %v9289_v23 }
 0x10e   :  { %5254 = vmatprep.subr.bf16.mxu0 %v7474_v19 }
 0x110   :  { %6024 = vmatpush3.bf16.msra.mxu1 %v7193_v57 }
 0x111   :  { %5255 = vmatpush3.bf16.msra.mxu0 %v7481_v20  ;;  %6025 = vmatprep.subr.bf16.mxu1 %v9289_v23 }
 0x112   :  { %5256 = vmatprep.subr.bf16.mxu0 %v7488_v21 }
 0x114   :  { %6026 = vmatpush3.bf16.msra.mxu1 %v7212_v60 }
 0x115   :  { %5257 = vmatpush3.bf16.msra.mxu0 %v7495_v29  ;;  %6027 = vmatprep.subr.bf16.mxu1 %v9289_v23 }
 0x116   :  { %5258 = vmatprep.subr.bf16.mxu0 %v7502_v32 }
 0x118   :  { %6028 = vmatpush3.bf16.msra.mxu1 %v7232_v0 }
 0x119   :  { %5259 = vmatpush3.bf16.msra.mxu0 %v7511_v33  ;;  %6029 = vmatprep.subr.bf16.mxu1 %v9289_v23 }
 0x11a   :  { %5995 = vmatprep.subr.bf16.mxu0 %v9289_v23 }
 0x11c   :  { %4682 = vmatmul.mubr.msk.bf16.vlgmr.msra.gmra.mrb[16].mxu0 %vm7175_vm12, %v9287_v36  ;;  %6030 = vmatpush3.bf16.msra.mxu1 %v7249_v2  ;;  %vm893_vm12 = vcmp.eq.s32.totalorder %v7313_v6, %v7027_v31 }
 0x11d   :  { %5996 = vmatpush3.bf16.msra.mxu0 %v7068_v37  ;;  %5372 = vmatprep.subr.bf16.mxu1 %v7532_v44  ;;  %vm4703_vm9 = vmpackc.low %vm898_vm5, %vm893_vm12  ;;  %vm1066_vm12 = vcmp.eq.s32.totalorder %v7412_v13, %v7024_v30  ;;  %vm1226_vm5 = vcmp.eq.s32.totalorder %v7570_v49, %v7017_v27 }
 0x11e   :  { %5997 = vmatprep.subr.bf16.mxu0 %v9289_v23  ;;  %6011 = vmatprep.mubr.msk.bf16.mxu0 %vm6833_vm2, %v9289_v23  ;;  %vm4741_vm7 = vmpackc.low %vm1231_vm6, %vm1226_vm5 }
 0x11f   :  { %6032 = vmatmul.mubr.msk.bf16.vlgmr.msra.gmra.mrb[16].mxu1 %vm4707_vm14, %v9287_v36  ;;  %vm897_vm14 = vcmp.eq.s32.totalorder %v7315_v7, %v7095_v41  ;;  %v6841_v7 = vmov 10  }
 0x120   :  { %5373 = vmatpush3.bf16.msra.mxu1 %v7042_v34  ;;  %4724 = vmatprep.mubr.msk.bf16.mxu1 %vm4723_vm1, %v9287_v36  ;;  %vm1061_vm1 = vcmp.eq.s32.totalorder %v7399_v25, %v7024_v30 }
 0x121   :  { %5998 = vmatpush3.bf16.msra.mxu0 %v7100_v42  ;;  %5374 = vmatprep.subr.bf16.mxu1 %v7051_v35 }
 0x122   :  { %5999 = vmatprep.subr.bf16.mxu0 %v9289_v23  ;;  %6322 = vset.pattern.permute.xlu1 %v6841_v7 }
 0x123   :  { %2067 = vperm.xlu1 %6322, %v7292_v4  }
 0x124   :  { %5375 = vmatpush3.bf16.msra.mxu1 %v7078_v39 }
 0x125   :  { %6000 = vmatpush3.bf16.msra.mxu0 %v7131_v46  ;;  %5376 = vmatprep.subr.bf16.mxu1 %v7087_v40 }
 0x126   :  { %6001 = vmatprep.subr.bf16.mxu0 %v9289_v23 }
 0x127   :  { %2070 = vperm.xlu1 %6322, %v7302_v5  }
 0x128   :  { %5377 = vmatpush3.bf16.msra.mxu1 %v7110_v43 }
 0x129   :  { %6002 = vmatpush3.bf16.msra.mxu0 %v7166_v52  ;;  %5378 = vmatprep.subr.bf16.mxu1 %v7121_v45 }
 0x12a   :  { %6003 = vmatprep.subr.bf16.mxu0 %v9289_v23 }
 0x12b   :  { %6324 = vset.pattern.permute.xlu1 %v6838_v54 }
 0x12c   :  { %5379 = vmatpush3.bf16.msra.mxu1 %v7137_v47  ;;  %2240 = vperm.xlu1 %6324, %v7302_v5   ;;  %v9322_v5 = vmov 12  }
 0x12d   :  { %6004 = vmatpush3.bf16.msra.mxu0 %v7193_v57  ;;  %5380 = vmatprep.subr.bf16.mxu1 %v7152_v51 }
 0x12e   :  { %6005 = vmatprep.subr.bf16.mxu0 %v9289_v23 }
 0x130   :  { %5381 = vmatpush3.bf16.msra.mxu1 %v7172_v53  ;;  %6325 = vset.pattern.permute.xlu1 %v9322_v5 }
 0x131   :  { %6006 = vmatpush3.bf16.msra.mxu0 %v7212_v60  ;;  %5382 = vmatprep.subr.bf16.mxu1 %v7183_v55 }
 0x132   :  { %6007 = vmatprep.subr.bf16.mxu0 %v9289_v23  ;;  %2407 = vperm.xlu1 %6325, %v7292_v4  }
 0x134   :  { %5383 = vmatpush3.bf16.msra.mxu1 %v7199_v58 }
 0x135   :  { %6008 = vmatpush3.bf16.msra.mxu0 %v7232_v0  ;;  %5384 = vmatprep.subr.bf16.mxu1 %v7206_v59 }
 0x136   :  { %6009 = vmatprep.subr.bf16.mxu0 %v9289_v23 }
 0x138   :  { %5385 = vmatpush3.bf16.msra.mxu1 %v7218_v61 }
 0x139   :  { %6010 = vmatpush3.bf16.msra.mxu0 %v7249_v2  ;;  %5386 = vmatprep.subr.bf16.mxu1 %v7225_v62 }
 0x13a   :  { %5319 = vmatprep.subr.bf16.mxu0 %v7532_v44 }
 0x13c   :  { %6012 = vmatmul.mubr.msk.bf16.vlgmr.msra.gmra.mrb[20].mxu0 %vm7185_vm13, %v9287_v36  ;;  %5387 = vmatpush3.bf16.msra.mxu1 %v7239_v1  ;;  %vm892_vm13 = vcmp.eq.s32.totalorder %v7313_v6, %v7095_v41 }
 0x13d   :  { %5320 = vmatpush3.bf16.msra.mxu0 %v7042_v34  ;;  %4704 = vmatprep.mubr.msk.bf16.mxu0 %vm4703_vm9, %v9287_v36  ;;  %vm4705_vm8 = vmpackc.low %vm897_vm14, %vm892_vm13 }
 0x13e   :  { %5321 = vmatprep.subr.bf16.mxu0 %v7051_v35  ;;  %5403 = vmatprep.subr.bf16.mxu1 %v7339_v8  ;;  %vm4719_vm9 = vmpackc.low %vm1066_vm12, %vm1061_vm1  ;;  %vm1234_vm12 = vcmp.eq.s32.totalorder %v7568_v48, %v7027_v31 }
 0x13f   :  { %4726 = vmatmul.mubr.msk.bf16.vlgmr.msra.gmra.mrb[20].mxu1 %vm4725_vm10, %v9287_v36  ;;  %vm1235_vm10 = vcmp.eq.s32.totalorder %v7568_v48, %v7071_v38 }
 0x140   :  { %5404 = vmatpush3.bf16.msra.mxu1 %v7346_v9  ;;  %4740 = vmatprep.mubr.msk.bf16.mxu1 %vm4739_vm11, %v9287_v36  ;;  %vm4747_vm14 = vmpackc.low %vm1235_vm10, %vm1230_vm4 }
 0x141   :  { %5322 = vmatpush3.bf16.msra.mxu0 %v7078_v39  ;;  %5405 = vmatprep.subr.bf16.mxu1 %v7354_v10 }
 0x142   :  { %5323 = vmatprep.subr.bf16.mxu0 %v7087_v40 }
 0x144   :  { %5406 = vmatpush3.bf16.msra.mxu1 %v7361_v11 }
 0x145   :  { %5324 = vmatpush3.bf16.msra.mxu0 %v7110_v43  ;;  %5407 = vmatprep.subr.bf16.mxu1 %v7368_v12 }
 0x146   :  { %5325 = vmatprep.subr.bf16.mxu0 %v7121_v45 }
 0x148   :  { %5408 = vmatpush3.bf16.msra.mxu1 %v7375_v14 }
 0x149   :  { %5326 = vmatpush3.bf16.msra.mxu0 %v7137_v47  ;;  %5409 = vmatprep.subr.bf16.mxu1 %v7382_v22 }
 0x14a   :  { %5327 = vmatprep.subr.bf16.mxu0 %v7152_v51 }
 0x14c   :  { %5410 = vmatpush3.bf16.msra.mxu1 %v7389_v24 }
 0x14d   :  { %5328 = vmatpush3.bf16.msra.mxu0 %v7172_v53  ;;  %5411 = vmatprep.subr.bf16.mxu1 %v7460_v17 }
 0x14e   :  { %5329 = vmatprep.subr.bf16.mxu0 %v7183_v55 }
 0x150   :  { %5412 = vmatpush3.bf16.msra.mxu1 %v7467_v18 }
 0x151   :  { %5330 = vmatpush3.bf16.msra.mxu0 %v7199_v58  ;;  %5413 = vmatprep.subr.bf16.mxu1 %v7474_v19 }
 0x152   :  { %5331 = vmatprep.subr.bf16.mxu0 %v7206_v59 }
 0x154   :  { %5414 = vmatpush3.bf16.msra.mxu1 %v7481_v20 }
 0x155   :  { %5332 = vmatpush3.bf16.msra.mxu0 %v7218_v61  ;;  %5415 = vmatprep.subr.bf16.mxu1 %v7488_v21 }
 0x156   :  { %5333 = vmatprep.subr.bf16.mxu0 %v7225_v62 }
 0x158   :  { %5416 = vmatpush3.bf16.msra.mxu1 %v7495_v29 }
 0x159   :  { %5334 = vmatpush3.bf16.msra.mxu0 %v7239_v1  ;;  %5417 = vmatprep.subr.bf16.mxu1 %v7502_v32 }
 0x15a   :  { %5350 = vmatprep.subr.bf16.mxu0 %v7339_v8 }
 0x15c   :  { %4706 = vmatmul.mubr.msk.bf16.vlgmr.msra.gmra.mrb[24].mxu0 %vm4705_vm8, %v9287_v36  ;;  %5418 = vmatpush3.bf16.msra.mxu1 %v7511_v33 }
 0x15d   :  { %5351 = vmatpush3.bf16.msra.mxu0 %v7346_v9  ;;  %6055 = vmatprep.subr.bf16.mxu1 %v9289_v23 }
 0x15e   :  { %5352 = vmatprep.subr.bf16.mxu0 %v7354_v10  ;;  %4720 = vmatprep.mubr.msk.bf16.mxu0 %vm4719_vm9, %v9287_v36 }
 0x15f   :  { %4742 = vmatmul.mubr.msk.bf16.vlgmr.msra.gmra.mrb[24].mxu1 %vm4741_vm7, %v9287_v36  ;;  %v7685_v36 = vpop.permute.xlu1 %1391 }
 0x160   :  { %6056 = vmatpush3.bf16.msra.mxu1 %v7068_v37  ;;  %6071 = vmatprep.mubr.msk.bf16.mxu1 %vm6833_vm2, %v9289_v23  ;;  %vm1399_vm11 = vcmp.eq.s32.totalorder %v7685_v36, %v7027_v31  ;;  %vm1398_vm5 = vcmp.eq.s32.totalorder %v7685_v36, %v7095_v41 }
 0x161   :  { %5353 = vmatpush3.bf16.msra.mxu0 %v7361_v11  ;;  %6057 = vmatprep.subr.bf16.mxu1 %v9289_v23 }
 0x162   :  { %5354 = vmatprep.subr.bf16.mxu0 %v7368_v12 }
 0x164   :  { %6058 = vmatpush3.bf16.msra.mxu1 %v7100_v42 }
 0x165   :  { %5355 = vmatpush3.bf16.msra.mxu0 %v7375_v14  ;;  %6059 = vmatprep.subr.bf16.mxu1 %v9289_v23 }
 0x166   :  { %5356 = vmatprep.subr.bf16.mxu0 %v7382_v22 }
 0x168   :  { %6060 = vmatpush3.bf16.msra.mxu1 %v7131_v46 }
 0x169   :  { %5357 = vmatpush3.bf16.msra.mxu0 %v7389_v24  ;;  %6061 = vmatprep.subr.bf16.mxu1 %v9289_v23 }
 0x16a   :  { %5358 = vmatprep.subr.bf16.mxu0 %v7460_v17 }
 0x16c   :  { %6062 = vmatpush3.bf16.msra.mxu1 %v7166_v52 }
 0x16d   :  { %5359 = vmatpush3.bf16.msra.mxu0 %v7467_v18  ;;  %6063 = vmatprep.subr.bf16.mxu1 %v9289_v23 }
 0x16e   :  { %5360 = vmatprep.subr.bf16.mxu0 %v7474_v19 }
 0x16f   :  { %v5154_v3 = vpop.f32.mrb[0].mxu0 }
 0x170   :  { %v5155_v6 = vpop.f32.mrb[1].mxu0  ;;  %6064 = vmatpush3.bf16.msra.mxu1 %v7193_v57 }
 0x171   :  { %v7668_v25 = vadd.f32 %v5155_v6, %v5154_v3  ;;  %5361 = vmatpush3.bf16.msra.mxu0 %v7481_v20  ;;  %v5157_v13 = vpop.f32.mrb[2].mxu0  ;;  %6065 = vmatprep.subr.bf16.mxu1 %v9289_v23 }
 0x172   :  { %v5158_v28 = vpop.f32.mrb[3].mxu0  ;;  %5362 = vmatprep.subr.bf16.mxu0 %v7488_v21  ;;  %v5207_v50 = vpop.f32.mrb[0].mxu1 }
 0x173   :  { %v7674_v26 = vadd.f32 %v5158_v28, %v5157_v13  ;;  %v5208_v63 = vpop.f32.mrb[1].mxu1  ;;  %v7687_v13 = vpop.permute.xlu0 %1394 }
 0x174   :  { %6066 = vmatpush3.bf16.msra.mxu1 %v7212_v60  ;;  %v7677_v56 = vadd.f32 %v5208_v63, %v5207_v50  ;;  %v5210_v3 = vpop.f32.mrb[2].mxu1  ;;  %vm1404_vm13 = vcmp.eq.s32.totalorder %v7687_v13, %v7027_v31  ;;  %v9321_v63 = vmov 1.0|1.0   ;;  %vm1403_vm6 = vcmp.eq.s32.totalorder %v7687_v13, %v7095_v41 }
 0x175   :  { %5363 = vmatpush3.bf16.msra.mxu0 %v7495_v29  ;;  %6067 = vmatprep.subr.bf16.mxu1 %v9289_v23  ;;  %v5211_v6 = vpop.f32.mrb[3].mxu1  ;;  %vm4763_vm1 = vmpackc.low %vm1404_vm13, %vm1399_vm11  ;;  %vm1228_vm11 = vcmp.eq.s32.totalorder %v7570_v49, %v7095_v41  ;;  %vm1233_vm13 = vcmp.eq.s32.totalorder %v7568_v48, %v7095_v41 }
 0x176   :  { %5364 = vmatprep.subr.bf16.mxu0 %v7502_v32  ;;  %v7682_v7 = vadd.f32 %v5211_v6, %v5210_v3  ;;  %vm4765_vm4 = vmpackc.low %vm1403_vm6, %vm1398_vm5 }
 0x177   :  { %vm4745_vm5 = vmpackc.low %vm1233_vm13, %vm1228_vm11 }
 0x178   :  { %6068 = vmatpush3.bf16.msra.mxu1 %v7232_v0 }
 0x179   :  { %5365 = vmatpush3.bf16.msra.mxu0 %v7511_v33  ;;  %6069 = vmatprep.subr.bf16.mxu1 %v9289_v23 }
 0x17a   :  { %6035 = vmatprep.subr.bf16.mxu0 %v9289_v23 }
 0x17c   :  { %4722 = vmatmul.mubr.msk.bf16.vlgmr.msra.gmra.mrb[28].mxu0 %vm7423_vm3, %v9321_v63  ;;  %6070 = vmatpush3.bf16.msra.mxu1 %v7249_v2  ;;  %vm1229_vm3 = vcmp.eq.s32.totalorder %v7570_v49, %v7027_v31 }
 0x17d   :  { %6036 = vmatpush3.bf16.msra.mxu0 %v7068_v37  ;;  %5478 = vmatprep.subr.bf16.mxu1 %v7532_v44  ;;  %vm4743_vm8 = vmpackc.low %vm1234_vm12, %vm1229_vm3 }
 0x17e   :  { %6037 = vmatprep.subr.bf16.mxu0 %v9289_v23  ;;  %6051 = vmatprep.mubr.msk.bf16.mxu0 %vm6833_vm2, %v9289_v23 }
 0x17f   :  { %6072 = vmatmul.mubr.msk.bf16.vlgmr.msra.gmra.mrb[28].mxu1 %vm4747_vm14, %v9321_v63  ;;  %vm1397_vm14 = vcmp.eq.s32.totalorder %v7685_v36, %v7024_v30 }
 0x180   :  { %5479 = vmatpush3.bf16.msra.mxu1 %v7042_v34  ;;  %4764 = vmatprep.mubr.msk.bf16.mxu1 %vm4763_vm1, %v9321_v63  ;;  %vm1402_vm1 = vcmp.eq.s32.totalorder %v7687_v13, %v7024_v30 }
 0x181   :  { %6038 = vmatpush3.bf16.msra.mxu0 %v7100_v42  ;;  %5480 = vmatprep.subr.bf16.mxu1 %v7051_v35  ;;  %vm4759_vm6 = vmpackc.low %vm1402_vm1, %vm1397_vm14  ;;  %vm1396_vm14 = vcmp.eq.s32.totalorder %v7685_v36, %v7017_v27  ;;  %vm1401_vm1 = vcmp.eq.s32.totalorder %v7687_v13, %v7017_v27 }
 0x182   :  { %6039 = vmatprep.subr.bf16.mxu0 %v9289_v23 }
 0x184   :  { %5481 = vmatpush3.bf16.msra.mxu1 %v7078_v39 }
 0x185   :  { %6040 = vmatpush3.bf16.msra.mxu0 %v7131_v46  ;;  %5482 = vmatprep.subr.bf16.mxu1 %v7087_v40 }
 0x186   :  { %6041 = vmatprep.subr.bf16.mxu0 %v9289_v23 }
 0x188   :  { %5483 = vmatpush3.bf16.msra.mxu1 %v7110_v43 }
 0x189   :  { %6042 = vmatpush3.bf16.msra.mxu0 %v7166_v52  ;;  %5484 = vmatprep.subr.bf16.mxu1 %v7121_v45  ;;  %v7735_v52 = vpop.permute.xlu1 %1561 }
 0x18a   :  { %6043 = vmatprep.subr.bf16.mxu0 %v9289_v23  ;;  %vm1567_vm9 = vcmp.eq.s32.totalorder %v7735_v52, %v7024_v30  ;;  %vm1566_vm3 = vcmp.eq.s32.totalorder %v7735_v52, %v7017_v27 }
 0x18c   :  { %5485 = vmatpush3.bf16.msra.mxu1 %v7137_v47 }
 0x18d   :  { %6044 = vmatpush3.bf16.msra.mxu0 %v7193_v57  ;;  %5486 = vmatprep.subr.bf16.mxu1 %v7152_v51 }
 0x18e   :  { %6045 = vmatprep.subr.bf16.mxu0 %v9289_v23 }
 0x18f   :  { %v5176_v37 = vpop.f32.mrb[4].mxu0 }
 0x190   :  { %v5177_v42 = vpop.f32.mrb[5].mxu0  ;;  %5487 = vmatpush3.bf16.msra.mxu1 %v7172_v53 }
 0x191   :  { %v5178_v46 = vadd.f32 %v5177_v42, %v5176_v37  ;;  %v5179_v4 = vpop.f32.mrb[6].mxu0  ;;  %6046 = vmatpush3.bf16.msra.mxu0 %v7212_v60  ;;  %5488 = vmatprep.subr.bf16.mxu1 %v7183_v55  ;;  %v7894_v42 = vld [vmem:[%s9276_s1 + $0x128] sm:$0xff]  }
 0x192   :  { %v5180_v15 = vpop.f32.mrb[7].mxu0  ;;  %6047 = vmatprep.subr.bf16.mxu0 %v9289_v23  ;;  %v7738_v54 = vpop.f32.mrb[4].mxu1 }
 0x193   :  { %v5181_v28 = vadd.f32 %v5180_v15, %v5179_v4  ;;  %v492_v50 = vadd.f32 %v5178_v46, %v7668_v25  ;;  %v5993_v3 = vpop.f32.mrb[5].mxu1  ;;  %v7752_v25 = vpop.permute.xlu1 %1564 }
 0x194   :  { %5489 = vmatpush3.bf16.msra.mxu1 %v7199_v58  ;;  %v7742_v6 = vpop.f32.mrb[6].mxu1  ;;  %vm1572_vm7 = vcmp.eq.s32.totalorder %v7752_v25, %v7024_v30  ;;  %vm1571_vm12 = vcmp.eq.s32.totalorder %v7752_v25, %v7017_v27  ;;  %v7933_v3 = vld [vmem:[%s9276_s1 + $0x138] sm:$0xff]  }
 0x195   :  { %6048 = vmatpush3.bf16.msra.mxu0 %v7232_v0  ;;  %5490 = vmatprep.subr.bf16.mxu1 %v7206_v59  ;;  %v495_v60 = vadd.f32 %v5181_v28, %v7674_v26  ;;  %v5994_v5 = vpop.f32.mrb[7].mxu1  ;;  %vm4779_vm10 = vmpackc.low %vm1572_vm7, %vm1567_vm9 }
 0x196   :  { %6049 = vmatprep.subr.bf16.mxu0 %v9289_v23  ;;  %vm4781_vm7 = vmpackc.low %vm1571_vm12, %vm1566_vm3  ;;  %vm1570_vm12 = vcmp.eq.s32.totalorder %v7735_v52, %v7071_v38  ;;  %v7960_v5 = vld [vmem:[%s9276_s1 + $0x88] sm:$0xff]  }
 0x197   :  { %vm4761_vm3 = vmpackc.low %vm1401_vm1, %vm1396_vm14  ;;  %vm1400_vm14 = vcmp.eq.s32.totalorder %v7685_v36, %v7071_v38  ;;  %vm1405_vm1 = vcmp.eq.s32.totalorder %v7687_v13, %v7071_v38  ;;  %v9331_v36 = vmov 14   ;;  %v8102_v13 = vld [vmem:[%s9276_s1 + $0x40] sm:$0xff]  }
 0x198   :  { %5491 = vmatpush3.bf16.msra.mxu1 %v7218_v61 }
 0x199   :  { %6050 = vmatpush3.bf16.msra.mxu0 %v7249_v2  ;;  %5492 = vmatprep.subr.bf16.mxu1 %v7225_v62  ;;  %v9325_v2 = vmov 0 }
 0x19a   :  { %5425 = vmatprep.subr.bf16.mxu0 %v7532_v44 }
 0x19c   :  { %6052 = vmatmul.mubr.msk.bf16.vlgmr.msra.gmra.mrb[32].mxu0 %vm7437_vm15, %v9321_v63  ;;  %5493 = vmatpush3.bf16.msra.mxu1 %v7239_v1  ;;  %vm540_vm15 = vcmask 261120  }
 0x19d   :  { %5426 = vmatpush3.bf16.msra.mxu0 %v7042_v34  ;;  %4744 = vmatprep.mubr.msk.bf16.mxu0 %vm4743_vm8, %v9321_v63 }
 0x19e   :  { %5427 = vmatprep.subr.bf16.mxu0 %v7051_v35  ;;  %5509 = vmatprep.subr.bf16.mxu1 %v7339_v8 }
 0x19f   :  { %4766 = vmatmul.mubr.msk.bf16.vlgmr.msra.gmra.mrb[32].mxu1 %vm4765_vm4, %v9321_v63 }
 0x1a0   :  { %5510 = vmatpush3.bf16.msra.mxu1 %v7346_v9  ;;  %4780 = vmatprep.mubr.msk.bf16.mxu1 %vm4779_vm10, %v9321_v63 }
 0x1a1   :  { %5428 = vmatpush3.bf16.msra.mxu0 %v7078_v39  ;;  %5511 = vmatprep.subr.bf16.mxu1 %v7354_v10 }
 0x1a2   :  { %5429 = vmatprep.subr.bf16.mxu0 %v7087_v40 }
 0x1a4   :  { %5512 = vmatpush3.bf16.msra.mxu1 %v7361_v11 }
 0x1a5   :  { %5430 = vmatpush3.bf16.msra.mxu0 %v7110_v43  ;;  %5513 = vmatprep.subr.bf16.mxu1 %v7368_v12 }
 0x1a6   :  { %5431 = vmatprep.subr.bf16.mxu0 %v7121_v45 }
 0x1a8   :  { %5514 = vmatpush3.bf16.msra.mxu1 %v7375_v14 }
 0x1a9   :  { %5432 = vmatpush3.bf16.msra.mxu0 %v7137_v47  ;;  %5515 = vmatprep.subr.bf16.mxu1 %v7382_v22 }
 0x1aa   :  { %5433 = vmatprep.subr.bf16.mxu0 %v7152_v51 }
 0x1ac   :  { %5516 = vmatpush3.bf16.msra.mxu1 %v7389_v24 }
 0x1ad   :  { %5434 = vmatpush3.bf16.msra.mxu0 %v7172_v53  ;;  %5517 = vmatprep.subr.bf16.mxu1 %v7460_v17 }
 0x1ae   :  { %5435 = vmatprep.subr.bf16.mxu0 %v7183_v55 }
 0x1af   :  { %v532_v26 = vpop.f32.mrb[8].mxu0 }
 0x1b0   :  { %v533_v34 = vadd.f32 %v532_v26, %v492_v50  ;;  %v5973_v35 = vpop.f32.mrb[9].mxu0  ;;  %5518 = vmatpush3.bf16.msra.mxu1 %v7467_v18  ;;  %v7967_v26 = vld [vmem:[%s9276_s1 + $0xd0] sm:$0xff]  }
 0x1b1   :  { %v535_v39 = vpop.f32.mrb[10].mxu0  ;;  %5436 = vmatpush3.bf16.msra.mxu0 %v7199_v58  ;;  %5519 = vmatprep.subr.bf16.mxu1 %v7474_v19  ;;  %v7981_v35 = vld [vmem:[%s9276_s1 + $0xd8] sm:$0xff]  }
 0x1b2   :  { %v536_v40 = vadd.f32 %v535_v39, %v495_v60  ;;  %v5974_v43 = vpop.f32.mrb[11].mxu0  ;;  %5437 = vmatprep.subr.bf16.mxu0 %v7206_v59  ;;  %v5282_v45 = vpop.f32.mrb[8].mxu1  ;;  %v7953_v60 = vld [vmem:[%s9276_s1 + $0xc8] sm:$0xff]   ;;  %v7988_v39 = vld [vmem:[%s9276_s1 + $0x98] sm:$0xff]  }
 0x1b3   :  { %v5283_v47 = vpop.f32.mrb[9].mxu1  ;;  %v7821_v59 = vpop.permute.xlu1 %1734  ;;  %v8000_v43 = vld [vmem:[%s9276_s1 + $0xe0] sm:$0xff]  }
 0x1b4   :  { %v539_v51 = vpack.c.bf16 %v536_v40, %v533_v34  ;;  %5520 = vmatpush3.bf16.msra.mxu1 %v7481_v20  ;;  %v7797_v53 = vadd.f32 %v5283_v47, %v5282_v45  ;;  %v5285_v55 = vpop.f32.mrb[10].mxu1  ;;  %vm1741_vm9 = vcmp.eq.s32.totalorder %v7821_v59, %v7017_v27  ;;  %vm1745_vm11 = vcmp.eq.s32.totalorder %v7821_v59, %v7071_v38  ;;  %v7974_v34 = vld [vmem:[%s9276_s1 + $0x90] sm:$0xff]   ;;  %v7994_v40 = vld [vmem:[%s9276_s1 + $0x120] sm:$0xff]  }
 0x1b5   :  { %5438 = vmatpush3.bf16.msra.mxu0 %v7218_v61  ;;  %5521 = vmatprep.subr.bf16.mxu1 %v7488_v21  ;;  %v5286_v58 = vpop.f32.mrb[11].mxu1  ;;  %v7823_v61 = vpop.permute.xlu0 %1731  ;;  %9328 = vst [vmem:[#allocation11_spill] sm:$0xff] %v8000_v43 }
 0x1b6   :  { %541 = vst.msk [vmem:[#allocation2] sm:$0xff] %vm540_vm15, %v539_v51  ;;  %5439 = vmatprep.subr.bf16.mxu0 %v7225_v62  ;;  %v7803_v0 = vadd.f32 %v5286_v58, %v5285_v55  ;;  %vm1736_vm8 = vcmp.eq.s32.totalorder %v7823_v61, %v7017_v27  ;;  %vm1740_vm10 = vcmp.eq.s32.totalorder %v7823_v61, %v7071_v38  ;;  %v8007_v51 = vld [vmem:[%s9276_s1 + $0xa0] sm:$0xff]  }
 0x1b7   :  { %vm7835_vm4 = vmpackc.low %vm1741_vm9, %vm1736_vm8  ;;  %vm1744_vm8 = vcmp.eq.s32.totalorder %v7821_v59, %v7027_v31  ;;  %9329 = vst [vmem:[#allocation12_spill] sm:$0xff] %v8007_v51 }
 0x1b8   :  { %5522 = vmatpush3.bf16.msra.mxu1 %v7495_v29  ;;  %vm7854_vm13 = vmpackc.low %vm1745_vm11, %vm1740_vm10  ;;  %vm1569_vm10 = vcmp.eq.s32.totalorder %v7735_v52, %v7027_v31  ;;  %vm1574_vm11 = vcmp.eq.s32.totalorder %v7752_v25, %v7027_v31 }
 0x1b9   :  { %5440 = vmatpush3.bf16.msra.mxu0 %v7239_v1  ;;  %5523 = vmatprep.subr.bf16.mxu1 %v7502_v32  ;;  %v7843_v1 = vld [vmem:[%s9276_s1 + $0x100] sm:$0xff]   ;;  %v9326_v2 = vsel %vm7854_vm13, 4294967295, %v9325_v2 }
 0x1ba   :  { %5456 = vmatprep.subr.bf16.mxu0 %v7339_v8  ;;  %9327 = vst [vmem:[#allocation10_spill] sm:$0xff] %v9326_v2  ;;  %v7862_v8 = vld [vmem:[%s9276_s1 + $0x108] sm:$0xff]  }
 0x1bc   :  { %4746 = vmatmul.mubr.msk.bf16.vlgmr.msra.gmra.mrb[36].mxu0 %vm4745_vm5, %v9321_v63  ;;  %5524 = vmatpush3.bf16.msra.mxu1 %v7511_v33  ;;  %vm1575_vm5 = vcmp.eq.s32.totalorder %v7752_v25, %v7071_v38 }
 0x1bd   :  { %5457 = vmatpush3.bf16.msra.mxu0 %v7346_v9  ;;  %6095 = vmatprep.subr.bf16.mxu1 %v9289_v23  ;;  %v7871_v9 = vld [vmem:[%s9276_s1 + $0x110] sm:$0xff]   ;;  %vm4787_vm9 = vmpackc.low %vm1575_vm5, %vm1570_vm12  ;;  %vm1743_vm12 = vcmp.eq.s32.totalorder %v7821_v59, %v7095_v41 }
 0x1be   :  { %5458 = vmatprep.subr.bf16.mxu0 %v7354_v10  ;;  %4760 = vmatprep.mubr.msk.bf16.mxu0 %vm4759_vm6, %v9321_v63  ;;  %v7880_v10 = vld [vmem:[%s9276_s1 + $0x118] sm:$0xff]   ;;  %vm1739_vm6 = vcmp.eq.s32.totalorder %v7823_v61, %v7027_v31  ;;  %vm4783_vm5 = vmpackc.low %vm1574_vm11, %vm1569_vm10  ;;  %vm1568_vm11 = vcmp.eq.s32.totalorder %v7735_v52, %v7095_v41  ;;  %v8246_v52 = vld [vmem:[%s9276_s1 + $0x68] sm:$0xff]  }
 0x1bf   :  { %4782 = vmatmul.mubr.msk.bf16.vlgmr.msra.gmra.mrb[36].mxu1 %vm4781_vm7, %v9321_v63  ;;  %vm4803_vm7 = vmpackc.low %vm1744_vm8, %vm1739_vm6 }
 0x1c0   :  { %6096 = vmatpush3.bf16.msra.mxu1 %v7843_v1  ;;  %6111 = vmatprep.mubr.msk.bf16.mxu1 %vm6833_vm2, %v9289_v23 }
 0x1c1   :  { %5459 = vmatpush3.bf16.msra.mxu0 %v7361_v11  ;;  %6097 = vmatprep.subr.bf16.mxu1 %v9289_v23 }
 0x1c2   :  { %5460 = vmatprep.subr.bf16.mxu0 %v7368_v12 }
 0x1c4   :  { %6098 = vmatpush3.bf16.msra.mxu1 %v7862_v8 }
 0x1c5   :  { %5461 = vmatpush3.bf16.msra.mxu0 %v7375_v14  ;;  %6099 = vmatprep.subr.bf16.mxu1 %v9289_v23 }
 0x1c6   :  { %5462 = vmatprep.subr.bf16.mxu0 %v7382_v22 }
 0x1c8   :  { %6100 = vmatpush3.bf16.msra.mxu1 %v7871_v9 }
 0x1c9   :  { %5463 = vmatpush3.bf16.msra.mxu0 %v7389_v24  ;;  %6101 = vmatprep.subr.bf16.mxu1 %v9289_v23 }
 0x1ca   :  { %5464 = vmatprep.subr.bf16.mxu0 %v7460_v17 }
 0x1cc   :  { %6102 = vmatpush3.bf16.msra.mxu1 %v7880_v10 }
 0x1cd   :  { %5465 = vmatpush3.bf16.msra.mxu0 %v7467_v18  ;;  %6103 = vmatprep.subr.bf16.mxu1 %v9289_v23 }
 0x1ce   :  { %5466 = vmatprep.subr.bf16.mxu0 %v7474_v19 }
 0x1cf   :  { %v5229_v11 = vpop.f32.mrb[12].mxu0 }
 0x1d0   :  { %v5230_v12 = vpop.f32.mrb[13].mxu0  ;;  %6104 = vmatpush3.bf16.msra.mxu1 %v7193_v57 }
 0x1d1   :  { %v5231_v14 = vadd.f32 %v5230_v12, %v5229_v11  ;;  %v5232_v22 = vpop.f32.mrb[14].mxu0  ;;  %5467 = vmatpush3.bf16.msra.mxu0 %v7481_v20  ;;  %6105 = vmatprep.subr.bf16.mxu1 %v9289_v23  ;;  %v8014_v11 = vld [vmem:[%s9276_s1 + $0xe8] sm:$0xff]  }
 0x1d2   :  { %v5233_v24 = vpop.f32.mrb[15].mxu0  ;;  %5468 = vmatprep.subr.bf16.mxu0 %v7488_v21  ;;  %v5313_v16 = vpop.f32.mrb[12].mxu1  ;;  %9330 = vst [vmem:[#allocation13_spill] sm:$0xff] %v8014_v11 }
 0x1d3   :  { %v659_v48 = vadd.f32 %v5231_v14, %v7677_v56  ;;  %v5234_v49 = vadd.f32 %v5233_v24, %v5232_v22  ;;  %v5314_v37 = vpop.f32.mrb[13].mxu1  ;;  %v6843_v22 = vmov 13  }
 0x1d4   :  { %6106 = vmatpush3.bf16.msra.mxu1 %v7894_v42  ;;  %v7897_v57 = vadd.f32 %v5314_v37, %v5313_v16  ;;  %v5316_v46 = vpop.f32.mrb[14].mxu1  ;;  %6327 = vset.pattern.permute.xlu1 %v6843_v22  ;;  %v8029_v37 = vld [vmem:[%s9276_s1 + $0xa8] sm:$0xff]   ;;  %v8138_v22 = vld [vmem:[%s9276_s1 + $0x10] sm:$0xff]  }
 0x1d5   :  { %v700_v4 = vadd.f32 %v7738_v54, %v659_v48  ;;  %v662_v15 = vadd.f32 %v5234_v49, %v7682_v7  ;;  %5469 = vmatpush3.bf16.msra.mxu0 %v7495_v29  ;;  %6107 = vmatprep.subr.bf16.mxu1 %v9289_v23  ;;  %v5317_v56 = vpop.f32.mrb[15].mxu1  ;;  %v7914_v7 = vld [vmem:[%s9276_s1 + $0x130] sm:$0xff]   ;;  %v6711_v49 = vld [vmem:[%s9275_s0] sm:$0xff] }
 0x1d6   :  { %5470 = vmatprep.subr.bf16.mxu0 %v7502_v32  ;;  %v7908_v28 = vadd.f32 %v5317_v56, %v5316_v46  ;;  %2573 = vperm.xlu1 %6327, %v6711_v49   ;;  %v8049_v56 = vpop.permute.xlu1 %1897 }
 0x1d7   :  { %v703_v50 = vadd.f32 %v7742_v6, %v662_v15  ;;  %v7945_v6 = vld [vmem:[%s9276_s1 + $0x80] sm:$0xff]   ;;  %vm1903_vm6 = vcmp.eq.s32.totalorder %v8049_v56, %v7024_v30 }
 0x1d8   :  { %6108 = vmatpush3.bf16.msra.mxu1 %v7914_v7 }
 0x1d9   :  { %5471 = vmatpush3.bf16.msra.mxu0 %v7511_v33  ;;  %v706_v54 = vpack.c.bf16 %v703_v50, %v700_v4  ;;  %6109 = vmatprep.subr.bf16.mxu1 %v9289_v23  ;;  %v8051_v50 = vpop.permute.xlu0 %1900 }
 0x1da   :  { %6075 = vmatprep.subr.bf16.mxu0 %v9289_v23  ;;  %vm1908_vm8 = vcmp.eq.s32.totalorder %v8051_v50, %v7024_v30 }
 0x1db   :  { %708 = vrot.lane.b32.xlu0 %v706_v54, %s6842_s15  ;;  %v6714_v54 = vld [vmem:[%s9275_s0 + $0x8] sm:$0xff]  ;;  %vm4819_vm10 = vmpackc.low %vm1908_vm8, %vm1903_vm6 }
 0x1dc   :  { %4762 = vmatmul.mubr.msk.bf16.vlgmr.msra.gmra.mrb[40].mxu0 %vm4761_vm3, %v9321_v63  ;;  %6110 = vmatpush3.bf16.msra.mxu1 %v7933_v3  ;;  %vm1738_vm3 = vcmp.eq.s32.totalorder %v7823_v61, %v7095_v41 }
 0x1dd   :  { %6076 = vmatpush3.bf16.msra.mxu0 %v7843_v1  ;;  %5584 = vmatprep.subr.bf16.mxu1 %v7532_v44 }
 0x1de   :  { %6077 = vmatprep.subr.bf16.mxu0 %v9289_v23  ;;  %6091 = vmatprep.mubr.msk.bf16.mxu0 %vm6833_vm2, %v9289_v23 }
 0x1df   :  { %6112 = vmatmul.mubr.msk.bf16.vlgmr.msra.gmra.mrb[40].mxu1 %vm4787_vm9, %v9321_v63  ;;  %2576 = vperm.xlu1 %6327, %v6714_v54   ;;  %vm4767_vm9 = vmpackc.low %vm1405_vm1, %vm1400_vm14  ;;  %vm1573_vm14 = vcmp.eq.s32.totalorder %v7752_v25, %v7095_v41  ;;  %vm1902_vm1 = vcmp.eq.s32.totalorder %v8049_v56, %v7017_v27 }
 0x1e0   :  { %5585 = vmatpush3.bf16.msra.mxu1 %v7945_v6  ;;  %4804 = vmatprep.mubr.msk.bf16.mxu1 %vm4803_vm7, %v9321_v63  ;;  %vm4805_vm7 = vmpackc.low %vm1743_vm12, %vm1738_vm3  ;;  %vm1907_vm3 = vcmp.eq.s32.totalorder %v8051_v50, %v7017_v27  ;;  %vm1737_vm12 = vcmp.eq.s32.totalorder %v7823_v61, %v7024_v30 }
 0x1e1   :  { %6078 = vmatpush3.bf16.msra.mxu0 %v7862_v8  ;;  %5586 = vmatprep.subr.bf16.mxu1 %v7953_v60  ;;  %vm4785_vm6 = vmpackc.low %vm1573_vm14, %vm1568_vm11 }
 0x1e2   :  { %6079 = vmatprep.subr.bf16.mxu0 %v9289_v23  ;;  %vm4821_vm8 = vmpackc.low %vm1907_vm3, %vm1902_vm1  ;;  %vm1906_vm3 = vcmp.eq.s32.totalorder %v8049_v56, %v7071_v38 }
 0x1e3   :  { %6329 = vset.pattern.permute.xlu1 %v9331_v36 }
 0x1e4   :  { %5587 = vmatpush3.bf16.msra.mxu1 %v7960_v5  ;;  %2746 = vperm.xlu1 %6329, %v6714_v54  }
 0x1e5   :  { %6080 = vmatpush3.bf16.msra.mxu0 %v7871_v9  ;;  %5588 = vmatprep.subr.bf16.mxu1 %v7967_v26 }
 0x1e6   :  { %6081 = vmatprep.subr.bf16.mxu0 %v9289_v23 }
 0x1e8   :  { %5589 = vmatpush3.bf16.msra.mxu1 %v7974_v34 }
 0x1e9   :  { %6082 = vmatpush3.bf16.msra.mxu0 %v7880_v10  ;;  %5590 = vmatprep.subr.bf16.mxu1 %v7981_v35 }
 0x1ea   :  { %6083 = vmatprep.subr.bf16.mxu0 %v9289_v23 }
 0x1ec   :  { %5591 = vmatpush3.bf16.msra.mxu1 %v7988_v39 }
 0x1ed   :  { %6084 = vmatpush3.bf16.msra.mxu0 %v7994_v40  ;;  %5592 = vmatprep.subr.bf16.mxu1 %v8000_v43 }
 0x1ee   :  { %6085 = vmatprep.subr.bf16.mxu0 %v9289_v23 }
 0x1ef   :  { %v5260_v45 = vpop.f32.mrb[16].mxu0 }
 0x1f0   :  { %v5261_v47 = vpop.f32.mrb[17].mxu0  ;;  %5593 = vmatpush3.bf16.msra.mxu1 %v8007_v51 }
 0x1f1   :  { %v5262_v55 = vadd.f32 %v5261_v47, %v5260_v45  ;;  %v5263_v58 = vpop.f32.mrb[18].mxu0  ;;  %6086 = vmatpush3.bf16.msra.mxu0 %v7894_v42  ;;  %5594 = vmatprep.subr.bf16.mxu1 %v8014_v11  ;;  %v8070_v45 = vld [vmem:[%s9276_s1 + $0xf8] sm:$0xff]   ;;  %v8109_v47 = vld [vmem:[%s9276_s1] sm:$0xff]  }
 0x1f2   :  { %v5264_v12 = vpop.f32.mrb[19].mxu0  ;;  %6087 = vmatprep.subr.bf16.mxu0 %v9289_v23  ;;  %v8018_v14 = vpop.f32.mrb[16].mxu1 }
 0x1f3   :  { %v5265_v24 = vadd.f32 %v5264_v12, %v5263_v58  ;;  %v8021_v16 = vadd.f32 %v7797_v53, %v5262_v55  ;;  %v6033_v48 = vpop.f32.mrb[17].mxu1  ;;  %v8038_v53 = vld [vmem:[%s9276_s1 + $0xf0] sm:$0xff]   ;;  %v8117_v55 = vld [vmem:[%s9276_s1 + $0x48] sm:$0xff]  }
 0x1f4   :  { %5595 = vmatpush3.bf16.msra.mxu1 %v8029_v37  ;;  %v8032_v46 = vpop.f32.mrb[18].mxu1  ;;  %v8124_v58 = vld [vmem:[%s9276_s1 + $0x8] sm:$0xff]   ;;  %v8131_v12 = vld [vmem:[%s9276_s1 + $0x50] sm:$0xff]   ;;  %v8152_v48 = vld [vmem:[%s9276_s1 + $0x18] sm:$0xff]  }
 0x1f5   :  { %6088 = vmatpush3.bf16.msra.mxu0 %v7914_v7  ;;  %5596 = vmatprep.subr.bf16.mxu1 %v8038_v53  ;;  %v8042_v4 = vadd.f32 %v7803_v0, %v5265_v24  ;;  %v6034_v15 = vpop.f32.mrb[19].mxu1  ;;  %v8063_v0 = vld [vmem:[%s9276_s1 + $0xb0] sm:$0xff]   ;;  %v8145_v24 = vld [vmem:[%s9276_s1 + $0x58] sm:$0xff]  }
 0x1f6   :  { %6089 = vmatprep.subr.bf16.mxu0 %v9289_v23 }
 0x1f8   :  { %5597 = vmatpush3.bf16.msra.mxu1 %v8063_v0 }
 0x1f9   :  { %6090 = vmatpush3.bf16.msra.mxu0 %v7933_v3  ;;  %5598 = vmatprep.subr.bf16.mxu1 %v8070_v45 }
 0x1fa   :  { %5531 = vmatprep.subr.bf16.mxu0 %v7532_v44  ;;  %v8093_v44 = vld [vmem:[%s9276_s1 + $0xb8] sm:$0xff]  }
 0x1fc   :  { %6092 = vmatmul.mubr.msk.bf16.vlgmr.msra.gmra.mrb[44].mxu0 %vm4767_vm9, %v9321_v63  ;;  %5599 = vmatpush3.bf16.msra.mxu1 %v8093_v44 }
 0x1fd   :  { %5532 = vmatpush3.bf16.msra.mxu0 %v7945_v6  ;;  %4784 = vmatprep.mubr.msk.bf16.mxu0 %vm4783_vm5, %v9321_v63  ;;  %vm1742_vm5 = vcmp.eq.s32.totalorder %v7821_v59, %v7024_v30 }
 0x1fe   :  { %5533 = vmatprep.subr.bf16.mxu0 %v7953_v60  ;;  %5615 = vmatprep.subr.bf16.mxu1 %v8102_v13  ;;  %vm4799_vm9 = vmpackc.low %vm1742_vm5, %vm1737_vm12  ;;  %vm1911_vm12 = vcmp.eq.s32.totalorder %v8051_v50, %v7071_v38 }
 0x1ff   :  { %4806 = vmatmul.mubr.msk.bf16.vlgmr.msra.gmra.mrb[44].mxu1 %vm4805_vm7, %v9321_v63 }
 0x200   :  { %5616 = vmatpush3.bf16.msra.mxu1 %v8109_v47  ;;  %4820 = vmatprep.mubr.msk.bf16.mxu1 %vm4819_vm10, %v9321_v63 }
 0x201   :  { %5534 = vmatpush3.bf16.msra.mxu0 %v7960_v5  ;;  %5617 = vmatprep.subr.bf16.mxu1 %v8117_v55 }
 0x202   :  { %5535 = vmatprep.subr.bf16.mxu0 %v7967_v26 }
 0x204   :  { %5618 = vmatpush3.bf16.msra.mxu1 %v8124_v58 }
 0x205   :  { %5536 = vmatpush3.bf16.msra.mxu0 %v7974_v34  ;;  %5619 = vmatprep.subr.bf16.mxu1 %v8131_v12 }
 0x206   :  { %5537 = vmatprep.subr.bf16.mxu0 %v7981_v35 }
 0x208   :  { %5620 = vmatpush3.bf16.msra.mxu1 %v8138_v22 }
 0x209   :  { %5538 = vmatpush3.bf16.msra.mxu0 %v7988_v39  ;;  %5621 = vmatprep.subr.bf16.mxu1 %v8145_v24 }
 0x20a   :  { %5539 = vmatprep.subr.bf16.mxu0 %v8000_v43 }
 0x20c   :  { %5622 = vmatpush3.bf16.msra.mxu1 %v8152_v48 }
 0x20d   :  { %5540 = vmatpush3.bf16.msra.mxu0 %v8007_v51  ;;  %5623 = vmatprep.subr.bf16.mxu1 %v7460_v17 }
 0x20e   :  { %5541 = vmatprep.subr.bf16.mxu0 %v8014_v11 }
 0x20f   :  { %v870_v49 = vpop.f32.mrb[20].mxu0 }
 0x210   :  { %v871_v15 = vadd.f32 %v870_v49, %v8021_v16  ;;  %v6013_v54 = vpop.f32.mrb[21].mxu0  ;;  %5624 = vmatpush3.bf16.msra.mxu1 %v7467_v18  ;;  %v8167_v49 = vpop.permute.xlu1 %2067 }
 0x211   :  { %v873_v36 = vpop.f32.mrb[22].mxu0  ;;  %5542 = vmatpush3.bf16.msra.mxu0 %v8029_v37  ;;  %5625 = vmatprep.subr.bf16.mxu1 %v7474_v19  ;;  %vm2072_vm7 = vcmp.eq.s32.totalorder %v8167_v49, %v7017_v27  ;;  %vm2076_vm11 = vcmp.eq.s32.totalorder %v8167_v49, %v7071_v38  ;;  %vm2075_vm5 = vcmp.eq.s32.totalorder %v8167_v49, %v7027_v31 }
 0x212   :  { %v874_v23 = vadd.f32 %v873_v36, %v8042_v4  ;;  %v6014_v2 = vpop.f32.mrb[23].mxu0  ;;  %5543 = vmatprep.subr.bf16.mxu0 %v8038_v53  ;;  %v5388_v51 = vpop.f32.mrb[20].mxu1  ;;  %v8260_v4 = vld [vmem:[%s9276_s1 + $0x70] sm:$0xff]  }
 0x213   :  { %v5389_v17 = vpop.f32.mrb[21].mxu1 }
 0x214   :  { %v877_v43 = vpack.c.bf16 %v874_v23, %v871_v15  ;;  %5626 = vmatpush3.bf16.msra.mxu1 %v7481_v20  ;;  %v8165_v11 = vadd.f32 %v5389_v17, %v5388_v51  ;;  %v5391_v16 = vpop.f32.mrb[22].mxu1  ;;  %v8191_v19 = vpop.permute.xlu1 %2070  ;;  %v9332_v20 = vmov 0 }
 0x215   :  { %5544 = vmatpush3.bf16.msra.mxu0 %v8063_v0  ;;  %5627 = vmatprep.subr.bf16.mxu1 %v7488_v21  ;;  %v5392_v18 = vpop.f32.mrb[23].mxu1  ;;  %vm2077_vm10 = vcmp.eq.s32.totalorder %v8191_v19, %v7017_v27  ;;  %vm2081_vm14 = vcmp.eq.s32.totalorder %v8191_v19, %v7071_v38  ;;  %v9335_v21 = vmov 0.0  }
 0x216   :  { %879 = vrot.lane.b32.xlu0 %v877_v43, %s6844_s24  ;;  %5545 = vmatprep.subr.bf16.mxu0 %v8070_v45  ;;  %v8177_v23 = vadd.f32 %v5392_v18, %v5391_v16  ;;  %vm8199_vm0 = vmpackc.low %vm2077_vm10, %vm2072_vm7  ;;  %v8253_v43 = vld [vmem:[%s9276_s1 + $0x28] sm:$0xff]   ;;  %vm1905_vm7 = vcmp.eq.s32.totalorder %v8049_v56, %v7027_v31  ;;  %vm1910_vm10 = vcmp.eq.s32.totalorder %v8051_v50, %v7027_v31 }
 0x217   :  { %v9333_v20 = vsel %vm8199_vm0, 4294967295, %v9332_v20  ;;  %vm8209_vm1 = vmpackc.low %vm2081_vm14, %vm2076_vm11  ;;  %vm2074_vm11 = vcmp.eq.s32.totalorder %v8167_v49, %v7095_v41  ;;  %vm2079_vm14 = vcmp.eq.s32.totalorder %v8191_v19, %v7095_v41 }
 0x218   :  { %5628 = vmatpush3.bf16.msra.mxu1 %v7495_v29  ;;  %9334 = vst [vmem:[#allocation14_spill] sm:$0xff] %v9333_v20  ;;  %v9336_v29 = vmov 0 }
 0x219   :  { %5546 = vmatpush3.bf16.msra.mxu0 %v8093_v44  ;;  %5629 = vmatprep.subr.bf16.mxu1 %v7502_v32  ;;  %v9337_v29 = vsel %vm8209_vm1, 4294967295, %v9336_v29  ;;  %v8232_v32 = vld [vmem:[%s9276_s1 + $0x60] sm:$0xff]  }
 0x21a   :  { %5562 = vmatprep.subr.bf16.mxu0 %v8102_v13  ;;  %9338 = vst [vmem:[#allocation15_spill] sm:$0xff] %v9337_v29  ;;  %v8272_v29 = vld [vmem:[%s9276_s1 + $0x30] sm:$0xff]  }
 0x21c   :  { %4786 = vmatmul.mubr.msk.bf16.vlgmr.msra.gmra.mrb[48].mxu0 %vm4785_vm6, %v9321_v63  ;;  %5630 = vmatpush3.bf16.msra.mxu1 %v7511_v33  ;;  %v8239_v33 = vld [vmem:[%s9276_s1 + $0x20] sm:$0xff]   ;;  %vm2080_vm6 = vcmp.eq.s32.totalorder %v8191_v19, %v7027_v31 }
 0x21d   :  { %5563 = vmatpush3.bf16.msra.mxu0 %v8109_v47  ;;  %6135 = vmatprep.subr.bf16.mxu1 %v9335_v21 }
 0x21e   :  { %5564 = vmatprep.subr.bf16.mxu0 %v8117_v55  ;;  %4800 = vmatprep.mubr.msk.bf16.mxu0 %vm4799_vm9, %v9321_v63  ;;  %vm4843_vm9 = vmpackc.low %vm2080_vm6, %vm2075_vm5 }
 0x21f   :  { %4822 = vmatmul.mubr.msk.bf16.vlgmr.msra.gmra.mrb[48].mxu1 %vm4821_vm8, %v9321_v63  ;;  %vm4827_vm8 = vmpackc.low %vm1911_vm12, %vm1906_vm3 }
 0x220   :  { %6136 = vmatpush3.bf16.msra.mxu1 %v7843_v1  ;;  %6151 = vmatprep.mubr.msk.bf16.mxu1 %vm6833_vm2, %v9335_v21  ;;  %vm4823_vm3 = vmpackc.low %vm1910_vm10, %vm1905_vm7  ;;  %vm2073_vm7 = vcmp.eq.s32.totalorder %v8167_v49, %v7024_v30  ;;  %vm2078_vm10 = vcmp.eq.s32.totalorder %v8191_v19, %v7024_v30 }
 0x221   :  { %5565 = vmatpush3.bf16.msra.mxu0 %v8124_v58  ;;  %6137 = vmatprep.subr.bf16.mxu1 %v9335_v21  ;;  %vm4845_vm6 = vmpackc.low %vm2079_vm14, %vm2074_vm11 }
 0x222   :  { %5566 = vmatprep.subr.bf16.mxu0 %v8131_v12 }
 0x224   :  { %6138 = vmatpush3.bf16.msra.mxu1 %v7862_v8 }
 0x225   :  { %5567 = vmatpush3.bf16.msra.mxu0 %v8138_v22  ;;  %6139 = vmatprep.subr.bf16.mxu1 %v9335_v21 }
 0x226   :  { %5568 = vmatprep.subr.bf16.mxu0 %v8145_v24 }
 0x228   :  { %6140 = vmatpush3.bf16.msra.mxu1 %v7871_v9 }
 0x229   :  { %5569 = vmatpush3.bf16.msra.mxu0 %v8152_v48  ;;  %6141 = vmatprep.subr.bf16.mxu1 %v9335_v21 }
 0x22a   :  { %5570 = vmatprep.subr.bf16.mxu0 %v8232_v32 }
 0x22c   :  { %6142 = vmatpush3.bf16.msra.mxu1 %v7880_v10 }
 0x22d   :  { %5571 = vmatpush3.bf16.msra.mxu0 %v8239_v33  ;;  %6143 = vmatprep.subr.bf16.mxu1 %v9335_v21 }
 0x22e   :  { %5572 = vmatprep.subr.bf16.mxu0 %v8246_v52 }
 0x22f   :  { %v5335_v25 = vpop.f32.mrb[24].mxu0 }
 0x230   :  { %v5336_v59 = vpop.f32.mrb[25].mxu0  ;;  %6144 = vmatpush3.bf16.msra.mxu1 %v7994_v40 }
 0x231   :  { %v5337_v61 = vadd.f32 %v5336_v59, %v5335_v25  ;;  %v5338_v2 = vpop.f32.mrb[26].mxu0  ;;  %5573 = vmatpush3.bf16.msra.mxu0 %v8253_v43  ;;  %6145 = vmatprep.subr.bf16.mxu1 %v9335_v21 }
 0x232   :  { %v5339_v51 = vpop.f32.mrb[27].mxu0  ;;  %5574 = vmatprep.subr.bf16.mxu0 %v8260_v4  ;;  %v5419_v15 = vpop.f32.mrb[24].mxu1 }
 0x233   :  { %v1001_v54 = vadd.f32 %v5337_v61, %v7897_v57  ;;  %v5340_v36 = vadd.f32 %v5339_v51, %v5338_v2  ;;  %v5420_v17 = vpop.f32.mrb[25].mxu1  ;;  %v8279_v61 = vld [vmem:[%s9276_s1 + $0x78] sm:$0xff]  }
 0x234   :  { %6146 = vmatpush3.bf16.msra.mxu1 %v7894_v42  ;;  %v8265_v16 = vadd.f32 %v5420_v17, %v5419_v15  ;;  %v5422_v18 = vpop.f32.mrb[26].mxu1  ;;  %v8289_v2 = vld [vmem:[%s9276_s1 + $0x38] sm:$0xff]   ;;  %v8313_v15 = vld [vmem:[%s9276_s1 + $0xc0] sm:$0xff]  }
 0x235   :  { %v1042_v25 = vadd.f32 %v8018_v14, %v1001_v54  ;;  %v1004_v59 = vadd.f32 %v5340_v36, %v7908_v28  ;;  %5575 = vmatpush3.bf16.msra.mxu0 %v8272_v29  ;;  %6147 = vmatprep.subr.bf16.mxu1 %v9335_v21  ;;  %v5423_v57 = vpop.f32.mrb[27].mxu1  ;;  %v9342_v17 = vld [vmem:[#allocation11_spill] sm:$0xff] }
 0x236   :  { %5576 = vmatprep.subr.bf16.mxu0 %v8279_v61  ;;  %v8282_v14 = vadd.f32 %v5423_v57, %v5422_v18 }
 0x237   :  { %v1045_v28 = vadd.f32 %v8032_v46, %v1004_v59  ;;  %v8303_v46 = vpop.permute.xlu0 %2237  ;;  %v9343_v59 = vld [vmem:[#allocation12_spill] sm:$0xff] }
 0x238   :  { %9339 = vst [vmem:[#allocation16_spill] sm:$0xff] %v8282_v14  ;;  %6148 = vmatpush3.bf16.msra.mxu1 %v7914_v7  ;;  %vm2243_vm12 = vcmp.eq.s32.totalorder %v8303_v46, %v7024_v30  ;;  %vm2242_vm11 = vcmp.eq.s32.totalorder %v8303_v46, %v7017_v27 }
 0x239   :  { %5577 = vmatpush3.bf16.msra.mxu0 %v8289_v2  ;;  %v1048_v51 = vpack.c.bf16 %v1045_v28, %v1042_v25  ;;  %6149 = vmatprep.subr.bf16.mxu1 %v9335_v21 }
 0x23a   :  { %6115 = vmatprep.subr.bf16.mxu0 %v9335_v21 }
 0x23b   :  { %1050 = vrot.lane.b32.xlu0 %v1048_v51, %s6845_s19  ;;  %v8323_v62 = vpop.permute.xlu0 %2410  ;;  %v9344_v51 = vld [vmem:[#allocation13_spill] sm:$0xff] }
 0x23c   :  { %4802 = vmatmul.mubr.msk.bf16.vlgmr.msra.gmra.mrb[52].mxu0 %vm7835_vm4, %v9321_v63  ;;  %6150 = vmatpush3.bf16.msra.mxu1 %v7933_v3  ;;  %9340 = vst [vmem:[#allocation17_spill] sm:$0xff] %v8323_v62  ;;  %vm711_vm4 = vcmask 523520  }
 0x23d   :  { %6116 = vmatpush3.bf16.msra.mxu0 %v7843_v1  ;;  %5690 = vmatprep.subr.bf16.mxu1 %v8313_v15 }
 0x23e   :  { %6117 = vmatprep.subr.bf16.mxu0 %v9335_v21  ;;  %6131 = vmatprep.mubr.msk.bf16.mxu0 %vm6833_vm2, %v9335_v21 }
 0x23f   :  { %6152 = vmatmul.mubr.msk.bf16.vlgmr.msra.gmra.mrb[52].mxu1 %vm4827_vm8, %v9321_v63  ;;  %v8331_v54 = vpop.permute.xlu0 %2743 }
 0x240   :  { %5691 = vmatpush3.bf16.msra.mxu1 %v7945_v6  ;;  %4844 = vmatprep.mubr.msk.bf16.mxu1 %vm4843_vm9, %v9321_v63  ;;  %9341 = vst [vmem:[#allocation18_spill] sm:$0xff] %v8331_v54  ;;  %vm1909_vm9 = vcmp.eq.s32.totalorder %v8051_v50, %v7095_v41 }
 0x241   :  { %6118 = vmatpush3.bf16.msra.mxu0 %v7862_v8  ;;  %5692 = vmatprep.subr.bf16.mxu1 %v7953_v60 }
 0x242   :  { %6119 = vmatprep.subr.bf16.mxu0 %v9335_v21 }
 0x244   :  { %5693 = vmatpush3.bf16.msra.mxu1 %v7960_v5 }
 0x245   :  { %6120 = vmatpush3.bf16.msra.mxu0 %v7871_v9  ;;  %5694 = vmatprep.subr.bf16.mxu1 %v7967_v26 }
 0x246   :  { %6121 = vmatprep.subr.bf16.mxu0 %v9335_v21 }
 0x248   :  { %5695 = vmatpush3.bf16.msra.mxu1 %v7974_v34 }
 0x249   :  { %6122 = vmatpush3.bf16.msra.mxu0 %v7880_v10  ;;  %5696 = vmatprep.subr.bf16.mxu1 %v7981_v35 }
 0x24a   :  { %6123 = vmatprep.subr.bf16.mxu0 %v9335_v21 }
 0x24c   :  { %5697 = vmatpush3.bf16.msra.mxu1 %v7988_v39 }
 0x24d   :  { %6124 = vmatpush3.bf16.msra.mxu0 %v7994_v40  ;;  %v709_v36 = vpop.permute.xlu0 %708  ;;  %5698 = vmatprep.subr.bf16.mxu1 %v9342_v17 }
 0x24e   :  { %712 = vst.msk [vmem:[#allocation2] sm:$0xff] %vm711_vm4, %v709_v36  ;;  %6125 = vmatprep.subr.bf16.mxu0 %v9335_v21 }
 0x24f   :  { %v5366_v18 = vpop.f32.mrb[28].mxu0 }
 0x250   :  { %v5367_v25 = vpop.f32.mrb[29].mxu0  ;;  %5699 = vmatpush3.bf16.msra.mxu1 %v9343_v59 }
 0x251   :  { %v5368_v57 = vadd.f32 %v5367_v25, %v5366_v18  ;;  %v5369_v28 = vpop.f32.mrb[30].mxu0  ;;  %6126 = vmatpush3.bf16.msra.mxu0 %v7894_v42  ;;  %5700 = vmatprep.subr.bf16.mxu1 %v9344_v51 }
 0x252   :  { %v5370_v54 = vpop.f32.mrb[31].mxu0  ;;  %6127 = vmatprep.subr.bf16.mxu0 %v9335_v21  ;;  %v8346_v20 = vpop.f32.mrb[28].mxu1 }
 0x253   :  { %v5371_v62 = vadd.f32 %v5370_v54, %v5369_v28  ;;  %v1171_v36 = vadd.f32 %v8165_v11, %v5368_v57  ;;  %v6073_v38 = vpop.f32.mrb[29].mxu1 }
 0x254   :  { %5701 = vmatpush3.bf16.msra.mxu1 %v8029_v37  ;;  %v8350_v14 = vpop.f32.mrb[30].mxu1  ;;  %v8360_v38 = vpop.permute.xlu1 %2240 }
 0x255   :  { %6128 = vmatpush3.bf16.msra.mxu0 %v7914_v7  ;;  %5702 = vmatprep.subr.bf16.mxu1 %v8038_v53  ;;  %v1174_v18 = vadd.f32 %v8177_v23, %v5371_v62  ;;  %v6074_v25 = vpop.f32.mrb[31].mxu1  ;;  %vm2248_vm5 = vcmp.eq.s32.totalorder %v8360_v38, %v7024_v30  ;;  %vm2247_vm14 = vcmp.eq.s32.totalorder %v8360_v38, %v7017_v27 }
 0x256   :  { %6129 = vmatprep.subr.bf16.mxu0 %v9335_v21  ;;  %vm4859_vm8 = vmpackc.low %vm2248_vm5, %vm2243_vm12 }
 0x257   :  { %vm4839_vm12 = vmpackc.low %vm2078_vm10, %vm2073_vm7 }
 0x258   :  { %5703 = vmatpush3.bf16.msra.mxu1 %v8063_v0  ;;  %vm4861_vm5 = vmpackc.low %vm2247_vm14, %vm2242_vm11  ;;  %vm2245_vm14 = vcmp.eq.s32.totalorder %v8303_v46, %v7027_v31 }
 0x259   :  { %6130 = vmatpush3.bf16.msra.mxu0 %v7933_v3  ;;  %5704 = vmatprep.subr.bf16.mxu1 %v8070_v45 }
 0x25a   :  { %5637 = vmatprep.subr.bf16.mxu0 %v8313_v15 }
 0x25c   :  { %6132 = vmatmul.mubr.msk.bf16.vlgmr.msra.gmra.mrb[56].mxu0 %vm7854_vm13, %v9321_v63  ;;  %5705 = vmatpush3.bf16.msra.mxu1 %v8093_v44  ;;  %vm1904_vm13 = vcmp.eq.s32.totalorder %v8049_v56, %v7095_v41 }
 0x25d   :  { %5638 = vmatpush3.bf16.msra.mxu0 %v7945_v6  ;;  %4824 = vmatprep.mubr.msk.bf16.mxu0 %vm4823_vm3, %v9321_v63  ;;  %vm4825_vm3 = vmpackc.low %vm1909_vm9, %vm1904_vm13 }
 0x25e   :  { %5639 = vmatprep.subr.bf16.mxu0 %v7953_v60  ;;  %5721 = vmatprep.subr.bf16.mxu1 %v8102_v13 }
 0x25f   :  { %4846 = vmatmul.mubr.msk.bf16.vlgmr.msra.gmra.mrb[56].mxu1 %vm4845_vm6, %v9321_v63  ;;  %vm882_vm6 = vcmask 785920  }
 0x260   :  { %5722 = vmatpush3.bf16.msra.mxu1 %v8109_v47  ;;  %4860 = vmatprep.mubr.msk.bf16.mxu1 %vm4859_vm8, %v9321_v63 }
 0x261   :  { %5640 = vmatpush3.bf16.msra.mxu0 %v7960_v5  ;;  %5723 = vmatprep.subr.bf16.mxu1 %v8117_v55 }
 0x262   :  { %5641 = vmatprep.subr.bf16.mxu0 %v7967_v26 }
 0x264   :  { %5724 = vmatpush3.bf16.msra.mxu1 %v8124_v58 }
 0x265   :  { %5642 = vmatpush3.bf16.msra.mxu0 %v7974_v34  ;;  %5725 = vmatprep.subr.bf16.mxu1 %v8131_v12 }
 0x266   :  { %5643 = vmatprep.subr.bf16.mxu0 %v7981_v35 }
 0x268   :  { %5726 = vmatpush3.bf16.msra.mxu1 %v8138_v22 }
 0x269   :  { %5644 = vmatpush3.bf16.msra.mxu0 %v7988_v39  ;;  %5727 = vmatprep.subr.bf16.mxu1 %v8145_v24 }
 0x26a   :  { %5645 = vmatprep.subr.bf16.mxu0 %v9342_v17 }
 0x26c   :  { %5728 = vmatpush3.bf16.msra.mxu1 %v8152_v48 }
 0x26d   :  { %5646 = vmatpush3.bf16.msra.mxu0 %v9343_v59  ;;  %5729 = vmatprep.subr.bf16.mxu1 %v8232_v32 }
 0x26e   :  { %5647 = vmatprep.subr.bf16.mxu0 %v9344_v51 }
 0x26f   :  { %v1211_v23 = vpop.f32.mrb[32].mxu0 }
 0x270   :  { %v1212_v62 = vadd.f32 %v1211_v23, %v1171_v36  ;;  %v6053_v54 = vpop.f32.mrb[33].mxu0  ;;  %5730 = vmatpush3.bf16.msra.mxu1 %v8239_v33 }
 0x271   :  { %v1214_v57 = vpop.f32.mrb[34].mxu0  ;;  %5648 = vmatpush3.bf16.msra.mxu0 %v8029_v37  ;;  %5731 = vmatprep.subr.bf16.mxu1 %v8246_v52 }
 0x272   :  { %v1215_v28 = vadd.f32 %v1214_v57, %v1174_v18  ;;  %v6054_v25 = vpop.f32.mrb[35].mxu0  ;;  %5649 = vmatprep.subr.bf16.mxu0 %v8038_v53  ;;  %v5494_v11 = vpop.f32.mrb[32].mxu1 }
 0x273   :  { %v5495_v59 = vpop.f32.mrb[33].mxu1 }
 0x274   :  { %v1218_v17 = vpack.c.bf16 %v1215_v28, %v1212_v62  ;;  %5732 = vmatpush3.bf16.msra.mxu1 %v8253_v43  ;;  %v8405_v51 = vadd.f32 %v5495_v59, %v5494_v11  ;;  %v5497_v36 = vpop.f32.mrb[34].mxu1 }
 0x275   :  { %5650 = vmatpush3.bf16.msra.mxu0 %v8063_v0  ;;  %5733 = vmatprep.subr.bf16.mxu1 %v8260_v4  ;;  %v5498_v23 = vpop.f32.mrb[35].mxu1 }
 0x276   :  { %1219 = vst.msk [vmem:[#allocation2 + $0x8] sm:$0xff] %vm540_vm15, %v1218_v17  ;;  %5651 = vmatprep.subr.bf16.mxu0 %v8070_v45  ;;  %v8411_v18 = vadd.f32 %v5498_v23, %v5497_v36  ;;  %v9346_v23 = vld [vmem:[#allocation16_spill] sm:$0xff] }
 0x278   :  { %5734 = vmatpush3.bf16.msra.mxu1 %v8272_v29 }
 0x279   :  { %5652 = vmatpush3.bf16.msra.mxu0 %v8093_v44  ;;  %5735 = vmatprep.subr.bf16.mxu1 %v8279_v61 }
 0x27a   :  { %5668 = vmatprep.subr.bf16.mxu0 %v8102_v13 }
 0x27c   :  { %4826 = vmatmul.mubr.msk.bf16.vlgmr.msra.gmra.mrb[60].mxu0 %vm4825_vm3, %v9321_v63  ;;  %5736 = vmatpush3.bf16.msra.mxu1 %v8289_v2  ;;  %vm2250_vm3 = vcmp.eq.s32.totalorder %v8360_v38, %v7027_v31 }
 0x27d   :  { %5669 = vmatpush3.bf16.msra.mxu0 %v8109_v47  ;;  %6175 = vmatprep.subr.bf16.mxu1 %v9335_v21 }
 0x27e   :  { %5670 = vmatprep.subr.bf16.mxu0 %v8117_v55  ;;  %4840 = vmatprep.mubr.msk.bf16.mxu0 %vm4839_vm12, %v9321_v63 }
 0x27f   :  { %4862 = vmatmul.mubr.msk.bf16.vlgmr.msra.gmra.mrb[60].mxu1 %vm4861_vm5, %v9321_v63 }
 0x280   :  { %6176 = vmatpush3.bf16.msra.mxu1 %v7843_v1  ;;  %6191 = vmatprep.mubr.msk.bf16.mxu1 %vm6833_vm2, %v9335_v21 }
 0x281   :  { %5671 = vmatpush3.bf16.msra.mxu0 %v8124_v58  ;;  %6177 = vmatprep.subr.bf16.mxu1 %v9335_v21 }
 0x282   :  { %5672 = vmatprep.subr.bf16.mxu0 %v8131_v12 }
 0x284   :  { %6178 = vmatpush3.bf16.msra.mxu1 %v7862_v8 }
 0x285   :  { %5673 = vmatpush3.bf16.msra.mxu0 %v8138_v22  ;;  %6179 = vmatprep.subr.bf16.mxu1 %v9335_v21 }
 0x286   :  { %5674 = vmatprep.subr.bf16.mxu0 %v8145_v24 }
 0x288   :  { %v880_v56 = vpop.permute.xlu0 %879  ;;  %6180 = vmatpush3.bf16.msra.mxu1 %v7871_v9 }
 0x289   :  { %883 = vst.msk [vmem:[#allocation2] sm:$0xff] %vm882_vm6, %v880_v56  ;;  %5675 = vmatpush3.bf16.msra.mxu0 %v8152_v48  ;;  %6181 = vmatprep.subr.bf16.mxu1 %v9335_v21 }
 0x28a   :  { %5676 = vmatprep.subr.bf16.mxu0 %v8232_v32 }
 0x28c   :  { %6182 = vmatpush3.bf16.msra.mxu1 %v7880_v10 }
 0x28d   :  { %5677 = vmatpush3.bf16.msra.mxu0 %v8239_v33  ;;  %6183 = vmatprep.subr.bf16.mxu1 %v9335_v21 }
 0x28e   :  { %5678 = vmatprep.subr.bf16.mxu0 %v8246_v52 }
 0x28f   :  { %v5441_v50 = vpop.f32.mrb[36].mxu0 }
 0x290   :  { %v5442_v49 = vpop.f32.mrb[37].mxu0  ;;  %6184 = vmatpush3.bf16.msra.mxu1 %v7994_v40 }
 0x291   :  { %v5443_v19 = vadd.f32 %v5442_v49, %v5441_v50  ;;  %v5444_v17 = vpop.f32.mrb[38].mxu0  ;;  %5679 = vmatpush3.bf16.msra.mxu0 %v8253_v43  ;;  %6185 = vmatprep.subr.bf16.mxu1 %v9335_v21 }
 0x292   :  { %v5445_v59 = vpop.f32.mrb[39].mxu0  ;;  %5680 = vmatprep.subr.bf16.mxu0 %v8260_v4  ;;  %v5525_v62 = vpop.f32.mrb[36].mxu1 }
 0x293   :  { %v1337_v54 = vadd.f32 %v5443_v19, %v8265_v16  ;;  %v5446_v57 = vadd.f32 %v5445_v59, %v5444_v17  ;;  %v5526_v28 = vpop.f32.mrb[37].mxu1  ;;  %v8471_v19 = vpop.permute.xlu1 %2407  ;;  %v9347_v17 = vld [vmem:[#allocation9_spill] sm:$0xff] }
 0x294   :  { %6186 = vmatpush3.bf16.msra.mxu1 %v7894_v42  ;;  %v8461_v25 = vadd.f32 %v5526_v28, %v5525_v62  ;;  %v5528_v11 = vpop.f32.mrb[38].mxu1  ;;  %vm2246_vm8 = vcmp.eq.s32.totalorder %v8303_v46, %v9347_v17  ;;  %vm2251_vm13 = vcmp.eq.s32.totalorder %v8360_v38, %v9347_v17  ;;  %vm2415_vm9 = vcmp.eq.s32.totalorder %v8471_v19, %v7027_v31 }
 0x295   :  { %v1378_v36 = vadd.f32 %v8346_v20, %v1337_v54  ;;  %v1340_v56 = vadd.f32 %v5446_v57, %v9346_v23  ;;  %5681 = vmatpush3.bf16.msra.mxu0 %v8272_v29  ;;  %6187 = vmatprep.subr.bf16.mxu1 %v9335_v21  ;;  %v5529_v50 = vpop.f32.mrb[39].mxu1  ;;  %vm4867_vm10 = vmpackc.low %vm2251_vm13, %vm2246_vm8 }
 0x296   :  { %5682 = vmatprep.subr.bf16.mxu0 %v8279_v61  ;;  %v8468_v49 = vadd.f32 %v5529_v50, %v5528_v11  ;;  %v9353_v11 = vld [vmem:[#allocation13_spill] sm:$0xff] }
 0x297   :  { %v1381_v16 = vadd.f32 %v8350_v14, %v1340_v56  ;;  %v9348_v14 = vld [vmem:[#allocation17_spill] sm:$0xff]  ;;  %v8514_v62 = vpop.permute.xlu1 %2573 }
 0x298   :  { %6188 = vmatpush3.bf16.msra.mxu1 %v7914_v7  ;;  %vm2420_vm7 = vcmp.eq.s32.totalorder %v9348_v14, %v7027_v31  ;;  %vm2581_vm12 = vcmp.eq.s32.totalorder %v8514_v62, %v7027_v31  ;;  %vm2580_vm13 = vcmp.eq.s32.totalorder %v8514_v62, %v7095_v41 }
 0x299   :  { %5683 = vmatpush3.bf16.msra.mxu0 %v8289_v2  ;;  %v1384_v20 = vpack.c.bf16 %v1381_v16, %v1378_v36  ;;  %6189 = vmatprep.subr.bf16.mxu1 %v9335_v21  ;;  %vm4883_vm11 = vmpackc.low %vm2420_vm7, %vm2415_vm9 }
 0x29a   :  { %6155 = vmatprep.subr.bf16.mxu0 %v9335_v21  ;;  %vm4863_vm7 = vmpackc.low %vm2250_vm3, %vm2245_vm14 }
 0x29b   :  { %1386 = vrot.lane.b32.xlu1 %v1384_v20, %s6842_s15  ;;  %v8529_v59 = vpop.permute.xlu1 %2576 }
 0x29c   :  { %4842 = vmatmul.mubr.msk.bf16.vlgmr.msra.gmra.mrb[64].mxu0 %vm8199_vm0, %v9321_v63  ;;  %6190 = vmatpush3.bf16.msra.mxu1 %v7933_v3  ;;  %vm9351_vm0 = vcmask 1048320   ;;  %vm2586_vm5 = vcmp.eq.s32.totalorder %v8529_v59, %v7027_v31  ;;  %vm2585_vm9 = vcmp.eq.s32.totalorder %v8529_v59, %v7095_v41 }
 0x29d   :  { %6156 = vmatpush3.bf16.msra.mxu0 %v7843_v1  ;;  %5796 = vmatprep.subr.bf16.mxu1 %v8313_v15  ;;  %vm8540_vm8 = vmpackc.low %vm2586_vm5, %vm2581_vm12  ;;  %vm2584_vm12 = vcmp.eq.s32.totalorder %v8529_v59, %v7024_v30 }
 0x29e   :  { %6157 = vmatprep.subr.bf16.mxu0 %v9335_v21  ;;  %6171 = vmatprep.mubr.msk.bf16.mxu0 %vm6833_vm2, %v9335_v21  ;;  %vm8560_vm5 = vmpackc.low %vm2585_vm9, %vm2580_vm13  ;;  %vm2249_vm13 = vcmp.eq.s32.totalorder %v8360_v38, %v7095_v41  ;;  %vm2413_vm9 = vcmp.eq.s32.totalorder %v8471_v19, %v7024_v30 }
 0x29f   :  { %6192 = vmatmul.mubr.msk.bf16.vlgmr.msra.gmra.mrb[64].mxu1 %vm4867_vm10, %v9321_v63  ;;  %vm2414_vm10 = vcmp.eq.s32.totalorder %v8471_v19, %v7095_v41 }
 0x2a0   :  { %5797 = vmatpush3.bf16.msra.mxu1 %v7945_v6  ;;  %4884 = vmatprep.mubr.msk.bf16.mxu1 %vm4883_vm11, %v9321_v63  ;;  %vm2419_vm11 = vcmp.eq.s32.totalorder %v9348_v14, %v7095_v41 }
 0x2a1   :  { %6158 = vmatpush3.bf16.msra.mxu0 %v7862_v8  ;;  %5798 = vmatprep.subr.bf16.mxu1 %v7953_v60  ;;  %v9350_v8 = vld [vmem:[#allocation11_spill] sm:$0xff]  ;;  %vm4885_vm14 = vmpackc.low %vm2419_vm11, %vm2414_vm10  ;;  %vm2578_vm10 = vcmp.eq.s32.totalorder %v8514_v62, %v7017_v27  ;;  %vm2583_vm11 = vcmp.eq.s32.totalorder %v8529_v59, %v7017_v27 }
 0x2a2   :  { %6159 = vmatprep.subr.bf16.mxu0 %v9335_v21 }
 0x2a4   :  { %5799 = vmatpush3.bf16.msra.mxu1 %v7960_v5 }
 0x2a5   :  { %6160 = vmatpush3.bf16.msra.mxu0 %v7871_v9  ;;  %5800 = vmatprep.subr.bf16.mxu1 %v7967_v26 }
 0x2a6   :  { %6161 = vmatprep.subr.bf16.mxu0 %v9335_v21 }
 0x2a8   :  { %5801 = vmatpush3.bf16.msra.mxu1 %v7974_v34 }
 0x2a9   :  { %6162 = vmatpush3.bf16.msra.mxu0 %v7880_v10  ;;  %5802 = vmatprep.subr.bf16.mxu1 %v7981_v35  ;;  %v9352_v10 = vld [vmem:[#allocation12_spill] sm:$0xff] }
 0x2aa   :  { %6163 = vmatprep.subr.bf16.mxu0 %v9335_v21 }
 0x2ac   :  { %5803 = vmatpush3.bf16.msra.mxu1 %v7988_v39 }
 0x2ad   :  { %6164 = vmatpush3.bf16.msra.mxu0 %v7994_v40  ;;  %v1051_v1 = vpop.permute.xlu0 %1050  ;;  %5804 = vmatprep.subr.bf16.mxu1 %v9350_v8 }
 0x2ae   :  { %1053 = vst.msk [vmem:[#allocation2] sm:$0xff] %vm9351_vm0, %v1051_v1  ;;  %6165 = vmatprep.subr.bf16.mxu0 %v9335_v21  ;;  %vm2579_vm0 = vcmp.eq.s32.totalorder %v8514_v62, %v7024_v30 }
 0x2af   :  { %v5472_v9 = vpop.f32.mrb[40].mxu0  ;;  %vm4899_vm3 = vmpackc.low %vm2584_vm12, %vm2579_vm0 }
 0x2b0   :  { %v5473_v54 = vpop.f32.mrb[41].mxu0  ;;  %5805 = vmatpush3.bf16.msra.mxu1 %v9352_v10 }
 0x2b1   :  { %v5474_v57 = vadd.f32 %v5473_v54, %v5472_v9  ;;  %v5475_v28 = vpop.f32.mrb[42].mxu0  ;;  %6166 = vmatpush3.bf16.msra.mxu0 %v7894_v42  ;;  %5806 = vmatprep.subr.bf16.mxu1 %v9353_v11 }
 0x2b2   :  { %v5476_v40 = vpop.f32.mrb[43].mxu0  ;;  %6167 = vmatprep.subr.bf16.mxu0 %v9335_v21  ;;  %v8520_v36 = vpop.f32.mrb[40].mxu1 }
 0x2b3   :  { %v5477_v23 = vadd.f32 %v5476_v40, %v5475_v28  ;;  %v1507_v56 = vadd.f32 %v8405_v51, %v5474_v57  ;;  %v6113_v50 = vpop.f32.mrb[41].mxu1  ;;  %v9359_v28 = vld [vmem:[#allocation18_spill] sm:$0xff]  ;;  %v8752_v40 = vld [vmem:[%s9276_s1 + $0xd0] sm:$0xff]   ;;  %v6761_v51 = vld [vmem:[%s9276_s1 + $0x8] sm:$0xff]  }
 0x2b4   :  { %5807 = vmatpush3.bf16.msra.mxu1 %v8029_v37  ;;  %v8524_v16 = vpop.f32.mrb[42].mxu1 }
 0x2b5   :  { %6168 = vmatpush3.bf16.msra.mxu0 %v7914_v7  ;;  %5808 = vmatprep.subr.bf16.mxu1 %v8038_v53  ;;  %v1510_v42 = vadd.f32 %v8411_v18, %v5477_v23  ;;  %v6114_v20 = vpop.f32.mrb[43].mxu1  ;;  %v8766_v23 = vld [vmem:[%s9276_s1 + $0xd8] sm:$0xff]   ;;  %v6381_v7 = vld [vmem:[#allocation3 + $0x64] ss:$16 sps:$4 sm:$0xff]  }
 0x2b6   :  { %6169 = vmatprep.subr.bf16.mxu0 %v9335_v21 }
 0x2b8   :  { %5809 = vmatpush3.bf16.msra.mxu1 %v8063_v0 }
 0x2b9   :  { %6170 = vmatpush3.bf16.msra.mxu0 %v7933_v3  ;;  %5810 = vmatprep.subr.bf16.mxu1 %v8070_v45 }
 0x2ba   :  { %5743 = vmatprep.subr.bf16.mxu0 %v8313_v15 }
 0x2bc   :  { %6172 = vmatmul.mubr.msk.bf16.vlgmr.msra.gmra.mrb[68].mxu0 %vm8209_vm1, %v9321_v63  ;;  %5811 = vmatpush3.bf16.msra.mxu1 %v8093_v44  ;;  %vm2244_vm1 = vcmp.eq.s32.totalorder %v8303_v46, %v7095_v41 }
 0x2bd   :  { %5744 = vmatpush3.bf16.msra.mxu0 %v7945_v6  ;;  %4864 = vmatprep.mubr.msk.bf16.mxu0 %vm4863_vm7, %v9321_v63  ;;  %vm2418_vm7 = vcmp.eq.s32.totalorder %v9348_v14, %v7024_v30  ;;  %vm4865_vm0 = vmpackc.low %vm2249_vm13, %vm2244_vm1  ;;  %vm2417_vm1 = vcmp.eq.s32.totalorder %v9348_v14, %v7017_v27 }
 0x2be   :  { %5745 = vmatprep.subr.bf16.mxu0 %v7953_v60  ;;  %5827 = vmatprep.subr.bf16.mxu1 %v8102_v13  ;;  %vm4879_vm12 = vmpackc.low %vm2418_vm7, %vm2413_vm9  ;;  %vm2582_vm9 = vcmp.eq.s32.totalorder %v8514_v62, %v9347_v17  ;;  %vm2587_vm7 = vcmp.eq.s32.totalorder %v8529_v59, %v9347_v17  ;;  %v8738_v62 = vld [vmem:[%s9276_s1 + $0xc8] sm:$0xff]   ;;  %v8788_v59 = vld [vmem:[%s9276_s1 + $0xa0] sm:$0xff]  }
 0x2bf   :  { %4886 = vmatmul.mubr.msk.bf16.vlgmr.msra.gmra.mrb[68].mxu1 %vm4885_vm14, %v9321_v63  ;;  %vm4901_vm14 = vmpackc.low %vm2583_vm11, %vm2578_vm10  ;;  %vm2751_vm10 = vcmp.eq.s32.totalorder %v9359_v28, %v7027_v31 }
 0x2c0   :  { %5828 = vmatpush3.bf16.msra.mxu1 %v8109_v47  ;;  %4900 = vmatprep.mubr.msk.bf16.mxu1 %vm4899_vm3, %v9321_v63  ;;  %vm2412_vm3 = vcmp.eq.s32.totalorder %v8471_v19, %v7017_v27 }
 0x2c1   :  { %5746 = vmatpush3.bf16.msra.mxu0 %v7960_v5  ;;  %5829 = vmatprep.subr.bf16.mxu1 %v8117_v55  ;;  %vm4881_vm13 = vmpackc.low %vm2417_vm1, %vm2412_vm3  ;;  %vm2421_vm3 = vcmp.eq.s32.totalorder %v9348_v14, %v9347_v17  ;;  %vm2750_vm1 = vcmp.eq.s32.totalorder %v9359_v28, %v7095_v41  ;;  %v8836_v14 = vld [vmem:[%s9276_s1 + $0xb8] sm:$0xff]  }
 0x2c2   :  { %5747 = vmatprep.subr.bf16.mxu0 %v7967_v26 }
 0x2c4   :  { %5830 = vmatpush3.bf16.msra.mxu1 %v8124_v58 }
 0x2c5   :  { %5748 = vmatpush3.bf16.msra.mxu0 %v7974_v34  ;;  %5831 = vmatprep.subr.bf16.mxu1 %v8131_v12 }
 0x2c6   :  { %5749 = vmatprep.subr.bf16.mxu0 %v7981_v35 }
 0x2c8   :  { %5832 = vmatpush3.bf16.msra.mxu1 %v8138_v22 }
 0x2c9   :  { %5750 = vmatpush3.bf16.msra.mxu0 %v7988_v39  ;;  %5833 = vmatprep.subr.bf16.mxu1 %v8145_v24 }
 0x2ca   :  { %5751 = vmatprep.subr.bf16.mxu0 %v9350_v8 }
 0x2cc   :  { %5834 = vmatpush3.bf16.msra.mxu1 %v8152_v48 }
 0x2cd   :  { %5752 = vmatpush3.bf16.msra.mxu0 %v9352_v10  ;;  %5835 = vmatprep.subr.bf16.mxu1 %v8232_v32 }
 0x2ce   :  { %5753 = vmatprep.subr.bf16.mxu0 %v9353_v11  ;;  %v8745_v11 = vld [vmem:[%s9276_s1 + $0x88] sm:$0xff]  }
 0x2cf   :  { %v1547_v6 = vpop.f32.mrb[44].mxu0 }
 0x2d0   :  { %v1548_v60 = vadd.f32 %v1547_v6, %v1507_v56  ;;  %v6093_v5 = vpop.f32.mrb[45].mxu0  ;;  %5836 = vmatpush3.bf16.msra.mxu1 %v8239_v33  ;;  %v8773_v56 = vld [vmem:[%s9276_s1 + $0x98] sm:$0xff]  }
 0x2d1   :  { %v1550_v26 = vpop.f32.mrb[46].mxu0  ;;  %5754 = vmatpush3.bf16.msra.mxu0 %v8029_v37  ;;  %5837 = vmatprep.subr.bf16.mxu1 %v8246_v52 }
 0x2d2   :  { %v1551_v34 = vadd.f32 %v1550_v26, %v1510_v42  ;;  %v6094_v35 = vpop.f32.mrb[47].mxu0  ;;  %5755 = vmatprep.subr.bf16.mxu0 %v8038_v53  ;;  %v5600_v39 = vpop.f32.mrb[44].mxu1  ;;  %v8629_v53 = vld [vmem:[%s9276_s1 + $0x100] sm:$0xff]  }
 0x2d3   :  { %v5601_v18 = vpop.f32.mrb[45].mxu1 }
 0x2d4   :  { %v1554_v1 = vpack.c.bf16 %v1551_v34, %v1548_v60  ;;  %5838 = vmatpush3.bf16.msra.mxu1 %v8253_v43  ;;  %v8595_v8 = vadd.f32 %v5601_v18, %v5600_v39  ;;  %v5603_v9 = vpop.f32.mrb[46].mxu1  ;;  %v6752_v60 = vld [vmem:[%s9276_s1 + $0xe8] sm:$0xff]  }
 0x2d5   :  { %5756 = vmatpush3.bf16.msra.mxu0 %v8063_v0  ;;  %5839 = vmatprep.subr.bf16.mxu1 %v8260_v4  ;;  %v5604_v54 = vpop.f32.mrb[47].mxu1  ;;  %v8640_v0 = vld [vmem:[%s9276_s1 + $0x108] sm:$0xff]  }
 0x2d6   :  { %1556 = vrot.lane.b32.xlu1 %v1554_v1, %s6844_s24  ;;  %5757 = vmatprep.subr.bf16.mxu0 %v8070_v45  ;;  %v8601_v37 = vadd.f32 %v5604_v54, %v5603_v9  ;;  %v8649_v45 = vld [vmem:[%s9276_s1 + $0x110] sm:$0xff]   ;;  %v6753_v18 = vld [vmem:[%s9276_s1 + $0xa8] sm:$0xff]  }
 0x2d7   :  { %v6754_v9 = vld [vmem:[%s9276_s1 + $0xf0] sm:$0xff]  }
 0x2d8   :  { %5840 = vmatpush3.bf16.msra.mxu1 %v8272_v29 }
 0x2d9   :  { %5758 = vmatpush3.bf16.msra.mxu0 %v8093_v44  ;;  %5841 = vmatprep.subr.bf16.mxu1 %v8279_v61  ;;  %v8658_v44 = vld [vmem:[%s9276_s1 + $0x118] sm:$0xff]  }
 0x2da   :  { %5774 = vmatprep.subr.bf16.mxu0 %v8102_v13 }
 0x2dc   :  { %4866 = vmatmul.mubr.msk.bf16.vlgmr.msra.gmra.mrb[72].mxu0 %vm4865_vm0, %v9321_v63  ;;  %5842 = vmatpush3.bf16.msra.mxu1 %v8289_v2  ;;  %vm4907_vm0 = vmpackc.low %vm2587_vm7, %vm2582_vm9 }
 0x2dd   :  { %5775 = vmatpush3.bf16.msra.mxu0 %v8109_v47  ;;  %6215 = vmatprep.subr.bf16.mxu1 %v9335_v21 }
 0x2de   :  { %5776 = vmatprep.subr.bf16.mxu0 %v8117_v55  ;;  %4880 = vmatprep.mubr.msk.bf16.mxu0 %vm4879_vm12, %v9321_v63  ;;  %v8667_v55 = vld [vmem:[%s9276_s1 + $0x120] sm:$0xff]  }
 0x2df   :  { %4902 = vmatmul.mubr.msk.bf16.vlgmr.msra.gmra.mrb[72].mxu1 %vm4901_vm14, %v9321_v63  ;;  %vm2416_vm14 = vcmp.eq.s32.totalorder %v8471_v19, %v9347_v17  ;;  %v6372_v19 = vld [vmem:[#allocation3 + $0x4] ss:$16 sps:$4 sm:$0xff]  }
 0x2e0   :  { %6216 = vmatpush3.bf16.msra.mxu1 %v8629_v53  ;;  %6231 = vmatprep.mubr.msk.bf16.mxu1 %vm6833_vm2, %v9335_v21  ;;  %vm4887_vm9 = vmpackc.low %vm2421_vm3, %vm2416_vm14  ;;  %vm9360_vm14 = vcmask 1048320  }
 0x2e1   :  { %5777 = vmatpush3.bf16.msra.mxu0 %v8124_v58  ;;  %6217 = vmatprep.subr.bf16.mxu1 %v9335_v21 }
 0x2e2   :  { %5778 = vmatprep.subr.bf16.mxu0 %v8131_v12 }
 0x2e4   :  { %6218 = vmatpush3.bf16.msra.mxu1 %v8640_v0 }
 0x2e5   :  { %5779 = vmatpush3.bf16.msra.mxu0 %v8138_v22  ;;  %6219 = vmatprep.subr.bf16.mxu1 %v9335_v21 }
 0x2e6   :  { %5780 = vmatprep.subr.bf16.mxu0 %v8145_v24 }
 0x2e8   :  { %6220 = vmatpush3.bf16.msra.mxu1 %v8649_v45 }
 0x2e9   :  { %5781 = vmatpush3.bf16.msra.mxu0 %v8152_v48  ;;  %6221 = vmatprep.subr.bf16.mxu1 %v9335_v21 }
 0x2ea   :  { %5782 = vmatprep.subr.bf16.mxu0 %v8232_v32 }
 0x2ec   :  { %6222 = vmatpush3.bf16.msra.mxu1 %v8658_v44 }
 0x2ed   :  { %5783 = vmatpush3.bf16.msra.mxu0 %v8239_v33  ;;  %6223 = vmatprep.subr.bf16.mxu1 %v9335_v21 }
 0x2ee   :  { %5784 = vmatprep.subr.bf16.mxu0 %v8246_v52  ;;  %v8677_v52 = vld [vmem:[%s9276_s1 + $0x128] sm:$0xff]  }
 0x2ef   :  { %v5547_v13 = vpop.f32.mrb[48].mxu0 }
 0x2f0   :  { %v5548_v47 = vpop.f32.mrb[49].mxu0  ;;  %6224 = vmatpush3.bf16.msra.mxu1 %v8667_v55 }
 0x2f1   :  { %v5549_v58 = vadd.f32 %v5548_v47, %v5547_v13  ;;  %v5550_v12 = vpop.f32.mrb[50].mxu0  ;;  %5785 = vmatpush3.bf16.msra.mxu0 %v8253_v43  ;;  %6225 = vmatprep.subr.bf16.mxu1 %v9335_v21  ;;  %v6370_v47 = vld [vmem:[#allocation3] ss:$16 sps:$4 sm:$0xff]  }
 0x2f2   :  { %v5551_v22 = vpop.f32.mrb[51].mxu0  ;;  %5786 = vmatprep.subr.bf16.mxu0 %v8260_v4  ;;  %v5631_v24 = vpop.f32.mrb[48].mxu1 }
 0x2f3   :  { %v1677_v48 = vadd.f32 %v5549_v58, %v8461_v25  ;;  %v5552_v32 = vadd.f32 %v5551_v22, %v5550_v12  ;;  %v5632_v33 = vpop.f32.mrb[49].mxu1  ;;  %v6378_v58 = vld [vmem:[#allocation3 + $0x44] ss:$16 sps:$4 sm:$0xff]   ;;  %v6376_v12 = vld [vmem:[#allocation3 + $0x40] ss:$16 sps:$4 sm:$0xff]  }
 0x2f4   :  { %6226 = vmatpush3.bf16.msra.mxu1 %v8677_v52  ;;  %v8680_v46 = vadd.f32 %v5632_v33, %v5631_v24  ;;  %v5634_v43 = vpop.f32.mrb[50].mxu1  ;;  %v6379_v22 = vld [vmem:[#allocation3 + $0x60] ss:$16 sps:$4 sm:$0xff]   ;;  %v6384_v24 = vld [vmem:[#allocation3 + $0x84] ss:$16 sps:$4 sm:$0xff]  }
 0x2f5   :  { %v1718_v38 = vadd.f32 %v8520_v36, %v1677_v48  ;;  %v1680_v10 = vadd.f32 %v5552_v32, %v8468_v49  ;;  %5787 = vmatpush3.bf16.msra.mxu0 %v8272_v29  ;;  %6227 = vmatprep.subr.bf16.mxu1 %v9335_v21  ;;  %v5635_v4 = vpop.f32.mrb[51].mxu1  ;;  %v8697_v49 = vld [vmem:[%s9276_s1 + $0x130] sm:$0xff]  }
 0x2f6   :  { %5788 = vmatprep.subr.bf16.mxu0 %v8279_v61  ;;  %v8691_v25 = vadd.f32 %v5635_v4, %v5634_v43  ;;  %v8701_v61 = vpop.permute.xlu1 %2746  ;;  %v8759_v36 = vld [vmem:[%s9276_s1 + $0x90] sm:$0xff]  }
 0x2f7   :  { %v1721_v57 = vadd.f32 %v8524_v16, %v1680_v10  ;;  %vm2756_vm11 = vcmp.eq.s32.totalorder %v8701_v61, %v7027_v31  ;;  %v8730_v31 = vld [vmem:[%s9276_s1 + $0x80] sm:$0xff]   ;;  %vm2757_vm3 = vcmp.eq.s32.totalorder %v8701_v61, %v9347_v17 }
 0x2f8   :  { %6228 = vmatpush3.bf16.msra.mxu1 %v8697_v49  ;;  %vm4923_vm12 = vmpackc.low %vm2756_vm11, %vm2751_vm10  ;;  %v8780_v16 = vld [vmem:[%s9276_s1 + $0xe0] sm:$0xff]   ;;  %vm2754_vm10 = vcmp.eq.s32.totalorder %v8701_v61, %v7024_v30 }
 0x2f9   :  { %5789 = vmatpush3.bf16.msra.mxu0 %v8289_v2  ;;  %v1724_v29 = vpack.c.bf16 %v1721_v57, %v1718_v38  ;;  %6229 = vmatprep.subr.bf16.mxu1 %v9335_v21  ;;  %v8718_v2 = vld [vmem:[%s9276_s1 + $0x138] sm:$0xff]   ;;  %v6382_v48 = vld [vmem:[#allocation3 + $0x80] ss:$16 sps:$4 sm:$0xff]   ;;  %v6387_v32 = vld [vmem:[#allocation3 + $0xa4] ss:$16 sps:$4 sm:$0xff]  }
 0x2fa   :  { %6195 = vmatprep.subr.bf16.mxu0 %v9335_v21  ;;  %v6385_v10 = vld [vmem:[#allocation3 + $0xa0] ss:$16 sps:$4 sm:$0xff]   ;;  %v6390_v57 = vld [vmem:[#allocation3 + $0xc4] ss:$16 sps:$4 sm:$0xff]  }
 0x2fb   :  { %1726 = vrot.lane.b32.xlu1 %v1724_v29, %s6845_s19 }
 0x2fc   :  { %4882 = vmatmul.mubr.msk.bf16.vlgmr.msra.gmra.mrb[76].mxu0 %vm4881_vm13, %v9321_v63  ;;  %6230 = vmatpush3.bf16.msra.mxu1 %v8718_v2  ;;  %vm2755_vm13 = vcmp.eq.s32.totalorder %v8701_v61, %v7095_v41  ;;  %v6375_v41 = vld [vmem:[#allocation3 + $0x24] ss:$16 sps:$4 sm:$0xff]  }
 0x2fd   :  { %6196 = vmatpush3.bf16.msra.mxu0 %v8629_v53  ;;  %5902 = vmatprep.subr.bf16.mxu1 %v8313_v15  ;;  %vm4925_vm7 = vmpackc.low %vm2755_vm13, %vm2750_vm1 }
 0x2fe   :  { %6197 = vmatprep.subr.bf16.mxu0 %v9335_v21  ;;  %6211 = vmatprep.mubr.msk.bf16.mxu0 %vm6833_vm2, %v9335_v21  ;;  %vm9361_vm13 = vmmov %vm9360_vm14 }
 0x2ff   :  { %6232 = vmatmul.mubr.msk.bf16.vlgmr.msra.gmra.mrb[76].mxu1 %vm4907_vm0, %v9321_v63  ;;  %vm2753_vm0 = vcmp.eq.s32.totalorder %v8701_v61, %v7017_v27  ;;  %v6430_v61 = vld [vmem:[#allocation3 + $0x88] ss:$16 sps:$4 sm:$0xff]  }
 0x300   :  { %5903 = vmatpush3.bf16.msra.mxu1 %v8730_v31  ;;  %4924 = vmatprep.mubr.msk.bf16.mxu1 %vm4923_vm12, %v9321_v63 }
 0x301   :  { %6198 = vmatpush3.bf16.msra.mxu0 %v8640_v0  ;;  %5904 = vmatprep.subr.bf16.mxu1 %v8738_v62 }
 0x302   :  { %6199 = vmatprep.subr.bf16.mxu0 %v9335_v21 }
 0x304   :  { %5905 = vmatpush3.bf16.msra.mxu1 %v8745_v11 }
 0x305   :  { %6200 = vmatpush3.bf16.msra.mxu0 %v8649_v45  ;;  %5906 = vmatprep.subr.bf16.mxu1 %v8752_v40 }
 0x306   :  { %6201 = vmatprep.subr.bf16.mxu0 %v9335_v21 }
 0x308   :  { %5907 = vmatpush3.bf16.msra.mxu1 %v8759_v36 }
 0x309   :  { %6202 = vmatpush3.bf16.msra.mxu0 %v8658_v44  ;;  %5908 = vmatprep.subr.bf16.mxu1 %v8766_v23 }
 0x30a   :  { %6203 = vmatprep.subr.bf16.mxu0 %v9335_v21 }
 0x30c   :  { %5909 = vmatpush3.bf16.msra.mxu1 %v8773_v56 }
 0x30d   :  { %v1387_v50 = vpop.permute.xlu1 %1386  ;;  %6204 = vmatpush3.bf16.msra.mxu0 %v8667_v55  ;;  %5910 = vmatprep.subr.bf16.mxu1 %v8780_v16 }
 0x30e   :  { %1389 = vst.msk [vmem:[#allocation2 + $0x8] sm:$0xff] %vm711_vm4, %v1387_v50  ;;  %6205 = vmatprep.subr.bf16.mxu0 %v9335_v21  ;;  %v6393_v50 = vld [vmem:[#allocation3 + $0xe4] ss:$16 sps:$4 sm:$0xff]  }
 0x30f   :  { %v5578_v42 = vpop.f32.mrb[52].mxu0 }
 0x310   :  { %v5579_v20 = vpop.f32.mrb[53].mxu0  ;;  %5911 = vmatpush3.bf16.msra.mxu1 %v8788_v59 }
 0x311   :  { %v5580_v3 = vadd.f32 %v5579_v20, %v5578_v42  ;;  %v5581_v6 = vpop.f32.mrb[54].mxu0  ;;  %6206 = vmatpush3.bf16.msra.mxu0 %v8677_v52  ;;  %5912 = vmatprep.subr.bf16.mxu1 %v6752_v60  ;;  %v6391_v20 = vld [vmem:[#allocation3 + $0xe0] ss:$16 sps:$4 sm:$0xff]  }
 0x312   :  { %v5582_v5 = vpop.f32.mrb[55].mxu0  ;;  %6207 = vmatprep.subr.bf16.mxu0 %v9335_v21  ;;  %v8796_v26 = vpop.f32.mrb[52].mxu1 }
 0x313   :  { %v5583_v34 = vadd.f32 %v5582_v5, %v5581_v6  ;;  %v1847_v35 = vadd.f32 %v8595_v8, %v5580_v3  ;;  %v6153_v39 = vpop.f32.mrb[53].mxu1  ;;  %v8817_v8 = vld [vmem:[%s9276_s1 + $0xb0] sm:$0xff]   ;;  %v6758_v3 = vld [vmem:[%s9276_s1 + $0x40] sm:$0xff]   ;;  %v6760_v5 = vld [vmem:[%s9276_s1 + $0x48] sm:$0xff]  }
 0x314   :  { %5913 = vmatpush3.bf16.msra.mxu1 %v6753_v18  ;;  %v8802_v1 = vpop.f32.mrb[54].mxu1  ;;  %v6394_v6 = vld [vmem:[#allocation3 + $0x100] ss:$16 sps:$4 sm:$0xff]  }
 0x315   :  { %6208 = vmatpush3.bf16.msra.mxu0 %v8697_v49  ;;  %5914 = vmatprep.subr.bf16.mxu1 %v6754_v9  ;;  %v1850_v54 = vadd.f32 %v8601_v37, %v5583_v34  ;;  %v6154_v13 = vpop.f32.mrb[55].mxu1  ;;  %v8824_v37 = vld [vmem:[%s9276_s1 + $0xf8] sm:$0xff]   ;;  %v6397_v34 = vld [vmem:[#allocation3 + $0x120] ss:$16 sps:$4 sm:$0xff]  }
 0x316   :  { %6209 = vmatprep.subr.bf16.mxu0 %v9335_v21  ;;  %v6762_v39 = vld [vmem:[%s9276_s1 + $0x50] sm:$0xff]   ;;  %v6764_v13 = vld [vmem:[%s9276_s1 + $0x58] sm:$0xff]  }
 0x318   :  { %5915 = vmatpush3.bf16.msra.mxu1 %v8817_v8 }
 0x319   :  { %6210 = vmatpush3.bf16.msra.mxu0 %v8718_v2  ;;  %5916 = vmatprep.subr.bf16.mxu1 %v8824_v37 }
 0x31a   :  { %5849 = vmatprep.subr.bf16.mxu0 %v8313_v15  ;;  %v6373_v15 = vld [vmem:[#allocation3 + $0x20] ss:$16 sps:$4 sm:$0xff]  }
 0x31c   :  { %6212 = vmatmul.mubr.msk.bf16.vlgmr.msra.gmra.mrb[80].mxu0 %vm4887_vm9, %v9321_v63  ;;  %5917 = vmatpush3.bf16.msra.mxu1 %v8836_v14 }
 0x31d   :  { %5850 = vmatpush3.bf16.msra.mxu0 %v8730_v31  ;;  %4904 = vmatprep.mubr.msk.bf16.mxu0 %vm8540_vm8, %v9321_v63  ;;  %vm2749_vm8 = vcmp.eq.s32.totalorder %v9359_v28, %v7024_v30  ;;  %v6759_v30 = vld [vmem:[%s9276_s1] sm:$0xff]  }
 0x31e   :  { %5851 = vmatprep.subr.bf16.mxu0 %v8738_v62  ;;  %3706 = vmatprep.subr.bf16.mxu1 %v6372_v19  ;;  %vm4919_vm11 = vmpackc.low %vm2754_vm10, %vm2749_vm8  ;;  %v6765_v19 = vld [vmem:[%s9276_s1 + $0x18] sm:$0xff]  }
 0x31f   :  { %4926 = vmatmul.mubr.msk.bf16.vlgmr.msra.gmra.mrb[80].mxu1 %vm4925_vm7, %v9321_v63 }
 0x320   :  { %3707 = vmatpush1.bf16.msra.mxu1 %v6370_v47  ;;  %v6766_v47 = vld [vmem:[%s9276_s1 + $0x60] sm:$0xff]  }
 0x321   :  { %5852 = vmatpush3.bf16.msra.mxu0 %v8745_v11  ;;  %3708 = vmatprep.subr.bf16.mxu1 %v6375_v41  ;;  %v6406_v41 = vld [vmem:[#allocation3 + $0x180] ss:$16 sps:$4 sm:$0xff]  }
 0x322   :  { %5853 = vmatprep.subr.bf16.mxu0 %v8752_v40 }
 0x324   :  { %3709 = vmatpush1.bf16.msra.mxu1 %v6373_v15  ;;  %v6767_v15 = vld [vmem:[%s9276_s1 + $0x20] sm:$0xff]  }
 0x325   :  { %5854 = vmatpush3.bf16.msra.mxu0 %v8759_v36  ;;  %3710 = vmatprep.subr.bf16.mxu1 %v6378_v58  ;;  %v6388_v36 = vld [vmem:[#allocation3 + $0xc0] ss:$16 sps:$4 sm:$0xff]   ;;  %v6411_v58 = vld [vmem:[#allocation3 + $0x1a4] ss:$16 sps:$4 sm:$0xff]  }
 0x326   :  { %5855 = vmatprep.subr.bf16.mxu0 %v8766_v23 }
 0x328   :  { %3711 = vmatpush1.bf16.msra.mxu1 %v6376_v12  ;;  %v6768_v12 = vld [vmem:[%s9276_s1 + $0x68] sm:$0xff]  }
 0x329   :  { %5856 = vmatpush3.bf16.msra.mxu0 %v8773_v56  ;;  %3712 = vmatprep.subr.bf16.mxu1 %v6381_v7 }
 0x32a   :  { %5857 = vmatprep.subr.bf16.mxu0 %v8780_v16 }
 0x32c   :  { %3713 = vmatpush1.bf16.msra.mxu1 %v6379_v22 }
 0x32d   :  { %5858 = vmatpush3.bf16.msra.mxu0 %v8788_v59  ;;  %3714 = vmatprep.subr.bf16.mxu1 %v6384_v24  ;;  %v6396_v59 = vld [vmem:[#allocation3 + $0x104] ss:$16 sps:$4 sm:$0xff]   ;;  %v6409_v24 = vld [vmem:[#allocation3 + $0x1a0] ss:$16 sps:$4 sm:$0xff]  }
 0x32e   :  { %5859 = vmatprep.subr.bf16.mxu0 %v6752_v60  ;;  %v6399_v60 = vld [vmem:[#allocation3 + $0x124] ss:$16 sps:$4 sm:$0xff]  }
 0x32f   :  { %v1887_v33 = vpop.f32.mrb[56].mxu0 }
 0x330   :  { %v1888_v43 = vadd.f32 %v1887_v33, %v1847_v35  ;;  %v6133_v38 = vpop.f32.mrb[57].mxu0  ;;  %3715 = vmatpush1.bf16.msra.mxu1 %v6382_v48  ;;  %v6402_v35 = vld [vmem:[#allocation3 + $0x144] ss:$16 sps:$4 sm:$0xff]   ;;  %v6769_v33 = vld [vmem:[%s9276_s1 + $0x28] sm:$0xff]  }
 0x331   :  { %v1890_v4 = vpop.f32.mrb[58].mxu0  ;;  %5860 = vmatpush3.bf16.msra.mxu0 %v6753_v18  ;;  %3716 = vmatprep.subr.bf16.mxu1 %v6387_v32  ;;  %v6400_v18 = vld [vmem:[#allocation3 + $0x140] ss:$16 sps:$4 sm:$0xff]  }
 0x332   :  { %v1891_v29 = vadd.f32 %v1890_v4, %v1850_v54  ;;  %v6134_v31 = vpop.f32.mrb[59].mxu0  ;;  %5861 = vmatprep.subr.bf16.mxu0 %v6754_v9  ;;  %v5706_v62 = vpop.f32.mrb[56].mxu1  ;;  %v6763_v9 = vld [vmem:[%s9276_s1 + $0x10] sm:$0xff]  }
 0x333   :  { %v5707_v11 = vpop.f32.mrb[57].mxu1  ;;  %v6405_v54 = vld [vmem:[#allocation3 + $0x164] ss:$16 sps:$4 sm:$0xff]  }
 0x334   :  { %v1894_v40 = vpack.c.bf16 %v1891_v29, %v1888_v43  ;;  %3717 = vmatpush1.bf16.msra.mxu1 %v6385_v10  ;;  %v8852_v23 = vadd.f32 %v5707_v11, %v5706_v62  ;;  %v5709_v56 = vpop.f32.mrb[58].mxu1  ;;  %v6414_v43 = vld [vmem:[#allocation3 + $0x1c4] ss:$16 sps:$4 sm:$0xff]   ;;  %v6412_v62 = vld [vmem:[#allocation3 + $0x1c0] ss:$16 sps:$4 sm:$0xff]  }
 0x335   :  { %5862 = vmatpush3.bf16.msra.mxu0 %v8817_v8  ;;  %3718 = vmatprep.subr.bf16.mxu1 %v6390_v57  ;;  %v5710_v16 = vpop.f32.mrb[59].mxu1  ;;  %v6770_v10 = vld [vmem:[%s9276_s1 + $0x70] sm:$0xff]  }
 0x336   :  { %1895 = vst.msk [vmem:[#allocation2 + $0x10] sm:$0xff] %vm540_vm15, %v1894_v40  ;;  %5863 = vmatprep.subr.bf16.mxu0 %v8824_v37  ;;  %v8857_v42 = vadd.f32 %v5710_v16, %v5709_v56  ;;  %v6403_v37 = vld [vmem:[#allocation3 + $0x160] ss:$16 sps:$4 sm:$0xff]   ;;  %v6417_v16 = vld [vmem:[#allocation3 + $0x1e4] ss:$16 sps:$4 sm:$0xff]  }
 0x338   :  { %3719 = vmatpush1.bf16.msra.mxu1 %v6388_v36 }
 0x339   :  { %5864 = vmatpush3.bf16.msra.mxu0 %v8836_v14  ;;  %3720 = vmatprep.subr.bf16.mxu1 %v6393_v50  ;;  %v6408_v14 = vld [vmem:[#allocation3 + $0x184] ss:$16 sps:$4 sm:$0xff]  }
 0x33a   :  { %5880 = vmatprep.subr.bf16.mxu0 %v6758_v3  ;;  %v6771_v50 = vld [vmem:[%s9276_s1 + $0x30] sm:$0xff]   ;;  %v6773_v3 = vld [vmem:[%s9276_s1 + $0x38] sm:$0xff]  }
 0x33c   :  { %4906 = vmatmul.mubr.msk.bf16.vlgmr.msra.gmra.mrb[84].mxu0 %vm8560_vm5, %v9321_v63  ;;  %3721 = vmatpush1.bf16.msra.mxu1 %v6391_v20  ;;  %vm2748_vm5 = vcmp.eq.s32.totalorder %v9359_v28, %v7017_v27 }
 0x33d   :  { %5881 = vmatpush3.bf16.msra.mxu0 %v6759_v30  ;;  %3722 = vmatprep.subr.bf16.mxu1 %v6396_v59  ;;  %v6415_v59 = vld [vmem:[#allocation3 + $0x1e0] ss:$16 sps:$4 sm:$0xff]   ;;  %vm4921_vm12 = vmpackc.low %vm2753_vm0, %vm2748_vm5 }
 0x33e   :  { %5882 = vmatprep.subr.bf16.mxu0 %v6760_v5  ;;  %4920 = vmatprep.mubr.msk.bf16.mxu0 %vm4919_vm11, %v9321_v63 }
 0x340   :  { %3723 = vmatpush1.bf16.msra.mxu1 %v6394_v6 }
 0x341   :  { %5883 = vmatpush3.bf16.msra.mxu0 %v6761_v51  ;;  %3724 = vmatprep.subr.bf16.mxu1 %v6399_v60 }
 0x342   :  { %5884 = vmatprep.subr.bf16.mxu0 %v6762_v39 }
 0x344   :  { %3725 = vmatpush1.bf16.msra.mxu1 %v6397_v34 }
 0x345   :  { %5885 = vmatpush3.bf16.msra.mxu0 %v6763_v9  ;;  %3726 = vmatprep.subr.bf16.mxu1 %v6402_v35  ;;  %v6424_v9 = vld [vmem:[#allocation3 + $0x48] ss:$16 sps:$4 sm:$0xff]  }
 0x346   :  { %5886 = vmatprep.subr.bf16.mxu0 %v6764_v13  ;;  %v6433_v13 = vld [vmem:[#allocation3 + $0xa8] ss:$16 sps:$4 sm:$0xff]  }
 0x348   :  { %v1557_v8 = vpop.permute.xlu1 %1556  ;;  %3727 = vmatpush1.bf16.msra.mxu1 %v6400_v18  ;;  %v8954_v18 = vld [vmem:[#allocation2] sm:$0xff] }
 0x349   :  { %1559 = vst.msk [vmem:[#allocation2 + $0x8] sm:$0xff] %vm882_vm6, %v1557_v8  ;;  %5887 = vmatpush3.bf16.msra.mxu0 %v6765_v19  ;;  %3728 = vmatprep.subr.bf16.mxu1 %v6405_v54  ;;  %v6427_v54 = vld [vmem:[#allocation3 + $0x68] ss:$16 sps:$4 sm:$0xff]  }
 0x34a   :  { %5888 = vmatprep.subr.bf16.mxu0 %v6766_v47  ;;  %v6436_v47 = vld [vmem:[#allocation3 + $0xc8] ss:$16 sps:$4 sm:$0xff]  }
 0x34c   :  { %3729 = vmatpush1.bf16.msra.mxu1 %v6403_v37 }
 0x34d   :  { %5889 = vmatpush3.bf16.msra.mxu0 %v6767_v15  ;;  %3730 = vmatprep.subr.bf16.mxu1 %v6408_v14 }
 0x34e   :  { %5890 = vmatprep.subr.bf16.mxu0 %v6768_v12 }
 0x34f   :  { %v5653_v7 = vpop.f32.mrb[60].mxu0 }
 0x350   :  { %v5654_v22 = vpop.f32.mrb[61].mxu0  ;;  %3731 = vmatpush1.bf16.msra.mxu1 %v6406_v41 }
 0x351   :  { %v5655_v48 = vadd.f32 %v5654_v22, %v5653_v7  ;;  %v5656_v32 = vpop.f32.mrb[62].mxu0  ;;  %5891 = vmatpush3.bf16.msra.mxu0 %v6769_v33  ;;  %3732 = vmatprep.subr.bf16.mxu1 %v6411_v58  ;;  %v6441_v58 = vld [vmem:[#allocation3 + $0xec] ss:$16 sps:$4 sm:$0xff]  }
 0x352   :  { %v5657_v38 = vpop.f32.mrb[63].mxu0  ;;  %5892 = vmatprep.subr.bf16.mxu0 %v6770_v10  ;;  %v5737_v4 = vpop.f32.mrb[60].mxu1  ;;  %v6442_v10 = vld [vmem:[#allocation3 + $0x108] ss:$16 sps:$4 sm:$0xff]  }
 0x353   :  { %v2013_v57 = vadd.f32 %v5655_v48, %v8680_v46  ;;  %v5658_v29 = vadd.f32 %v5657_v38, %v5656_v32  ;;  %v5738_v31 = vpop.f32.mrb[61].mxu1  ;;  %v6772_v46 = vld [vmem:[%s9276_s1 + $0x78] sm:$0xff]  }
 0x354   :  { %3733 = vmatpush1.bf16.msra.mxu1 %v6409_v24  ;;  %v8909_v11 = vadd.f32 %v5738_v31, %v5737_v4  ;;  %v5740_v40 = vpop.f32.mrb[62].mxu1  ;;  %v6439_v32 = vld [vmem:[#allocation3 + $0xe8] ss:$16 sps:$4 sm:$0xff]   ;;  %v6447_v4 = vld [vmem:[#allocation3 + $0x12c] ss:$16 sps:$4 sm:$0xff]  }
 0x355   :  { %v2054_v36 = vadd.f32 %v8796_v26, %v2013_v57  ;;  %v2016_v56 = vadd.f32 %v5658_v29, %v8691_v25  ;;  %5893 = vmatpush3.bf16.msra.mxu0 %v6771_v50  ;;  %3734 = vmatprep.subr.bf16.mxu1 %v6414_v43  ;;  %v5741_v20 = vpop.f32.mrb[63].mxu1  ;;  %v6444_v43 = vld [vmem:[#allocation3 + $0x10c] ss:$16 sps:$4 sm:$0xff]   ;;  %v6445_v57 = vld [vmem:[#allocation3 + $0x128] ss:$16 sps:$4 sm:$0xff]  }
 0x356   :  { %5894 = vmatprep.subr.bf16.mxu0 %v6772_v46  ;;  %v8923_v25 = vadd.f32 %v5741_v20, %v5740_v40  ;;  %v6450_v29 = vld [vmem:[#allocation3 + $0x14c] ss:$16 sps:$4 sm:$0xff]   ;;  %v6448_v31 = vld [vmem:[#allocation3 + $0x148] ss:$16 sps:$4 sm:$0xff]  }
 0x357   :  { %v2057_v26 = vadd.f32 %v8802_v1, %v2016_v56  ;;  %v6451_v40 = vld [vmem:[#allocation3 + $0x168] ss:$16 sps:$4 sm:$0xff]   ;;  %v6459_v50 = vld [vmem:[#allocation3 + $0x1ac] ss:$16 sps:$4 sm:$0xff]  }
 0x358   :  { %3735 = vmatpush1.bf16.msra.mxu1 %v6412_v62  ;;  %v6453_v62 = vld [vmem:[#allocation3 + $0x16c] ss:$16 sps:$4 sm:$0xff]   ;;  %v6454_v56 = vld [vmem:[#allocation3 + $0x188] ss:$16 sps:$4 sm:$0xff]  }
 0x359   :  { %5895 = vmatpush3.bf16.msra.mxu0 %v6773_v3  ;;  %v2060_v6 = vpack.c.bf16 %v2057_v26, %v2054_v36  ;;  %3736 = vmatprep.subr.bf16.mxu1 %v6417_v16  ;;  %v6456_v36 = vld [vmem:[#allocation3 + $0x18c] ss:$16 sps:$4 sm:$0xff]   ;;  %v6457_v16 = vld [vmem:[#allocation3 + $0x1a8] ss:$16 sps:$4 sm:$0xff]  }
 0x35a   :  { %6235 = vmatprep.subr.bf16.mxu0 %v9335_v21  ;;  %v6462_v20 = vld [vmem:[#allocation3 + $0x1cc] ss:$16 sps:$4 sm:$0xff]  }
 0x35b   :  { %2062 = vrot.lane.b32.xlu1 %v2060_v6, %s6842_s15  ;;  %v6460_v6 = vld [vmem:[#allocation3 + $0x1c8] ss:$16 sps:$4 sm:$0xff]  }
 0x35c   :  { %4922 = vmatmul.mubr.msk.bf16.vlgmr.msra.gmra.mrb[88].mxu0 %vm4921_vm12, %v9321_v63  ;;  %3737 = vmatpush1.bf16.msra.mxu1 %v6415_v59 }
 0x35d   :  { %6236 = vmatpush3.bf16.msra.mxu0 %v8629_v53  ;;  %6251 = vmatprep.mubr.msk.bf16.mxu0 %vm6833_vm2, %v9335_v21  ;;  %vm2752_vm2 = vcmp.eq.s32.totalorder %v9359_v28, %v9347_v17  ;;  %v6429_v28 = vld [vmem:[#allocation3 + $0x6c] ss:$16 sps:$4 sm:$0xff]  }
 0x35e   :  { %6237 = vmatprep.subr.bf16.mxu0 %v9335_v21  ;;  %vm4927_vm1 = vmpackc.low %vm2757_vm3, %vm2752_vm2  ;;  %v6432_v17 = vld [vmem:[#allocation3 + $0x8c] ss:$16 sps:$4 sm:$0xff]  }
 0x361   :  { %6238 = vmatpush3.bf16.msra.mxu0 %v8640_v0 }
 0x362   :  { %6239 = vmatprep.subr.bf16.mxu0 %v9335_v21 }
 0x365   :  { %6240 = vmatpush3.bf16.msra.mxu0 %v8649_v45 }
 0x366   :  { %6241 = vmatprep.subr.bf16.mxu0 %v9335_v21 }
 0x369   :  { %6242 = vmatpush3.bf16.msra.mxu0 %v8658_v44 }
 0x36a   :  { %6243 = vmatprep.subr.bf16.mxu0 %v9335_v21 }
 0x36d   :  { %v1727_v27 = vpop.permute.xlu1 %1726  ;;  %6244 = vmatpush3.bf16.msra.mxu0 %v8667_v55 }
 0x36e   :  { %1729 = vst.msk [vmem:[#allocation2 + $0x8] sm:$0xff] %vm9360_vm14, %v1727_v27  ;;  %6245 = vmatprep.subr.bf16.mxu0 %v9335_v21 }
 0x36f   :  { %v5684_v53 = vpop.f32.mrb[64].mxu0 }
 0x370   :  { %v5685_v1 = vpop.f32.mrb[65].mxu0 }
 0x371   :  { %v5686_v0 = vadd.f32 %v5685_v1, %v5684_v53  ;;  %v5687_v30 = vpop.f32.mrb[66].mxu0  ;;  %6246 = vmatpush3.bf16.msra.mxu0 %v8677_v52  ;;  %v6420_v52 = vld [vmem:[#allocation3 + $0xc] ss:$16 sps:$4 sm:$0xff]  }
 0x372   :  { %v5688_v45 = vpop.f32.mrb[67].mxu0  ;;  %6247 = vmatprep.subr.bf16.mxu0 %v9335_v21  ;;  %v8947_v60 = vpop.f32.mrb[64].mxu1  ;;  %v6465_v53 = vld [vmem:[#allocation3 + $0x1ec] ss:$16 sps:$4 sm:$0xff]  }
 0x373   :  { %v5689_v44 = vadd.f32 %v5688_v45, %v5687_v30  ;;  %v2183_v5 = vadd.f32 %v8852_v23, %v5686_v0  ;;  %v6193_v34 = vpop.f32.mrb[65].mxu1  ;;  %v6423_v23 = vld [vmem:[#allocation3 + $0x2c] ss:$16 sps:$4 sm:$0xff]  }
 0x374   :  { %v8950_v55 = vpop.f32.mrb[66].mxu1 }
 0x375   :  { %6248 = vmatpush3.bf16.msra.mxu0 %v8697_v49  ;;  %v2913_v51 = vld [vmem:[#allocation2 + $0x8] sm:$0xff]  ;;  %v2186_v35 = vadd.f32 %v8857_v42, %v5689_v44  ;;  %v6194_v39 = vpop.f32.mrb[67].mxu1 }
 0x376   :  { %3738 = vmatprep.mubr.bf16.mxu1 %v2913_v51  ;;  %6249 = vmatprep.subr.bf16.mxu0 %v9335_v21  ;;  %v6418_v49 = vld [vmem:[#allocation3 + $0x8] ss:$16 sps:$4 sm:$0xff]   ;;  %v6426_v42 = vld [vmem:[#allocation3 + $0x4c] ss:$16 sps:$4 sm:$0xff]  }
 0x377   :  { %3739 = vmatmul.mubr.bf16.vlgmr.msra.gmra.mrb[84].mxu1 %v8954_v18  ;;  %v6421_v21 = vld [vmem:[#allocation3 + $0x28] ss:$16 sps:$4 sm:$0xff]  }
 0x379   :  { %6250 = vmatpush3.bf16.msra.mxu0 %v8718_v2  ;;  %v6435_v2 = vld [vmem:[#allocation3 + $0xac] ss:$16 sps:$4 sm:$0xff]  }
 0x37a   :  { %3792 = vmatprep.subr.bf16.mxu0 %v6420_v52 }
 0x37c   :  { %6252 = vmatmul.mubr.msk.bf16.vlgmr.msra.gmra.mrb[92].mxu0 %vm4927_vm1, %v9321_v63  ;;  %v6438_v63 = vld [vmem:[#allocation3 + $0xcc] ss:$16 sps:$4 sm:$0xff]  }
 0x37d   :  { %3793 = vmatpush1.bf16.msra.mxu0 %v6418_v49  ;;  %3824 = vmatprep.mubr.bf16.mxu0 %v2913_v51 }
 0x37e   :  { %3794 = vmatprep.subr.bf16.mxu0 %v6423_v23 }
 0x381   :  { %3795 = vmatpush1.bf16.msra.mxu0 %v6421_v21 }
 0x382   :  { %3796 = vmatprep.subr.bf16.mxu0 %v6426_v42 }
 0x385   :  { %3797 = vmatpush1.bf16.msra.mxu0 %v6424_v9 }
 0x386   :  { %3798 = vmatprep.subr.bf16.mxu0 %v6429_v28 }
 0x389   :  { %3799 = vmatpush1.bf16.msra.mxu0 %v6427_v54 }
 0x38a   :  { %3800 = vmatprep.subr.bf16.mxu0 %v6432_v17 }
 0x38d   :  { %3801 = vmatpush1.bf16.msra.mxu0 %v6430_v61 }
 0x38e   :  { %3802 = vmatprep.subr.bf16.mxu0 %v6435_v2 }
 0x38f   :  { %v2223_v8 = vpop.f32.mrb[68].mxu0 }
 0x390   :  { %v2224_v37 = vadd.f32 %v2223_v8, %v2183_v5  ;;  %v6173_v19 = vpop.f32.mrb[69].mxu0 }
 0x391   :  { %v2226_v14 = vpop.f32.mrb[70].mxu0  ;;  %3803 = vmatpush1.bf16.msra.mxu0 %v6433_v13 }
 0x392   :  { %v2227_v41 = vadd.f32 %v2226_v14, %v2186_v35  ;;  %v6174_v15 = vpop.f32.mrb[71].mxu0  ;;  %3804 = vmatprep.subr.bf16.mxu0 %v6438_v63  ;;  %v5812_v12 = vpop.f32.mrb[68].mxu1  ;;  %v6463_v35 = vld [vmem:[#allocation3 + $0x1e8] ss:$16 sps:$4 sm:$0xff]  }
 0x393   :  { %v5813_v7 = vpop.f32.mrb[69].mxu1 }
 0x394   :  { %v2230_v22 = vpack.c.bf16 %v2227_v41, %v2224_v37  ;;  %v8964_v24 = vadd.f32 %v5813_v7, %v5812_v12  ;;  %v5815_v48 = vpop.f32.mrb[70].mxu1 }
 0x395   :  { %3805 = vmatpush1.bf16.msra.mxu0 %v6436_v47  ;;  %v5816_v33 = vpop.f32.mrb[71].mxu1 }
 0x396   :  { %2232 = vrot.lane.b32.xlu1 %v2230_v22, %s6844_s24  ;;  %3806 = vmatprep.subr.bf16.mxu0 %v6441_v58  ;;  %v8967_v38 = vadd.f32 %v5816_v33, %v5815_v48  ;;  %v6466_v48 = vld [vmem:[#allocation3 + $0x200] ss:$16 sps:$4 sm:$0xff]   ;;  %v6469_v33 = vld [vmem:[#allocation3 + $0x208] ss:$16 sps:$4 sm:$0xff]  }
 0x399   :  { %3807 = vmatpush1.bf16.msra.mxu0 %v6439_v32  ;;  %v6468_v32 = vld [vmem:[#allocation3 + $0x204] ss:$16 sps:$4 sm:$0xff]  }
 0x39a   :  { %3808 = vmatprep.subr.bf16.mxu0 %v6444_v43  ;;  %3749 = vmatprep.subr.bf16.mxu1 %v6468_v32  ;;  %v6529_v32 = vld [vmem:[#allocation3 + $0x348] ss:$16 sps:$4 sm:$0xff]  }
 0x39b   :  { %3750 = vmatpush1.bf16.msra.mxu1 %v6466_v48  ;;  %v6526_v48 = vld [vmem:[#allocation3 + $0x340] ss:$16 sps:$4 sm:$0xff]  }
 0x39d   :  { %3809 = vmatpush1.bf16.msra.mxu0 %v6442_v10 }
 0x39e   :  { %3810 = vmatprep.subr.bf16.mxu0 %v6447_v4  ;;  %v6474_v4 = vld [vmem:[#allocation3 + $0x224] ss:$16 sps:$4 sm:$0xff]  }
 0x39f   :  { %3751 = vmatprep.subr.bf16.mxu1 %v6474_v4  ;;  %v6540_v4 = vld [vmem:[#allocation3 + $0x384] ss:$16 sps:$4 sm:$0xff]  }
 0x3a1   :  { %3811 = vmatpush1.bf16.msra.mxu0 %v6445_v57 }
 0x3a2   :  { %3812 = vmatprep.subr.bf16.mxu0 %v6450_v29 }
 0x3a5   :  { %3813 = vmatpush1.bf16.msra.mxu0 %v6448_v31  ;;  %v6472_v31 = vld [vmem:[#allocation3 + $0x220] ss:$16 sps:$4 sm:$0xff]  }
 0x3a6   :  { %3814 = vmatprep.subr.bf16.mxu0 %v6453_v62  ;;  %v6477_v62 = vld [vmem:[#allocation3 + $0x22c] ss:$16 sps:$4 sm:$0xff]   ;;  %3752 = vmatpush1.bf16.msra.mxu1 %v6472_v31 }
 0x3a7   :  { %v6549_v31 = vld [vmem:[#allocation3 + $0x3ac] ss:$16 sps:$4 sm:$0xff]  }
 0x3a9   :  { %3815 = vmatpush1.bf16.msra.mxu0 %v6451_v40 }
 0x3aa   :  { %3816 = vmatprep.subr.bf16.mxu0 %v6456_v36  ;;  %v6475_v36 = vld [vmem:[#allocation3 + $0x228] ss:$16 sps:$4 sm:$0xff]  }
 0x3ad   :  { %3817 = vmatpush1.bf16.msra.mxu0 %v6454_v56  ;;  %v6480_v56 = vld [vmem:[#allocation3 + $0x244] ss:$16 sps:$4 sm:$0xff]  }
 0x3ae   :  { %3818 = vmatprep.subr.bf16.mxu0 %v6459_v50  ;;  %3753 = vmatprep.subr.bf16.mxu1 %v6480_v56  ;;  %v6552_v56 = vld [vmem:[#allocation3 + $0x3c4] ss:$16 sps:$4 sm:$0xff]  }
 0x3af   :  { %v5759_v46 = vpop.f32.mrb[72].mxu0 }
 0x3b0   :  { %v5760_v26 = vpop.f32.mrb[73].mxu0 }
 0x3b1   :  { %v5761_v59 = vadd.f32 %v5760_v26, %v5759_v46  ;;  %v5762_v3 = vpop.f32.mrb[74].mxu0  ;;  %3819 = vmatpush1.bf16.msra.mxu0 %v6457_v16 }
 0x3b2   :  { %v5763_v27 = vpop.f32.mrb[75].mxu0  ;;  %3820 = vmatprep.subr.bf16.mxu0 %v6462_v20  ;;  %v5843_v1 = vpop.f32.mrb[72].mxu1  ;;  %v6483_v20 = vld [vmem:[#allocation3 + $0x24c] ss:$16 sps:$4 sm:$0xff]  }
 0x3b3   :  { %v2353_v0 = vadd.f32 %v5761_v59, %v8909_v11  ;;  %v5764_v30 = vadd.f32 %v5763_v27, %v5762_v3  ;;  %v5844_v45 = vpop.f32.mrb[73].mxu1  ;;  %v6478_v59 = vld [vmem:[#allocation3 + $0x240] ss:$16 sps:$4 sm:$0xff]   ;;  %v6481_v3 = vld [vmem:[#allocation3 + $0x248] ss:$16 sps:$4 sm:$0xff]  }
 0x3b4   :  { %v8970_v44 = vadd.f32 %v5844_v45, %v5843_v1  ;;  %v5846_v5 = vpop.f32.mrb[74].mxu1  ;;  %3754 = vmatpush1.bf16.msra.mxu1 %v6478_v59  ;;  %v6492_v45 = vld [vmem:[#allocation3 + $0x284] ss:$16 sps:$4 sm:$0xff]   ;;  %v6559_v59 = vld [vmem:[#allocation3 + $0x3e8] ss:$16 sps:$4 sm:$0xff]  }
 0x3b5   :  { %v2394_v34 = vadd.f32 %v8947_v60, %v2353_v0  ;;  %v2356_v51 = vadd.f32 %v5764_v30, %v8923_v25  ;;  %3821 = vmatpush1.bf16.msra.mxu0 %v6460_v6  ;;  %v5847_v39 = vpop.f32.mrb[75].mxu1  ;;  %v6486_v6 = vld [vmem:[#allocation3 + $0x264] ss:$16 sps:$4 sm:$0xff]   ;;  %v6484_v0 = vld [vmem:[#allocation3 + $0x260] ss:$16 sps:$4 sm:$0xff]  }
 0x3b6   :  { %3822 = vmatprep.subr.bf16.mxu0 %v6465_v53  ;;  %v5848_v52 = vadd.f32 %v5847_v39, %v5846_v5  ;;  %v6489_v53 = vld [vmem:[#allocation3 + $0x26c] ss:$16 sps:$4 sm:$0xff]   ;;  %3755 = vmatprep.subr.bf16.mxu1 %v6486_v6  ;;  %v6487_v30 = vld [vmem:[#allocation3 + $0x268] ss:$16 sps:$4 sm:$0xff]   ;;  %v6490_v5 = vld [vmem:[#allocation3 + $0x280] ss:$16 sps:$4 sm:$0xff]  }
 0x3b7   :  { %v2397_v49 = vadd.f32 %v8950_v55, %v2356_v51  ;;  %v6498_v51 = vld [vmem:[#allocation3 + $0x2a4] ss:$16 sps:$4 sm:$0xff]   ;;  %v6496_v39 = vld [vmem:[#allocation3 + $0x2a0] ss:$16 sps:$4 sm:$0xff]  }
 0x3b8   :  { %3756 = vmatpush1.bf16.msra.mxu1 %v6484_v0 }
 0x3b9   :  { %3823 = vmatpush1.bf16.msra.mxu0 %v6463_v35  ;;  %v2400_v23 = vpack.c.bf16 %v2397_v49, %v2394_v34  ;;  %3757 = vmatprep.subr.bf16.mxu1 %v6492_v45  ;;  %v6493_v34 = vld [vmem:[#allocation3 + $0x288] ss:$16 sps:$4 sm:$0xff]   ;;  %v6501_v35 = vld [vmem:[#allocation3 + $0x2ac] ss:$16 sps:$4 sm:$0xff]   ;;  %v6504_v49 = vld [vmem:[#allocation3 + $0x2c4] ss:$16 sps:$4 sm:$0xff]  }
 0x3bb   :  { %2402 = vrot.lane.b32.xlu1 %v2400_v23, %s6845_s19  ;;  %v6507_v23 = vld [vmem:[#allocation3 + $0x2cc] ss:$16 sps:$4 sm:$0xff]  }
 0x3bc   :  { %3825 = vmatmul.mubr.bf16.vlgmr.msra.gmra.mrb[96].mxu0 %v8954_v18  ;;  %3758 = vmatpush1.bf16.msra.mxu1 %v6490_v5 }
 0x3bd   :  { %3759 = vmatprep.subr.bf16.mxu1 %v6498_v51 }
 0x3c0   :  { %3760 = vmatpush1.bf16.msra.mxu1 %v6496_v39 }
 0x3c1   :  { %3761 = vmatprep.subr.bf16.mxu1 %v6504_v49  ;;  %v6570_v49 = vld [vmem:[%s9279_s4 + $0x24] ss:$8 sps:$4 sm:$0xff]  }
 0x3cd   :  { %v2063_v11 = vpop.permute.xlu1 %2062 }
 0x3ce   :  { %2065 = vst.msk [vmem:[#allocation2 + $0x10] sm:$0xff] %vm711_vm4, %v2063_v11  ;;  %v6502_v11 = vld [vmem:[#allocation3 + $0x2c0] ss:$16 sps:$4 sm:$0xff]  }
 0x3cf   :  { %v5790_v21 = vpop.f32.mrb[76].mxu0  ;;  %3762 = vmatpush1.bf16.msra.mxu1 %v6502_v11  ;;  %v6573_v11 = vld [vmem:[%s9279_s4 + $0x34] ss:$8 sps:$4 sm:$0xff]  }
 0x3d0   :  { %v5791_v60 = vpop.f32.mrb[77].mxu0 }
 0x3d1   :  { %v5792_v42 = vadd.f32 %v5791_v60, %v5790_v21  ;;  %v5793_v25 = vpop.f32.mrb[78].mxu0  ;;  %v6505_v21 = vld [vmem:[#allocation3 + $0x2c8] ss:$16 sps:$4 sm:$0xff]   ;;  %v6510_v60 = vld [vmem:[#allocation3 + $0x2e4] ss:$16 sps:$4 sm:$0xff]  }
 0x3d2   :  { %v5794_v9 = vpop.f32.mrb[79].mxu0  ;;  %v2729_v28 = vpop.f32.mrb[76].mxu1  ;;  %3763 = vmatprep.subr.bf16.mxu1 %v6510_v60  ;;  %v6576_v60 = vld [vmem:[%s9279_s4 + $0x44] ss:$8 sps:$4 sm:$0xff]  }
 0x3d3   :  { %v5795_v54 = vadd.f32 %v5794_v9, %v5793_v25  ;;  %v2523_v17 = vadd.f32 %v8964_v24, %v5792_v42  ;;  %v6233_v61 = vpop.f32.mrb[77].mxu1  ;;  %v6513_v42 = vld [vmem:[#allocation3 + $0x2ec] ss:$16 sps:$4 sm:$0xff]   ;;  %v6508_v25 = vld [vmem:[#allocation3 + $0x2e0] ss:$16 sps:$4 sm:$0xff]  }
 0x3d4   :  { %v2732_v55 = vpop.f32.mrb[78].mxu1  ;;  %v6511_v9 = vld [vmem:[#allocation3 + $0x2e8] ss:$16 sps:$4 sm:$0xff]   ;;  %3764 = vmatpush1.bf16.msra.mxu1 %v6508_v25  ;;  %v6514_v61 = vld [vmem:[#allocation3 + $0x300] ss:$16 sps:$4 sm:$0xff]  }
 0x3d5   :  { %v2526_v2 = vadd.f32 %v8967_v38, %v5795_v54  ;;  %v6234_v13 = vpop.f32.mrb[79].mxu1  ;;  %v6471_v38 = vld [vmem:[#allocation3 + $0x20c] ss:$16 sps:$4 sm:$0xff]  }
 0x3d6   :  { %3835 = vmatprep.subr.bf16.mxu0 %v6471_v38  ;;  %v6519_v54 = vld [vmem:[#allocation3 + $0x30c] ss:$16 sps:$4 sm:$0xff]   ;;  %v6532_v38 = vld [vmem:[#allocation3 + $0x360] ss:$16 sps:$4 sm:$0xff]  }
 0x3d7   :  { %3836 = vmatpush1.bf16.msra.mxu0 %v6469_v33  ;;  %v6534_v33 = vld [vmem:[#allocation3 + $0x364] ss:$16 sps:$4 sm:$0xff]  }
 0x3d8   :  { %3837 = vmatprep.subr.bf16.mxu0 %v6477_v62  ;;  %v6544_v62 = vld [vmem:[#allocation3 + $0x3a0] ss:$16 sps:$4 sm:$0xff]   ;;  %v6579_v25 = vld [vmem:[%s9279_s4 + $0x54] ss:$8 sps:$4 sm:$0xff]  }
 0x3db   :  { %3838 = vmatpush1.bf16.msra.mxu0 %v6475_v36  ;;  %v6550_v36 = vld [vmem:[#allocation3 + $0x3c0] ss:$16 sps:$4 sm:$0xff]  }
 0x3dc   :  { %3839 = vmatprep.subr.bf16.mxu0 %v6483_v20  ;;  %v6558_v20 = vld [vmem:[#allocation3 + $0x3e4] ss:$16 sps:$4 sm:$0xff]  }
 0x3df   :  { %3840 = vmatpush1.bf16.msra.mxu0 %v6481_v3 }
 0x3e0   :  { %3841 = vmatprep.subr.bf16.mxu0 %v6489_v53 }
 0x3e3   :  { %3842 = vmatpush1.bf16.msra.mxu0 %v6487_v30  ;;  %v6564_v30 = vld [vmem:[%s9279_s4 + $0x4] ss:$8 sps:$4 sm:$0xff]  }
 0x3ef   :  { %v2563_v63 = vpop.f32.mrb[80].mxu0 }
 0x3f0   :  { %v2564_v8 = vadd.f32 %v2563_v63, %v2523_v17  ;;  %v6213_v18 = vpop.f32.mrb[81].mxu0  ;;  %v6525_v63 = vld [vmem:[#allocation3 + $0x32c] ss:$16 sps:$4 sm:$0xff]  }
 0x3f1   :  { %v2566_v37 = vpop.f32.mrb[82].mxu0 }
 0x3f2   :  { %v2567_v19 = vadd.f32 %v2566_v37, %v2526_v2  ;;  %v6214_v14 = vpop.f32.mrb[83].mxu0  ;;  %v5918_v47 = vpop.f32.mrb[80].mxu1  ;;  %v6522_v2 = vld [vmem:[#allocation3 + $0x324] ss:$16 sps:$4 sm:$0xff]  }
 0x3f3   :  { %v5919_v41 = vpop.f32.mrb[81].mxu1 }
 0x3f4   :  { %v2570_v15 = vpack.c.bf16 %v2567_v19, %v2564_v8  ;;  %v8980_v58 = vadd.f32 %v5919_v41, %v5918_v47  ;;  %v5921_v12 = vpop.f32.mrb[82].mxu1  ;;  %v6520_v19 = vld [vmem:[#allocation3 + $0x320] ss:$16 sps:$4 sm:$0xff]   ;;  %v6523_v47 = vld [vmem:[#allocation3 + $0x328] ss:$16 sps:$4 sm:$0xff]  }
 0x3f5   :  { %v5922_v7 = vpop.f32.mrb[83].mxu1  ;;  %v6528_v41 = vld [vmem:[#allocation3 + $0x344] ss:$16 sps:$4 sm:$0xff]  }
 0x3f6   :  { %2571 = vst.msk [vmem:[#allocation2 + $0x18] sm:$0xff] %vm540_vm15, %v2570_v15  ;;  %v8983_v22 = vadd.f32 %v5922_v7, %v5921_v12  ;;  %v6531_v7 = vld [vmem:[#allocation3 + $0x34c] ss:$16 sps:$4 sm:$0xff]  }
 0x408   :  { %v2233_v24 = vpop.permute.xlu1 %2232 }
 0x409   :  { %2235 = vst.msk [vmem:[#allocation2 + $0x10] sm:$0xff] %vm882_vm6, %v2233_v24 }
 0x40f   :  { %v5865_v43 = vpop.f32.mrb[84].mxu0 }
 0x410   :  { %v5866_v10 = vpop.f32.mrb[85].mxu0 }
 0x411   :  { %v5867_v57 = vadd.f32 %v5866_v10, %v5865_v43  ;;  %v5868_v29 = vpop.f32.mrb[86].mxu0  ;;  %v6537_v43 = vld [vmem:[#allocation3 + $0x36c] ss:$16 sps:$4 sm:$0xff]   ;;  %v6535_v10 = vld [vmem:[#allocation3 + $0x368] ss:$16 sps:$4 sm:$0xff]  }
 0x412   :  { %v5869_v40 = vpop.f32.mrb[87].mxu0 }
 0x413   :  { %v2689_v50 = vadd.f32 %v5867_v57, %v8970_v44  ;;  %v5870_v16 = vadd.f32 %v5869_v40, %v5868_v29  ;;  %v6495_v44 = vld [vmem:[#allocation3 + $0x28c] ss:$16 sps:$4 sm:$0xff]   ;;  %v6538_v57 = vld [vmem:[#allocation3 + $0x380] ss:$16 sps:$4 sm:$0xff]   ;;  %v6546_v29 = vld [vmem:[#allocation3 + $0x3a4] ss:$16 sps:$4 sm:$0xff]  }
 0x414   :  { %3843 = vmatprep.subr.bf16.mxu0 %v6495_v44  ;;  %v6547_v40 = vld [vmem:[#allocation3 + $0x3a8] ss:$16 sps:$4 sm:$0xff]  }
 0x415   :  { %v2730_v46 = vadd.f32 %v2729_v28, %v2689_v50  ;;  %v2692_v26 = vadd.f32 %v5870_v16, %v5848_v52  ;;  %3844 = vmatpush1.bf16.msra.mxu0 %v6493_v34  ;;  %v6499_v52 = vld [vmem:[#allocation3 + $0x2a8] ss:$16 sps:$4 sm:$0xff]   ;;  %v6516_v28 = vld [vmem:[#allocation3 + $0x304] ss:$16 sps:$4 sm:$0xff]   ;;  %v6555_v16 = vld [vmem:[#allocation3 + $0x3cc] ss:$16 sps:$4 sm:$0xff]  }
 0x416   :  { %3845 = vmatprep.subr.bf16.mxu0 %v6501_v35  ;;  %3765 = vmatprep.subr.bf16.mxu1 %v6516_v28  ;;  %v6553_v50 = vld [vmem:[#allocation3 + $0x3c8] ss:$16 sps:$4 sm:$0xff]   ;;  %v6567_v35 = vld [vmem:[%s9279_s4 + $0x14] ss:$8 sps:$4 sm:$0xff]   ;;  %v6582_v28 = vld [vmem:[%s9279_s4 + $0x64] ss:$8 sps:$4 sm:$0xff]  }
 0x417   :  { %v2733_v27 = vadd.f32 %v2732_v55, %v2692_v26  ;;  %v6517_v55 = vld [vmem:[#allocation3 + $0x308] ss:$16 sps:$4 sm:$0xff]   ;;  %3766 = vmatpush1.bf16.msra.mxu1 %v6514_v61  ;;  %v6556_v26 = vld [vmem:[#allocation3 + $0x3e0] ss:$16 sps:$4 sm:$0xff]  }
 0x418   :  { %3767 = vmatprep.subr.bf16.mxu1 %v6522_v2  ;;  %v6562_v34 = vld [vmem:[%s9279_s4] ss:$8 sps:$4 sm:$0xff]   ;;  %v6583_v61 = vld [vmem:[%s9279_s4 + $0x70] ss:$8 sps:$4 sm:$0xff]  }
 0x419   :  { %v2736_v1 = vpack.c.bf16 %v2733_v27, %v2730_v46  ;;  %3846 = vmatpush1.bf16.msra.mxu0 %v6499_v52  ;;  %v6561_v46 = vld [vmem:[#allocation3 + $0x3ec] ss:$16 sps:$4 sm:$0xff]   ;;  %v6565_v52 = vld [vmem:[%s9279_s4 + $0x10] ss:$8 sps:$4 sm:$0xff]   ;;  %v6586_v2 = vld [vmem:[%s9279_s4 + $0x80] ss:$8 sps:$4 sm:$0xff]  }
 0x41a   :  { %3847 = vmatprep.subr.bf16.mxu0 %v6507_v23  ;;  %v6568_v23 = vld [vmem:[%s9279_s4 + $0x20] ss:$8 sps:$4 sm:$0xff]  }
 0x41b   :  { %2738 = vrot.lane.b32.xlu0 %v2736_v1, %s6842_s15  ;;  %3768 = vmatpush1.bf16.msra.mxu1 %v6520_v19  ;;  %v6595_v19 = vld [vmem:[%s9279_s4 + $0xb0] ss:$8 sps:$4 sm:$0xff]  }
 0x41c   :  { %3769 = vmatprep.subr.bf16.mxu1 %v6528_v41  ;;  %v6603_v41 = vld [vmem:[%s9279_s4 + $0xd4] ss:$8 sps:$4 sm:$0xff]  }
 0x41d   :  { %3848 = vmatpush1.bf16.msra.mxu0 %v6505_v21  ;;  %v6571_v21 = vld [vmem:[%s9279_s4 + $0x30] ss:$8 sps:$4 sm:$0xff]  }
 0x41e   :  { %3849 = vmatprep.subr.bf16.mxu0 %v6513_v42  ;;  %v6574_v42 = vld [vmem:[%s9279_s4 + $0x40] ss:$8 sps:$4 sm:$0xff]  }
 0x41f   :  { %3770 = vmatpush1.bf16.msra.mxu1 %v6526_v48  ;;  %v6607_v48 = vld [vmem:[%s9279_s4 + $0xf0] ss:$8 sps:$4 sm:$0xff]  }
 0x420   :  { %3771 = vmatprep.subr.bf16.mxu1 %v6534_v33  ;;  %v6658_v33 = vld [vmem:[%s9281_s6 + $0x40] sm:$0xff]  }
 0x421   :  { %3850 = vmatpush1.bf16.msra.mxu0 %v6511_v9  ;;  %v6577_v9 = vld [vmem:[%s9279_s4 + $0x50] ss:$8 sps:$4 sm:$0xff]  }
 0x422   :  { %3851 = vmatprep.subr.bf16.mxu0 %v6519_v54  ;;  %v6580_v54 = vld [vmem:[%s9279_s4 + $0x60] ss:$8 sps:$4 sm:$0xff]  }
 0x423   :  { %3772 = vmatpush1.bf16.msra.mxu1 %v6532_v38  ;;  %v6660_v38 = vld [vmem:[%s9281_s6 + $0x48] sm:$0xff]  }
 0x424   :  { %3773 = vmatprep.subr.bf16.mxu1 %v6540_v4  ;;  %v6662_v4 = vld [vmem:[%s9281_s6 + $0x50] sm:$0xff]  }
 0x425   :  { %3852 = vmatpush1.bf16.msra.mxu0 %v6517_v55  ;;  %v6588_v55 = vld [vmem:[%s9279_s4 + $0x84] ss:$8 sps:$4 sm:$0xff]  }
 0x426   :  { %3853 = vmatprep.subr.bf16.mxu0 %v6525_v63  ;;  %v6589_v63 = vld [vmem:[%s9279_s4 + $0x90] ss:$8 sps:$4 sm:$0xff]  }
 0x427   :  { %3774 = vmatpush1.bf16.msra.mxu1 %v6538_v57  ;;  %v6664_v57 = vld [vmem:[%s9281_s6 + $0x58] sm:$0xff]  }
 0x428   :  { %3775 = vmatprep.subr.bf16.mxu1 %v6546_v29  ;;  %v6666_v29 = vld [vmem:[%s9281_s6 + $0x60] sm:$0xff]  }
 0x429   :  { %3854 = vmatpush1.bf16.msra.mxu0 %v6523_v47  ;;  %v6598_v47 = vld [vmem:[%s9279_s4 + $0xc0] ss:$8 sps:$4 sm:$0xff]  }
 0x42a   :  { %3855 = vmatprep.subr.bf16.mxu0 %v6531_v7  ;;  %v6604_v7 = vld [vmem:[%s9279_s4 + $0xe0] ss:$8 sps:$4 sm:$0xff]  }
 0x42b   :  { %3776 = vmatpush1.bf16.msra.mxu1 %v6544_v62  ;;  %v9362_v62 = vlaneseq }
 0x42c   :  { %3777 = vmatprep.subr.bf16.mxu1 %v6552_v56 }
 0x42d   :  { %v2403_v17 = vpop.permute.xlu1 %2402  ;;  %3856 = vmatpush1.bf16.msra.mxu0 %v6529_v32  ;;  %v6612_v32 = vld [vmem:[%s9279_s4 + $0x104] ss:$8 sps:$4 sm:$0xff]  }
 0x42e   :  { %2405 = vst.msk [vmem:[#allocation2 + $0x10] sm:$0xff] %vm9361_vm13, %v2403_v17  ;;  %3857 = vmatprep.subr.bf16.mxu0 %v6537_v43  ;;  %v6585_v17 = vld [vmem:[%s9279_s4 + $0x74] ss:$8 sps:$4 sm:$0xff]   ;;  %v6659_v43 = vld [vmem:[%s9281_s6] sm:$0xff]  }
 0x42f   :  { %v5896_v13 = vpop.f32.mrb[88].mxu0  ;;  %3778 = vmatpush1.bf16.msra.mxu1 %v6550_v36 }
 0x430   :  { %v5897_v8 = vpop.f32.mrb[89].mxu0  ;;  %3779 = vmatprep.subr.bf16.mxu1 %v6558_v20 }
 0x431   :  { %v5898_v18 = vadd.f32 %v5897_v8, %v5896_v13  ;;  %v5899_v37 = vpop.f32.mrb[90].mxu0  ;;  %3858 = vmatpush1.bf16.msra.mxu0 %v6535_v10  ;;  %v6591_v13 = vld [vmem:[%s9279_s4 + $0x94] ss:$8 sps:$4 sm:$0xff]   ;;  %v6594_v8 = vld [vmem:[%s9279_s4 + $0xa4] ss:$8 sps:$4 sm:$0xff]  }
 0x432   :  { %v5900_v14 = vpop.f32.mrb[91].mxu0  ;;  %v6661_v10 = vld [vmem:[%s9281_s6 + $0x8] sm:$0xff]  }
 0x433   :  { %v5901_v15 = vadd.f32 %v5900_v14, %v5899_v37  ;;  %v2859_v12 = vadd.f32 %v8980_v58, %v5898_v18  ;;  %v6543_v58 = vld [vmem:[#allocation3 + $0x38c] ss:$16 sps:$4 sm:$0xff]   ;;  %3780 = vmatpush1.bf16.msra.mxu1 %v6556_v26  ;;  %v6592_v18 = vld [vmem:[%s9279_s4 + $0xa0] ss:$8 sps:$4 sm:$0xff]  }
 0x434   :  { %3859 = vmatprep.subr.bf16.mxu0 %v6543_v58  ;;  %4294 = vmatprep.subr.bf16.mxu1 %v6564_v30  ;;  %v6597_v37 = vld [vmem:[%s9279_s4 + $0xb4] ss:$8 sps:$4 sm:$0xff]   ;;  %v6600_v14 = vld [vmem:[%s9279_s4 + $0xc4] ss:$8 sps:$4 sm:$0xff]  }
 0x435   :  { %v2862_v24 = vadd.f32 %v8983_v22, %v5901_v15  ;;  %v6541_v22 = vld [vmem:[#allocation3 + $0x388] ss:$16 sps:$4 sm:$0xff]   ;;  %v2914_v39 = vld [vmem:[#allocation2 + $0x10] sm:$0xff] }
 0x436   :  { %3860 = vmatpush1.bf16.msra.mxu0 %v6541_v22  ;;  %v6601_v15 = vld [vmem:[%s9279_s4 + $0xd0] ss:$8 sps:$4 sm:$0xff]  }
 0x437   :  { %3861 = vmatprep.subr.bf16.mxu0 %v6549_v31  ;;  %v6663_v58 = vld [vmem:[%s9281_s6 + $0x10] sm:$0xff]   ;;  %v6665_v22 = vld [vmem:[%s9281_s6 + $0x18] sm:$0xff]   ;;  %v6667_v31 = vld [vmem:[%s9281_s6 + $0x20] sm:$0xff]  }
 0x43a   :  { %3862 = vmatpush1.bf16.msra.mxu0 %v6547_v40  ;;  %v9124_v40 = vshrl.u32 %v9362_v62, 7  ;;  %v6639_v62 = vld [vmem:[%s9279_s4 + $0x194] ss:$8 sps:$4 sm:$0xff]  }
 0x43b   :  { %3863 = vmatprep.subr.bf16.mxu0 %v6555_v16 }
 0x43c   :  { %v3048_v36 = vsub.s32 0, %v9124_v40  ;;  %v3056_v56 = vsub.s32 2, %v9124_v40  ;;  %v3052_v16 = vsub.s32 1, %v9124_v40  ;;  %v3060_v20 = vsub.s32 3, %v9124_v40 }
 0x43e   :  { %3864 = vmatpush1.bf16.msra.mxu0 %v6553_v50  ;;  %v3044_v50 = vld [vmem:[%s9278_s3] sm:$0xf] }
 0x43f   :  { %3865 = vmatprep.subr.bf16.mxu0 %v6561_v46  ;;  %v3049_v46 = vrot.slane %v3044_v50, %v3048_v36  ;;  %v3057_v26 = vrot.slane %v3044_v50, %v3056_v56  ;;  %v6637_v56 = vld [vmem:[%s9279_s4 + $0x190] ss:$8 sps:$4 sm:$0xff]  }
 0x442   :  { %3866 = vmatpush1.bf16.msra.mxu0 %v6559_v59  ;;  %v3053_v59 = vrot.slane %v3044_v50, %v3052_v16 }
 0x443   :  { %5933 = vmatprep.subr.bf16.mxu0 %v6658_v33  ;;  %v6624_v33 = vld [vmem:[%s9279_s4 + $0x144] ss:$8 sps:$4 sm:$0xff]  }
 0x44f   :  { %v2899_v3 = vpop.f32.mrb[92].mxu0 }
 0x450   :  { %v2900_v6 = vadd.f32 %v2899_v3, %v2859_v12  ;;  %v6253_v27 = vpop.f32.mrb[93].mxu0  ;;  %v6606_v12 = vld [vmem:[%s9279_s4 + $0xe4] ss:$8 sps:$4 sm:$0xff]   ;;  %v3061_v3 = vrot.slane %v3044_v50, %v3060_v20  ;;  %v6640_v20 = vld [vmem:[%s9279_s4 + $0x1a0] ss:$8 sps:$4 sm:$0xff]  }
 0x451   :  { %v2902_v53 = vpop.f32.mrb[94].mxu0  ;;  %v6642_v50 = vld [vmem:[%s9279_s4 + $0x1a4] ss:$8 sps:$4 sm:$0xff]  }
 0x452   :  { %v2903_v1 = vadd.f32 %v2902_v53, %v2862_v24  ;;  %v6254_v0 = vpop.f32.mrb[95].mxu0  ;;  %v6609_v24 = vld [vmem:[%s9279_s4 + $0xf4] ss:$8 sps:$4 sm:$0xff]  }
 0x454   :  { %v2906_v45 = vpack.c.bf16 %v2903_v1, %v2900_v6 }
 0x456   :  { %2908 = vrot.lane.b32.xlu0 %v2906_v45, %s6844_s24 }
 0x48d   :  { %v2739_v44 = vpop.permute.xlu0 %2738 }
 0x48e   :  { %2741 = vst.msk [vmem:[#allocation2 + $0x18] sm:$0xff] %vm711_vm4, %v2739_v44 }
 0x4c8   :  { %v2909_v5 = vpop.permute.xlu0 %2908 }
 0x4c9   :  { %2911 = vst.msk [vmem:[#allocation2 + $0x18] sm:$0xff] %vm882_vm6, %v2909_v5 }
 0x4d0   :  { %v2915_v51 = vld [vmem:[#allocation2 + $0x18] sm:$0xff] }
 0x4d1   :  { %3781 = vmatprep.mubr.bf16.mxu1 %v2915_v51  ;;  %3867 = vmatprep.mubr.bf16.mxu0 %v2915_v51 }
 0x4d2   :  { %3782 = vmatmul.mubr.bf16.vlgmr.msra.gmra.mrb[84].mxu1 %v2914_v39  ;;  %3868 = vmatmul.mubr.bf16.vlgmr.msra.gmra.mrb[96].mxu0 %v2914_v39 }
 0x4d3   :  { %4295 = vmatpush1.bf16.msra.mxu1 %v6562_v34  ;;  %5934 = vmatpush3.bf16.msra.mxu0 %v6659_v43  ;;  %v6622_v43 = vld [vmem:[%s9279_s4 + $0x140] ss:$8 sps:$4 sm:$0xff]  }
 0x4d4   :  { %4296 = vmatprep.subr.bf16.mxu1 %v6567_v35  ;;  %5935 = vmatprep.subr.bf16.mxu0 %v6660_v38  ;;  %v6627_v38 = vld [vmem:[%s9279_s4 + $0x154] ss:$8 sps:$4 sm:$0xff]  }
 0x4d7   :  { %4297 = vmatpush1.bf16.msra.mxu1 %v6565_v52  ;;  %5936 = vmatpush3.bf16.msra.mxu0 %v6661_v10  ;;  %v6625_v10 = vld [vmem:[%s9279_s4 + $0x150] ss:$8 sps:$4 sm:$0xff]  }
 0x4d8   :  { %4298 = vmatprep.subr.bf16.mxu1 %v6570_v49  ;;  %5937 = vmatprep.subr.bf16.mxu0 %v6662_v4  ;;  %v6630_v4 = vld [vmem:[%s9279_s4 + $0x164] ss:$8 sps:$4 sm:$0xff]  }
 0x4db   :  { %4299 = vmatpush1.bf16.msra.mxu1 %v6568_v23  ;;  %5938 = vmatpush3.bf16.msra.mxu0 %v6663_v58  ;;  %v6628_v58 = vld [vmem:[%s9279_s4 + $0x160] ss:$8 sps:$4 sm:$0xff]  }
 0x4dc   :  { %4300 = vmatprep.subr.bf16.mxu1 %v6573_v11  ;;  %5939 = vmatprep.subr.bf16.mxu0 %v6664_v57  ;;  %v6633_v57 = vld [vmem:[%s9279_s4 + $0x174] ss:$8 sps:$4 sm:$0xff]  }
 0x4df   :  { %4301 = vmatpush1.bf16.msra.mxu1 %v6571_v21  ;;  %5940 = vmatpush3.bf16.msra.mxu0 %v6665_v22  ;;  %v6631_v22 = vld [vmem:[%s9279_s4 + $0x170] ss:$8 sps:$4 sm:$0xff]  }
 0x4e0   :  { %4302 = vmatprep.subr.bf16.mxu1 %v6576_v60  ;;  %5941 = vmatprep.subr.bf16.mxu0 %v6666_v29  ;;  %v6636_v29 = vld [vmem:[%s9279_s4 + $0x184] ss:$8 sps:$4 sm:$0xff]  }
 0x4e3   :  { %4303 = vmatpush1.bf16.msra.mxu1 %v6574_v42  ;;  %5942 = vmatpush3.bf16.msra.mxu0 %v6667_v31  ;;  %v6634_v31 = vld [vmem:[%s9279_s4 + $0x180] ss:$8 sps:$4 sm:$0xff]  }
 0x4e4   :  { %4304 = vmatprep.subr.bf16.mxu1 %v6579_v25 }
 0x4e7   :  { %4305 = vmatpush1.bf16.msra.mxu1 %v6577_v9 }
 0x4e8   :  { %4306 = vmatprep.subr.bf16.mxu1 %v6582_v28 }
 0x4eb   :  { %4307 = vmatpush1.bf16.msra.mxu1 %v6580_v54 }
 0x4ec   :  { %4308 = vmatprep.subr.bf16.mxu1 %v6585_v17 }
 0x4ef   :  { %4309 = vmatpush1.bf16.msra.mxu1 %v6583_v61 }
 0x4f0   :  { %4310 = vmatprep.subr.bf16.mxu1 %v6588_v55 }
 0x4f3   :  { %4311 = vmatpush1.bf16.msra.mxu1 %v6586_v2 }
 0x4f4   :  { %4312 = vmatprep.subr.bf16.mxu1 %v6591_v13 }
 0x4f7   :  { %4313 = vmatpush1.bf16.msra.mxu1 %v6589_v63 }
 0x4f8   :  { %4314 = vmatprep.subr.bf16.mxu1 %v6594_v8 }
 0x4fb   :  { %4315 = vmatpush1.bf16.msra.mxu1 %v6592_v18 }
 0x4fc   :  { %4316 = vmatprep.subr.bf16.mxu1 %v6597_v37 }
 0x4ff   :  { %4317 = vmatpush1.bf16.msra.mxu1 %v6595_v19 }
 0x500   :  { %4318 = vmatprep.subr.bf16.mxu1 %v6600_v14 }
 0x503   :  { %4319 = vmatpush1.bf16.msra.mxu1 %v6598_v47  ;;  %v6610_v47 = vld [vmem:[%s9279_s4 + $0x100] ss:$8 sps:$4 sm:$0xff]  }
 0x504   :  { %4320 = vmatprep.subr.bf16.mxu1 %v6603_v41 }
 0x507   :  { %4321 = vmatpush1.bf16.msra.mxu1 %v6601_v15  ;;  %v6615_v15 = vld [vmem:[%s9279_s4 + $0x114] ss:$8 sps:$4 sm:$0xff]  }
 0x508   :  { %4322 = vmatprep.subr.bf16.mxu1 %v6606_v12  ;;  %v6613_v12 = vld [vmem:[%s9279_s4 + $0x110] ss:$8 sps:$4 sm:$0xff]  }
 0x50b   :  { %4323 = vmatpush1.bf16.msra.mxu1 %v6604_v7  ;;  %v6618_v7 = vld [vmem:[%s9279_s4 + $0x124] ss:$8 sps:$4 sm:$0xff]  }
 0x50c   :  { %4324 = vmatprep.subr.bf16.mxu1 %v6609_v24  ;;  %v6616_v24 = vld [vmem:[%s9279_s4 + $0x120] ss:$8 sps:$4 sm:$0xff]  }
 0x50f   :  { %4325 = vmatpush1.bf16.msra.mxu1 %v6607_v48  ;;  %v6621_v48 = vld [vmem:[%s9279_s4 + $0x134] ss:$8 sps:$4 sm:$0xff]  }
 0x510   :  { %4337 = vmatprep.subr.bf16.mxu1 %v6612_v32  ;;  %v6619_v32 = vld [vmem:[%s9279_s4 + $0x130] ss:$8 sps:$4 sm:$0xff]  }
 0x5a5   :  { %v3783_v6 = vpop.f32.mrb[84].mxu1  ;;  %v3869_v27 = vpop.f32.mrb[96].mxu0 }
 0x5a6   :  { %v6255_v53 = vadd.f32 %v3783_v6, %v3049_v46  ;;  %v6259_v1 = vadd.f32 %v3869_v27, %v3057_v26  ;;  %v3785_v0 = vpop.f32.mrb[85].mxu1  ;;  %v3871_v30 = vpop.f32.mrb[97].mxu0  ;;  %v6651_v6 = vld [vmem:[%s9279_s4 + $0x1d4] ss:$8 sps:$4 sm:$0xff]   ;;  %v6649_v27 = vld [vmem:[%s9279_s4 + $0x1d0] ss:$8 sps:$4 sm:$0xff]  }
 0x5a7   :  { %v6256_v45 = vadd.f32 %v3785_v0, %v3053_v59  ;;  %v6260_v44 = vadd.f32 %v3871_v30, %v3061_v3  ;;  %v3787_v5 = vpop.f32.mrb[86].mxu1  ;;  %v3873_v34 = vpop.f32.mrb[98].mxu0  ;;  %v6657_v0 = vld [vmem:[%s9279_s4 + $0x1f4] ss:$8 sps:$4 sm:$0xff]   ;;  %v6655_v30 = vld [vmem:[%s9279_s4 + $0x1f0] ss:$8 sps:$4 sm:$0xff]  }
 0x5a8   :  { %v3878_v51 = vmul.f32 0.01, %v6255_v53  ;;  %v3880_v35 = vmul.f32 0.01, %v6259_v1  ;;  %v6257_v39 = vadd.f32 %v3787_v5, %v3049_v46  ;;  %v6261_v52 = vadd.f32 %v3873_v34, %v3057_v26  ;;  %v3789_v49 = vpop.f32.mrb[87].mxu1  ;;  %v3875_v23 = vpop.f32.mrb[99].mxu0 }
 0x5a9   :  { %v3879_v11 = vmul.f32 0.01, %v6256_v45  ;;  %v3881_v21 = vmul.f32 0.01, %v6260_v44  ;;  %v6258_v60 = vadd.f32 %v3789_v49, %v3053_v59  ;;  %v6262_v42 = vadd.f32 %v3875_v23, %v3061_v3  ;;  %v6645_v46 = vld [vmem:[%s9279_s4 + $0x1b4] ss:$8 sps:$4 sm:$0xff]  }
 0x5aa   :  { %v3882_v25 = vmul.f32 0.01, %v6257_v39  ;;  %v3884_v9 = vmul.f32 0.01, %v6261_v52  ;;  %v3886_v17 = vmax.f32 %v6255_v53, %v3878_v51  ;;  %v3888_v61 = vmax.f32 %v6259_v1, %v3880_v35  ;;  %v6643_v26 = vld [vmem:[%s9279_s4 + $0x1b0] ss:$8 sps:$4 sm:$0xff]  }
 0x5ab   :  { %v3883_v28 = vmul.f32 0.01, %v6258_v60  ;;  %v3885_v54 = vmul.f32 0.01, %v6262_v42  ;;  %v3887_v13 = vmax.f32 %v6256_v45, %v3879_v11  ;;  %v3889_v63 = vmax.f32 %v6260_v44, %v3881_v21  ;;  %v6648_v59 = vld [vmem:[%s9279_s4 + $0x1c4] ss:$8 sps:$4 sm:$0xff]  }
 0x5ac   :  { %v3890_v55 = vmax.f32 %v6257_v39, %v3882_v25  ;;  %v3892_v2 = vmax.f32 %v6261_v52, %v3884_v9  ;;  %v6646_v3 = vld [vmem:[%s9279_s4 + $0x1c0] ss:$8 sps:$4 sm:$0xff]   ;;  %v6654_v53 = vld [vmem:[%s9279_s4 + $0x1e4] ss:$8 sps:$4 sm:$0xff]   ;;  %v6670_v5 = vld [vmem:[%s9281_s6 + $0x70] sm:$0xff]  }
 0x5ad   :  { %v3891_v8 = vmax.f32 %v6258_v60, %v3883_v28  ;;  %v3893_v18 = vmax.f32 %v6262_v42, %v3885_v54  ;;  %v6652_v1 = vld [vmem:[%s9279_s4 + $0x1e0] ss:$8 sps:$4 sm:$0xff]   ;;  %v6671_v34 = vld [vmem:[%s9281_s6 + $0x30] sm:$0xff]   ;;  %v6672_v51 = vld [vmem:[%s9281_s6 + $0x78] sm:$0xff]  }
 0x5ae   :  { %v3894_v37 = vpack.c.bf16 %v3890_v55, %v3886_v17  ;;  %v9137_v19 = vpack.c.bf16 %v3892_v2, %v3888_v61  ;;  %v6668_v45 = vld [vmem:[%s9281_s6 + $0x68] sm:$0xff]   ;;  %v6673_v35 = vld [vmem:[%s9281_s6 + $0x38] sm:$0xff]   ;;  %v3962_v39 = vld [vmem:[%s9280_s5] sm:$0x3] }
 0x5af   :  { %v3895_v14 = vpack.c.bf16 %v3891_v8, %v3887_v13  ;;  %v3897_v41 = vpack.c.bf16 %v3893_v18, %v3889_v63  ;;  %v6669_v44 = vld [vmem:[%s9281_s6 + $0x28] sm:$0xff]   ;;  %5943 = vmatprep.subr.bf16.mxu0 %v6668_v45  ;;  %v3967_v52 = vrot.slane %v3962_v39, %v3048_v36  ;;  %v3971_v49 = vrot.slane %v3962_v39, %v3052_v16  ;;  %v5121_v16 = vld [vmem:[%s9282_s7] ss:$0 sm:$0xff] }
 0x5b0   :  { %5944 = vmatpush3.bf16.msra.mxu0 %v6669_v44 }
 0x5b1   :  { %4326 = vmatprep.mubr.bf16.mxu1 %v3895_v14  ;;  %5945 = vmatprep.subr.bf16.mxu0 %v6670_v5 }
 0x5b2   :  { %4327 = vmatmul.mubr.bf16.vlgmr.msra.gmra.mrb[88].mxu1 %v3894_v37 }
 0x5b3   :  { %4338 = vmatpush1.bf16.msra.mxu1 %v6610_v47  ;;  %4369 = vmatprep.mubr.bf16.mxu1 %v3897_v41 }
 0x5b4   :  { %4339 = vmatprep.subr.bf16.mxu1 %v6615_v15  ;;  %5946 = vmatpush3.bf16.msra.mxu0 %v6671_v34 }
 0x5b5   :  { %5947 = vmatprep.subr.bf16.mxu0 %v6672_v51 }
 0x5b7   :  { %4340 = vmatpush1.bf16.msra.mxu1 %v6613_v12 }
 0x5b8   :  { %4341 = vmatprep.subr.bf16.mxu1 %v6618_v7  ;;  %5948 = vmatpush3.bf16.msra.mxu0 %v6673_v35 }
 0x5bb   :  { %4342 = vmatpush1.bf16.msra.mxu1 %v6616_v24 }
 0x5bc   :  { %4343 = vmatprep.subr.bf16.mxu1 %v6621_v48 }
 0x5bf   :  { %4344 = vmatpush1.bf16.msra.mxu1 %v6619_v32 }
 0x5c0   :  { %4345 = vmatprep.subr.bf16.mxu1 %v6624_v33 }
 0x5c3   :  { %4346 = vmatpush1.bf16.msra.mxu1 %v6622_v43 }
 0x5c4   :  { %4347 = vmatprep.subr.bf16.mxu1 %v6627_v38 }
 0x5c7   :  { %4348 = vmatpush1.bf16.msra.mxu1 %v6625_v10 }
 0x5c8   :  { %4349 = vmatprep.subr.bf16.mxu1 %v6630_v4 }
 0x5cb   :  { %4350 = vmatpush1.bf16.msra.mxu1 %v6628_v58 }
 0x5cc   :  { %4351 = vmatprep.subr.bf16.mxu1 %v6633_v57 }
 0x5cf   :  { %4352 = vmatpush1.bf16.msra.mxu1 %v6631_v22 }
 0x5d0   :  { %4353 = vmatprep.subr.bf16.mxu1 %v6636_v29 }
 0x5d3   :  { %4354 = vmatpush1.bf16.msra.mxu1 %v6634_v31 }
 0x5d4   :  { %4355 = vmatprep.subr.bf16.mxu1 %v6639_v62 }
 0x5d7   :  { %4356 = vmatpush1.bf16.msra.mxu1 %v6637_v56 }
 0x5d8   :  { %4357 = vmatprep.subr.bf16.mxu1 %v6642_v50 }
 0x5db   :  { %4358 = vmatpush1.bf16.msra.mxu1 %v6640_v20 }
 0x5dc   :  { %4359 = vmatprep.subr.bf16.mxu1 %v6645_v46 }
 0x5df   :  { %4360 = vmatpush1.bf16.msra.mxu1 %v6643_v26 }
 0x5e0   :  { %4361 = vmatprep.subr.bf16.mxu1 %v6648_v59 }
 0x5e3   :  { %4362 = vmatpush1.bf16.msra.mxu1 %v6646_v3 }
 0x5e4   :  { %4363 = vmatprep.subr.bf16.mxu1 %v6651_v6 }
 0x5e7   :  { %4364 = vmatpush1.bf16.msra.mxu1 %v6649_v27 }
 0x5e8   :  { %4365 = vmatprep.subr.bf16.mxu1 %v6654_v53 }
 0x5eb   :  { %4366 = vmatpush1.bf16.msra.mxu1 %v6652_v1 }
 0x5ec   :  { %4367 = vmatprep.subr.bf16.mxu1 %v6657_v0 }
 0x5ef   :  { %4368 = vmatpush1.bf16.msra.mxu1 %v6655_v30 }
 0x5f2   :  { %4370 = vmatmul.mubr.bf16.vlgmr.msra.gmra.mrb[88].mxu1 %v9137_v19 }
 0x6c5   :  { %v4371_v23 = vpop.f32.mrb[88].mxu1 }
 0x6c6   :  { %v6263_v11 = vadd.f32 %v4371_v23, %v3967_v52  ;;  %v4373_v21 = vpop.f32.mrb[89].mxu1 }
 0x6c7   :  { %v6264_v60 = vadd.f32 %v4373_v21, %v3971_v49  ;;  %v4375_v42 = vpop.f32.mrb[90].mxu1 }
 0x6c8   :  { %v4380_v25 = vmul.f32 0.01, %v6263_v11  ;;  %v6265_v9 = vadd.f32 %v4375_v42, %v3967_v52  ;;  %v4377_v28 = vpop.f32.mrb[91].mxu1 }
 0x6c9   :  { %v4381_v54 = vmul.f32 0.01, %v6264_v60  ;;  %v6266_v17 = vadd.f32 %v4377_v28, %v3971_v49 }
 0x6ca   :  { %v4382_v61 = vmul.f32 0.01, %v6265_v9  ;;  %v4384_v2 = vmax.f32 %v6263_v11, %v4380_v25 }
 0x6cb   :  { %v4383_v55 = vmul.f32 0.01, %v6266_v17  ;;  %v4385_v63 = vmax.f32 %v6264_v60, %v4381_v54 }
 0x6cc   :  { %v4386_v13 = vmax.f32 %v6265_v9, %v4382_v61 }
 0x6cd   :  { %v4387_v8 = vmax.f32 %v6266_v17, %v4383_v55 }
 0x6ce   :  { %v4388_v36 = vpack.c.bf16 %v4386_v13, %v4384_v2 }
 0x6cf   :  { %v4389_v18 = vpack.c.bf16 %v4387_v8, %v4385_v63 }
 0x6d1   :  { %4557 = vmatprep.mubr.bf16.mxu0 %v4389_v18 }
 0x6d2   :  { %4558 = vmatmul.mubr.bf16.vlgmr.msra.gmra.mrb[100].mxu0 %v4388_v36 }
 0x7a5   :  { %v5949_v40 = vpop.f32.mrb[100].mxu0 }
 0x7a6   :  { %v5950_v37 = vpop.f32.mrb[101].mxu0 }
 0x7a7   :  { %v5951_v19 = vadd.f32 %v5950_v37, %v5949_v40  ;;  %v5952_v14 = vpop.f32.mrb[102].mxu0 }
 0x7a8   :  { %v5953_v47 = vpop.f32.mrb[103].mxu0 }
 0x7a9   :  { %v4560_v41 = vadd.f32 %v5951_v19, %v5121_v16  ;;  %v5954_v15 = vadd.f32 %v5953_v47, %v5952_v14 }
 0x7ab   :  { %v4566_v12 = vmul.f32 0.01, %v4560_v41  ;;  %v4563_v7 = vadd.f32 %v5954_v15, %v5121_v16 }
 0x7ad   :  { %v4568_v24 = vmax.f32 %v4560_v41, %v4566_v12  ;;  %v4567_v48 = vmul.f32 0.01, %v4563_v7 }
 0x7af   :  { %4570 = vst.msk [vmem:[#allocation6] sm:$0xff] %vm540_vm15, %v4568_v24  ;;  %v4569_v32 = vmax.f32 %v4563_v7, %v4567_v48 }
 0x7b1   :  { %4571 = vst.msk [vmem:[#allocation6 + $0x8] sm:$0xff] %vm540_vm15, %v4569_v32 }
 0x7b2   :  { %6807 = shalt.err (!%p6804_p12)
}
 0x7b3   :  { %s6808_s25 = scalar_lea.hbm %s9283_s8, 256 }
 0x7b4   :  { %p6809_p13 = scmp.ne.s32.totalorder %s9283_s8, %s6808_s25  ;;  %p6812_p0 = scmp.lt.u32.totalorder %s6808_s25, %s9283_s8 }
 0x7b6   :  { %p6814_p1 = pnand %p6812_p0, %p6809_p13 }
 0x7b8   :  { %6817 = shalt.err (!%p6814_p1)
}
 0x7b9   :  { %s6847_s29 = smov 128   ;;  %s6848_s30 = smov 8  }
 0x7ba   :  { %4583 = dma.vmem_to_hbm [thread:$0]  %s4578_s2, 256, %s9283_s8, [#allocation5], %s6847_s29, %s6847_s29, %s6848_s30  }
 0x7bb   :  { %6820 = dma.done.wait [#allocation5], 256  }
 0x7bc   :  { %6821 = vsyncadd [#allocation5], 4294967040 }
 0x7bd   :  { %4587 = vsyncpa [#allocation4], 1 }
 0x7be   :  { %4588 = vsyncpa [#allocation5], 1 }

</bundles_post_ra>
